<compile_context>
chip_gen: v6e
topology: v6e:2x2x1
jax: 0.10.0
libtpu: 0.0.40
codegen_flags: <defaults>
</compile_context>

<pallas_src>
import jax
import jax.numpy as jnp
from jax import lax
from jax.experimental import pallas as pl
from jax.experimental.pallas import tpu as pltpu

# ----------------------------------------------------------------------------
# Small synthetic config consistent with the module
# ----------------------------------------------------------------------------
B = 2                       # batch
SEQ_LEN = 8                 # text sequence length (3 sentences for nl_input_ids)
EMBED_DIM = 32              # model_cfg.EMBED_DIM
HALF_DIM = EMBED_DIM // 2
NUM_CLASS = 16              # model_cfg.NUM_CLASS
VOCAB = 64                  # stand-in vocab for the frozen text model
C_IN, H_IN, W_IN = 4, 16, 16
IMG_IN_DIM = 2048           # self.img_in_dim for se_resnext50_32x4d

LN_EPS = 1e-5               # nn.LayerNorm default
BN_EPS = 1e-5               # nn.BatchNorm1d default
L2_EPS = 1e-12              # F.normalize default

# Tiny dots: HIGHEST precision is noise on the MXU at K<=224 but keeps the
# kernel numerically identical to the f32 reference (review item 9).
_MM_PRECISION = jax.lax.Precision.HIGHEST

# ---- packed-layout constants -------------------------------------------------
XIN_W = 4 * EMBED_DIM        # 128: [lang_raw | main_raw | pooled_c(pad) | pooled_m(pad)]
PACK_W = 7 * EMBED_DIM       # 224: widest packed matmul input (pass 3)
OUT_W = 256                  # single lane-dense output slab (multiple of 128)

# Rows of the vector slab (biases / LN / BN params), all zero-padded to _VEC_W.
_VEC_W = 160
(_R_B1, _R_B2, _R_B3, _R_B4, _R_B5, _R_B6,
 _R_LN_LANG_G, _R_LN_LANG_B, _R_LN_MAIN_G, _R_LN_MAIN_B,
 _R_LN_LCAR_G, _R_LN_LCAR_B, _R_LN_LMO_G, _R_LN_LMO_B,
 _R_VC_S, _R_VC_T, _R_VM_S, _R_VM_T) = range(18)
_N_VEC = 18

# Output slab layout (offset, width) in the fixed result order:
#   v_car, l_car, v_mo, l_mo, v_merge, l_merge, cls1, cls2, cls3, cls4
_OUT_SLICES = ((0, HALF_DIM), (16, HALF_DIM), (32, HALF_DIM), (48, HALF_DIM),
               (64, EMBED_DIM), (96, EMBED_DIM),
               (128, NUM_CLASS), (144, NUM_CLASS), (160, NUM_CLASS), (176, NUM_CLASS))
_OUT_USED = 192


# ----------------------------------------------------------------------------
# The single fused Pallas kernel: 6 block-packed MXU passes + VPU glue.
# ----------------------------------------------------------------------------
def _fused_forward_kernel(xin_ref, w1_ref, w2_ref, w3_ref, w4_ref, w56_ref,
                          vec_ref, out_ref, pack_ref):
    D, H2, NC = EMBED_DIM, HALF_DIM, NUM_CLASS
    f32 = jnp.float32

    def vec(row, width):                       # static (1, width) row of the vector slab
        return vec_ref[row:row + 1, 0:width]

    def mm(x, w):                              # MXU matmul, f32 accumulation
        return jnp.dot(x, w, preferred_element_type=f32, precision=_MM_PRECISION)

    def layernorm(x, g_row, b_row):
        mu = jnp.mean(x, axis=-1, keepdims=True)
        var = jnp.mean((x - mu) * (x - mu), axis=-1, keepdims=True)
        return (x - mu) * lax.rsqrt(var + LN_EPS) * vec(g_row, D) + vec(b_row, D)

    def l2norm(x):                             # F.normalize(p=2, dim=-1)
        n = jnp.sqrt(jnp.sum(x * x, axis=-1, keepdims=True))
        return x / jnp.maximum(n, L2_EPS)

    def relu(x):
        return jnp.maximum(x, 0.0)

    xin = xin_ref[...]                                               # (B, 128)
    bsz = xin.shape[0]

    # ---- pass 1: domian_lang_fc / domian_lang_main_fc layer-1  +  folded
    #              (backbone -> domian_vis_fc / _bk) for crops & motion --------
    pack_ref[:, 0:D] = layernorm(xin[:, 0:D], _R_LN_LANG_G, _R_LN_LANG_B)
    pack_ref[:, D:2 * D] = layernorm(xin[:, D:2 * D], _R_LN_MAIN_G, _R_LN_MAIN_B)
    pack_ref[:, 2 * D:4 * D] = xin[:, 2 * D:4 * D]                   # pooled crops/motion
    y1 = mm(pack_ref[:, 0:4 * D], w1_ref[...]) + vec(_R_B1, 4 * D)   # (B, 128)
    h_lang = relu(y1[:, 0:D])
    h_main = relu(y1[:, D:2 * D])
    visual_embeds = y1[:, 2 * D:3 * D]
    motion_embeds = y1[:, 3 * D:4 * D]

    # ---- pass 2: lang/main layer-2  +  vis_car_fc / vis_motion_fc ------------
    pack_ref[:, 0:D] = h_lang
    pack_ref[:, D:2 * D] = h_main
    pack_ref[:, 2 * D:3 * D] = relu(visual_embeds * vec(_R_VC_S, D) + vec(_R_VC_T, D))
    pack_ref[:, 3 * D:4 * D] = relu(motion_embeds * vec(_R_VM_S, D) + vec(_R_VM_T, D))
    y2 = mm(pack_ref[:, 0:4 * D], w2_ref[...]) + vec(_R_B2, 3 * D)   # (B, 96)
    lang_main_embeds = y2[:, 0:D]
    lang_embeds = y2[:, D:2 * D]
    visual_car = y2[:, 2 * D:2 * D + H2]
    visual_mo = y2[:, 2 * D + H2:3 * D]

    # ---- pass 3: merge layer-1 (lang & vis)  +  id_cls/id_cls2 layer-1
    #              +  lang_car_fc / lang_motion_fc -----------------------------
    pack_ref[:, 0:3 * D] = y2                                        # [l_main | l | vcar | vmo]
    pack_ref[:, 3 * D:4 * D] = visual_embeds
    pack_ref[:, 4 * D:5 * D] = motion_embeds
    pack_ref[:, 5 * D:6 * D] = relu(layernorm(lang_main_embeds, _R_LN_LCAR_G, _R_LN_LCAR_B))
    pack_ref[:, 6 * D:7 * D] = relu(layernorm(lang_embeds, _R_LN_LMO_G, _R_LN_LMO_B))
    y3 = mm(pack_ref[:, 0:7 * D], w3_ref[...]) + vec(_R_B3, 160)     # (B, 160)
    lang_car = y3[:, 4 * D:4 * D + H2]
    lang_mo = y3[:, 4 * D + H2:5 * D]

    # ---- pass 4: merge layer-2 (lang & vis)  +  id_cls/id_cls2 layer-2 -------
    y4 = mm(relu(y3[:, 0:4 * D]), w4_ref[...]) + vec(_R_B4, 3 * D)   # (B, 96)
    lang_merge = y4[:, 0:D]
    visual_merge = y4[:, D:2 * D]
    cls1 = y4[:, 2 * D:2 * D + NC]
    cls2 = y4[:, 2 * D + NC:2 * D + 2 * NC]

    # ---- pass 5/6: shared id_cls head on [lang_merge | visual_merge] ---------
    h5 = relu(mm(y4[:, 0:2 * D], w56_ref[:, 0:2 * D]) + vec(_R_B5, 2 * D))     # (B, 64)
    cls34 = mm(h5, w56_ref[:, 2 * D:2 * D + 2 * NC]) + vec(_R_B6, 2 * NC)      # (B, 32)

    # ---- single lane-dense (B, 256) output slab -------------------------------
    out_ref[:, 0:16] = l2norm(visual_car)
    out_ref[:, 16:32] = l2norm(lang_car)
    out_ref[:, 32:48] = l2norm(visual_mo)
    out_ref[:, 48:64] = l2norm(lang_mo)
    out_ref[:, 64:96] = l2norm(visual_merge)
    out_ref[:, 96:128] = l2norm(lang_merge)
    out_ref[:, 128:144] = cls1
    out_ref[:, 144:160] = cls2
    out_ref[:, 160:176] = cls34[:, 0:NC]        # id_cls_share(lang_merge_embeds)
    out_ref[:, 176:192] = cls34[:, NC:2 * NC]   # id_cls_share(visual_merge_embeds)
    out_ref[:, _OUT_USED:OUT_W] = jnp.zeros((bsz, OUT_W - _OUT_USED), f32)


def _run_fused(packed, xin):
    bsz = xin.shape[0]
    # No grid: every operand is a single full-array VMEM block (<0.5 MiB total),
    # one launch, one output DMA.
    return pl.pallas_call(
        _fused_forward_kernel,
        out_shape=jax.ShapeDtypeStruct((bsz, OUT_W), jnp.float32),
        scratch_shapes=[pltpu.VMEM((bsz, PACK_W), jnp.float32)],
    )(xin, packed["w1"], packed["w2"], packed["w3"], packed["w4"],
      packed["w56"], packed["vec"])


# ----------------------------------------------------------------------------
# Host-side parameter packing (slabs for the 6 block-packed passes)
# ----------------------------------------------------------------------------
def _block_matrix(shape, blocks):
    """Place (row_off, col_off, W) blocks into a zero matrix (off-blocks exactly 0)."""
    m = jnp.zeros(shape, jnp.float32)
    for r, c, w in blocks:
        m = m.at[r:r + w.shape[0], c:c + w.shape[1]].set(w)
    return m


def _vec_row(v):
    v = jnp.asarray(v, jnp.float32).reshape(1, -1)
    return jnp.pad(v, ((0, 0), (0, _VEC_W - v.shape[1])))


def pack_params(p):
    """Fold the linear backbone stand-in into domian_vis_fc and build the slabs."""
    D, H2, NC = EMBED_DIM, HALF_DIM, NUM_CLASS
    HI = jax.lax.Precision.HIGHEST

    # TODO(synk): exact only while the se_resnext50 stand-in is purely linear (GAP+Linear).
    w_vis = jnp.dot(p["bb_crop_w"], p["vis_fc_w"], precision=HI)                       # (4, 32)
    b_vis = jnp.dot(p["bb_crop_b"], p["vis_fc_w"], precision=HI) + p["vis_fc_b"]       # (1, 32)
    w_mo = jnp.dot(p["bb_motion_w"], p["vis_fc_bk_w"], precision=HI)
    b_mo = jnp.dot(p["bb_motion_b"], p["vis_fc_bk_w"], precision=HI) + p["vis_fc_bk_b"]

    # Pass 1: in  [LN(lang) | LN(main) | pooled_c(pad32) | pooled_m(pad32)]   (128)
    #         out [h_lang | h_main | visual_embeds | motion_embeds]           (128)
    w1 = _block_matrix((4 * D, 4 * D), [
        (0, 0, p["lang_fc_w1"]), (D, D, p["lang_main_fc_w1"]),
        (2 * D, 2 * D, w_vis), (3 * D, 3 * D, w_mo),
    ])
    b1 = jnp.concatenate([p["lang_fc_b1"], p["lang_main_fc_b1"], b_vis, b_mo], axis=-1)

    # Pass 2: in  [h_lang | h_main | relu(bn(vis)) | relu(bn(mot))]           (128)
    #         out [lang_main | lang | visual_car | visual_mo]                 (96)
    w2 = _block_matrix((4 * D, 3 * D), [
        (0, D, p["lang_fc_w2"]), (D, 0, p["lang_main_fc_w2"]),
        (2 * D, 2 * D, p["vis_car_w"]), (3 * D, 2 * D + H2, p["vis_mo_w"]),
    ])
    b2 = jnp.concatenate([p["lang_main_fc_b2"], p["lang_fc_b2"],
                          p["vis_car_b"], p["vis_mo_b"]], axis=-1)

    # Pass 3: in  [l_main | l | vcar | vmo | vis | mot | relu(LN(l_main)) | relu(LN(l))] (224)
    #         out [m_l | m_v | c1h | c2h | lang_car | lang_mo]                (160)
    w3 = _block_matrix((7 * D, 5 * D), [
        (0, 0, p["lang_merge_w1"]),            # cat([lang_main, lang]) -> merge L1
        (2 * D, D, p["vis_merge_w1"]),         # cat([visual_car, visual_mo]) -> merge L1
        (3 * D, 2 * D, p["id_cls_w1"]),
        (4 * D, 3 * D, p["id_cls2_w1"]),
        (5 * D, 4 * D, p["lang_car_w"]),
        (6 * D, 4 * D + H2, p["lang_mo_w"]),
    ])
    b3 = jnp.concatenate([p["lang_merge_b1"], p["vis_merge_b1"], p["id_cls_b1"],
                          p["id_cls2_b1"], p["lang_car_b"], p["lang_mo_b"]], axis=-1)

    # Pass 4: in  relu([m_l | m_v | c1h | c2h])                               (128)
    #         out [lang_merge | visual_merge | cls1 | cls2]                   (96)
    w4 = _block_matrix((4 * D, 3 * D), [
        (0, 0, p["lang_merge_w2"]), (D, D, p["vis_merge_w2"]),
        (2 * D, 2 * D, p["id_cls_w2"]), (3 * D, 2 * D + NC, p["id_cls2_w2"]),
    ])
    b4 = jnp.concatenate([p["lang_merge_b2"], p["vis_merge_b2"],
                          p["id_cls_b2"], p["id_cls2_b2"]], axis=-1)

    # Pass 5/6: shared id_cls head applied to both merge embeddings in one pass.
    w56 = _block_matrix((2 * D, 2 * D + 2 * NC), [
        (0, 0, p["id_cls_share_w1"]), (D, D, p["id_cls_share_w1"]),
        (0, 2 * D, p["id_cls_share_w2"]), (D, 2 * D + NC, p["id_cls_share_w2"]),
    ])
    b5 = jnp.concatenate([p["id_cls_share_b1"], p["id_cls_share_b1"]], axis=-1)
    b6 = jnp.concatenate([p["id_cls_share_b2"], p["id_cls_share_b2"]], axis=-1)

    vec = jnp.concatenate([_vec_row(v) for v in (
        b1, b2, b3, b4, b5, b6,
        p["lang_fc_ln_g"], p["lang_fc_ln_b"],
        p["lang_main_fc_ln_g"], p["lang_main_fc_ln_b"],
        p["lang_car_ln_g"], p["lang_car_ln_b"],
        p["lang_mo_ln_g"], p["lang_mo_ln_b"],
        p["vis_car_s"], p["vis_car_t"], p["vis_mo_s"], p["vis_mo_t"],
    )], axis=0)
    assert vec.shape == (_N_VEC, _VEC_W)

    return {"tok_emb": p["tok_emb"], "logit_scale": p["logit_scale"],
            "w1": w1, "w2": w2, "w3": w3, "w4": w4, "w56": w56, "vec": vec}


# ----------------------------------------------------------------------------
# Parameter init (PyTorch nn.Linear-style uniform; BN in eval mode, folded)
# ----------------------------------------------------------------------------
def _linear_init(key, fan_in, fan_out):
    kw, kb = jax.random.split(key)
    bound = 1.0 / (fan_in ** 0.5)
    w = jax.random.uniform(kw, (fan_in, fan_out), jnp.float32, -bound, bound)
    b = jax.random.uniform(kb, (1, fan_out), jnp.float32, -bound, bound)
    return w, b


def init_params(key):
    keys = iter(jax.random.split(key, 32))
    D, H2, NC = EMBED_DIM, HALF_DIM, NUM_CLASS
    p = {}

    def linear(fan_in, fan_out):
        return _linear_init(next(keys), fan_in, fan_out)

    def bn_affine(dim):
        # TODO(synk): BatchNorm1d implemented in eval mode (running stats);
        # PyTorch defaults gamma=1, beta=0, running_mean=0, running_var=1.
        gamma = jnp.ones((1, dim), jnp.float32)
        beta = jnp.zeros((1, dim), jnp.float32)
        rm = jnp.zeros((1, dim), jnp.float32)
        rv = jnp.ones((1, dim), jnp.float32)
        scale = gamma / jnp.sqrt(rv + BN_EPS)
        shift = beta - rm * scale
        return scale, shift

    def ln_params(dim):
        return jnp.ones((1, dim), jnp.float32), jnp.zeros((1, dim), jnp.float32)

    # TODO(synk): frozen pretrained bert_model stood in by a token-embedding table.
    p["tok_emb"] = 0.02 * jax.random.normal(next(keys), (VOCAB, EMBED_DIM), jnp.float32)

    # TODO(synk): pretrained se_resnext50 backbones stood in by GAP + Linear(C_IN, 2048).
    p["bb_crop_w"], p["bb_crop_b"] = linear(C_IN, IMG_IN_DIM)
    p["bb_motion_w"], p["bb_motion_b"] = linear(C_IN, IMG_IN_DIM)

    # domian_vis_fc / domian_vis_fc_bk: Conv2d(2048, D, kernel_size=1) on a 1x1 map
    p["vis_fc_w"], p["vis_fc_b"] = linear(IMG_IN_DIM, D)
    p["vis_fc_bk_w"], p["vis_fc_bk_b"] = linear(IMG_IN_DIM, D)

    # domian_lang_fc / domian_lang_main_fc: LN -> Linear -> ReLU -> Linear
    for name in ("lang_fc", "lang_main_fc"):
        p[f"{name}_ln_g"], p[f"{name}_ln_b"] = ln_params(D)
        p[f"{name}_w1"], p[f"{name}_b1"] = linear(D, D)
        p[f"{name}_w2"], p[f"{name}_b2"] = linear(D, D)

    # domian_lang_fc_merge: Linear(2D,D) -> BN -> ReLU -> Linear(D,D) (BN folded into L1)
    w1, b1 = linear(2 * D, D)
    s, t = bn_affine(D)
    p["lang_merge_w1"], p["lang_merge_b1"] = w1 * s, b1 * s + t
    p["lang_merge_w2"], p["lang_merge_b2"] = linear(D, D)

    # domian_vis_fc_merge: Linear(D,D) -> BN -> ReLU -> Linear(D,D) (BN folded into L1)
    w1, b1 = linear(D, D)
    s, t = bn_affine(D)
    p["vis_merge_w1"], p["vis_merge_b1"] = w1 * s, b1 * s + t
    p["vis_merge_w2"], p["vis_merge_b2"] = linear(D, D)

    # vis_car_fc / vis_motion_fc: BN -> ReLU -> Linear(D, D/2) (BN as per-feature affine)
    for name in ("vis_car", "vis_mo"):
        p[f"{name}_s"], p[f"{name}_t"] = bn_affine(D)
        p[f"{name}_w"], p[f"{name}_b"] = linear(D, H2)

    # lang_car_fc / lang_motion_fc: LN -> ReLU -> Linear(D, D/2)
    for name in ("lang_car", "lang_mo"):
        p[f"{name}_ln_g"], p[f"{name}_ln_b"] = ln_params(D)
        p[f"{name}_w"], p[f"{name}_b"] = linear(D, H2)

    # id_cls / id_cls2 / id_cls_share: Linear(D,D) -> BN -> ReLU -> Linear(D, NC) (BN folded)
    for name in ("id_cls", "id_cls2", "id_cls_share"):
        w1, b1 = linear(D, D)
        s, t = bn_affine(D)
        p[f"{name}_w1"], p[f"{name}_b1"] = w1 * s, b1 * s + t
        p[f"{name}_w2"], p[f"{name}_b2"] = linear(D, NC)

    p["logit_scale"] = jnp.ones((), jnp.float32)   # nn.Parameter(torch.ones(()))
    return p


# ----------------------------------------------------------------------------
# Wrapper: stand-in pretrained stages + data packing around the fused kernel
# ----------------------------------------------------------------------------
def _prepare_inputs(tok_emb, nl_input_ids, nl_main_input_ids, crops, motion):
    bsz = crops.shape[0]
    # TODO(synk): frozen pretrained bert_model stood in by an embedding lookup;
    # torch.mean over dims [1,2] == mean over all 3*L tokens.
    lang_raw = jnp.mean(jnp.take(tok_emb, nl_input_ids.reshape(bsz, -1), axis=0), axis=1)
    main_raw = jnp.mean(jnp.take(tok_emb, nl_main_input_ids, axis=0), axis=1)
    # TODO(synk): se_resnext50 backbones stood in by GAP + Linear(C_IN, 2048); the GAP
    # half happens here, the Linear half is folded into domian_vis_fc on the host.
    pooled_c = jnp.mean(crops.reshape(bsz, crops.shape[1], -1), axis=-1)      # (B, C_IN)
    pooled_m = jnp.mean(motion.reshape(bsz, motion.shape[1], -1), axis=-1)
    return lang_raw, main_raw, pooled_c, pooled_m


def _pack_data(lang_raw, main_raw, pooled_c, pooled_m):
    def pad32(x):
        return jnp.pad(x, ((0, 0), (0, EMBED_DIM - x.shape[1])))
    return jnp.concatenate(
        [lang_raw, main_raw, pad32(pooled_c), pad32(pooled_m)], axis=-1).astype(jnp.float32)


def _unpack_outputs(packed_out):
    return tuple(packed_out[:, off:off + w] for off, w in _OUT_SLICES)


def _package(outs, logit_scale):
    (v_car, l_car, v_mo, l_mo, v_merge, l_merge, c1, c2, c3, c4) = outs
    return ([(v_car, l_car), (v_mo, l_mo), (v_merge, l_merge)],
            logit_scale, [c1, c2, c3, c4])


def siamese_forward(packed_params, nl_input_ids, nl_attention_mask,
                    nl_motion_input_ids, nl_motion_attention_mask,
                    nl_main_input_ids, nl_main_attention_mask,
                    crops, motion, boxes_points):
    # nl_motion_* and boxes_points appear in the PyTorch signature but are unused
    # by forward(); attention masks only feed the frozen (stand-in) BERT.
    del nl_attention_mask, nl_motion_input_ids, nl_motion_attention_mask
    del nl_main_attention_mask, boxes_points
    lang_raw, main_raw, pooled_c, pooled_m = _prepare_inputs(
        packed_params["tok_emb"], nl_input_ids, nl_main_input_ids, crops, motion)
    xin = _pack_data(lang_raw, main_raw, pooled_c, pooled_m)
    outs = _unpack_outputs(_run_fused(packed_params, xin))
    return _package(outs, packed_params["logit_scale"])


# ----------------------------------------------------------------------------
# Pure-jnp reference of the original (unfolded, per-layer) module math
# ----------------------------------------------------------------------------
def _forward_math_ref(lang_raw, main_raw, pooled_c, pooled_m, p):
    def lin(x, wk, bk):
        return jnp.dot(x, p[wk], precision=_MM_PRECISION,
                       preferred_element_type=jnp.float32) + p[bk]

    def ln(x, gk, bk):
        mu = jnp.mean(x, axis=-1, keepdims=True)
        var = jnp.mean((x - mu) * (x - mu), axis=-1, keepdims=True)
        return (x - mu) * lax.rsqrt(var + LN_EPS) * p[gk] + p[bk]

    def l2(x):
        n = jnp.sqrt(jnp.sum(x * x, axis=-1, keepdims=True))
        return x / jnp.maximum(n, L2_EPS)

    relu = lambda x: jnp.maximum(x, 0.0)

    lang_embeds = lin(relu(lin(ln(lang_raw, "lang_fc_ln_g", "lang_fc_ln_b"),
                               "lang_fc_w1", "lang_fc_b1")), "lang_fc_w2", "lang_fc_b2")
    lang_main_embeds = lin(relu(lin(ln(main_raw, "lang_main_fc_ln_g", "lang_main_fc_ln_b"),
                                    "lang_main_fc_w1", "lang_main_fc_b1")),
                           "lang_main_fc_w2", "lang_main_fc_b2")
    lang_merge = lin(relu(lin(jnp.concatenate([lang_main_embeds, lang_embeds], axis=-1),
                              "lang_merge_w1", "lang_merge_b1")),
                     "lang_merge_w2", "lang_merge_b2")

    visual_embeds = lin(lin(pooled_c, "bb_crop_w", "bb_crop_b"), "vis_fc_w", "vis_fc_b")
    motion_embeds = lin(lin(pooled_m, "bb_motion_w", "bb_motion_b"), "vis_fc_bk_w", "vis_fc_bk_b")
    visual_car = lin(relu(visual_embeds * p["vis_car_s"] + p["vis_car_t"]),
                     "vis_car_w", "vis_car_b")
    visual_mo = lin(relu(motion_embeds * p["vis_mo_s"] + p["vis_mo_t"]),
                    "vis_mo_w", "vis_mo_b")
    visual_merge = lin(relu(lin(jnp.concatenate([visual_car, visual_mo], axis=-1),
                                "vis_merge_w1", "vis_merge_b1")),
                       "vis_merge_w2", "vis_merge_b2")

    cls1 = lin(relu(lin(visual_embeds, "id_cls_w1", "id_cls_b1")), "id_cls_w2", "id_cls_b2")
    cls2 = lin(relu(lin(motion_embeds, "id_cls2_w1", "id_cls2_b1")), "id_cls2_w2", "id_cls2_b2")
    cls3 = lin(relu(lin(lang_merge, "id_cls_share_w1", "id_cls_share_b1")),
               "id_cls_share_w2", "id_cls_share_b2")
    cls4 = lin(relu(lin(visual_merge, "id_cls_share_w1", "id_cls_share_b1")),
               "id_cls_share_w2", "id_cls_share_b2")

    lang_car = lin(relu(ln(lang_main_embeds, "lang_car_ln_g", "lang_car_ln_b")),
                   "lang_car_w", "lang_car_b")
    lang_mo = lin(relu(ln(lang_embeds, "lang_mo_ln_g", "lang_mo_ln_b")),
                  "lang_mo_w", "lang_mo_b")

    return (l2(visual_car), l2(lang_car), l2(visual_mo), l2(lang_mo),
            l2(visual_merge), l2(lang_merge), cls1, cls2, cls3, cls4)


def siamese_forward_ref(params, nl_input_ids, nl_attention_mask,
                        nl_motion_input_ids, nl_motion_attention_mask,
                        nl_main_input_ids, nl_main_attention_mask,
                        crops, motion, boxes_points):
    del nl_attention_mask, nl_motion_input_ids, nl_motion_attention_mask
    del nl_main_attention_mask, boxes_points
    lang_raw, main_raw, pooled_c, pooled_m = _prepare_inputs(
        params["tok_emb"], nl_input_ids, nl_main_input_ids, crops, motion)
    outs = _forward_math_ref(lang_raw, main_raw, pooled_c, pooled_m, params)
    return _package(outs, params["logit_scale"])


# ----------------------------------------------------------------------------
if __name__ == "__main__":
    key = jax.random.PRNGKey(0)
    (k_params, k_ids, k_mids, k_main, k_crops, k_motion, k_boxes) = jax.random.split(key, 7)

    params = init_params(k_params)
    packed = pack_params(params)          # host-side: fold backbone + build the 6 slabs

    nl_input_ids = jax.random.randint(k_ids, (B, 3, SEQ_LEN), 0, VOCAB, dtype=jnp.int32)
    nl_attention_mask = jnp.ones((B, 3, SEQ_LEN), jnp.int32)
    nl_motion_input_ids = jax.random.randint(k_mids, (B, SEQ_LEN), 0, VOCAB, dtype=jnp.int32)
    nl_motion_attention_mask = jnp.ones((B, SEQ_LEN), jnp.int32)
    nl_main_input_ids = jax.random.randint(k_main, (B, SEQ_LEN), 0, VOCAB, dtype=jnp.int32)
    nl_main_attention_mask = jnp.ones((B, SEQ_LEN), jnp.int32)
    crops = jax.random.normal(k_crops, (B, C_IN, H_IN, W_IN), jnp.float32)
    motion = jax.random.normal(k_motion, (B, C_IN, H_IN, W_IN), jnp.float32)
    boxes_points = jax.random.normal(k_boxes, (B, 10, 2), jnp.float32)

    args = (nl_input_ids, nl_attention_mask, nl_motion_input_ids, nl_motion_attention_mask,
            nl_main_input_ids, nl_main_attention_mask, crops, motion, boxes_points)

    out = jax.jit(siamese_forward)(packed, *args)
    out = jax.block_until_ready(out)

    pairs, logit_scale, cls_logits = out
    assert len(pairs) == 3 and len(cls_logits) == 4
    assert pairs[0][0].shape == (B, HALF_DIM) and pairs[0][1].shape == (B, HALF_DIM)
    assert pairs[1][0].shape == (B, HALF_DIM) and pairs[1][1].shape == (B, HALF_DIM)
    assert pairs[2][0].shape == (B, EMBED_DIM) and pairs[2][1].shape == (B, EMBED_DIM)
    assert all(c.shape == (B, NUM_CLASS) for c in cls_logits)
    assert logit_scale.shape == ()

    # Numeric check: fused/block-packed/folded kernel vs unfolded per-layer reference.
    ref = siamese_forward_ref(params, *args)
    for got, want in zip(jax.tree_util.tree_leaves(out), jax.tree_util.tree_leaves(ref)):
        assert jnp.allclose(got, want, atol=1e-2, rtol=1e-2), \
            f"mismatch: max abs err {float(jnp.max(jnp.abs(got - want)))}"

    print("KERNEL_OK")
</pallas_src>

<mosaic_0001>
module attributes {stable_mosaic.version = 11 : i64} {
  func.func @_fused_forward_kernel(%arg0: memref<2x128xf32, #tpu.memory_space<vmem>>, %arg1: memref<128x128xf32, #tpu.memory_space<vmem>>, %arg2: memref<128x96xf32, #tpu.memory_space<vmem>>, %arg3: memref<224x160xf32, #tpu.memory_space<vmem>>, %arg4: memref<128x96xf32, #tpu.memory_space<vmem>>, %arg5: memref<64x96xf32, #tpu.memory_space<vmem>>, %arg6: memref<18x160xf32, #tpu.memory_space<vmem>>, %arg7: memref<2x256xf32, #tpu.memory_space<vmem>>, %arg8: memref<2x224xf32, #tpu.memory_space<vmem>>) attributes {dimension_semantics = [], scalar_prefetch = 0 : i64, scratch_operands = 1 : i64, tpu.core_type = #tpu.core_type<tc>} {
    %c0 = arith.constant 0 : index
    %c0_0 = arith.constant 0 : index
    %0 = vector.load %arg0[%c0, %c0_0] : memref<2x128xf32, #tpu.memory_space<vmem>>, vector<2x128xf32>
    %1 = vector.extract_strided_slice %0 {offsets = [0, 0], sizes = [2, 32], strides = [1, 1]} : vector<2x128xf32> to vector<2x32xf32>
    %cst = arith.constant dense<0.000000e+00> : vector<2xf32>
    %2 = vector.multi_reduction <add>, %1, %cst [1] : vector<2x32xf32> to vector<2xf32>
    %3 = vector.shape_cast %2 : vector<2xf32> to vector<2x1xf32>
    %cst_1 = arith.constant 3.200000e+01 : f32
    %4 = vector.broadcast %cst_1 : f32 to vector<2x1xf32>
    %5 = arith.divf %3, %4 : vector<2x1xf32>
    %6 = vector.broadcast %5 : vector<2x1xf32> to vector<2x32xf32>
    %7 = arith.subf %1, %6 : vector<2x32xf32>
    %8 = vector.broadcast %5 : vector<2x1xf32> to vector<2x32xf32>
    %9 = arith.subf %1, %8 : vector<2x32xf32>
    %10 = arith.mulf %7, %9 : vector<2x32xf32>
    %cst_2 = arith.constant dense<0.000000e+00> : vector<2xf32>
    %11 = vector.multi_reduction <add>, %10, %cst_2 [1] : vector<2x32xf32> to vector<2xf32>
    %12 = vector.shape_cast %11 : vector<2xf32> to vector<2x1xf32>
    %cst_3 = arith.constant 3.200000e+01 : f32
    %13 = vector.broadcast %cst_3 : f32 to vector<2x1xf32>
    %14 = arith.divf %12, %13 : vector<2x1xf32>
    %15 = vector.broadcast %5 : vector<2x1xf32> to vector<2x32xf32>
    %16 = arith.subf %1, %15 : vector<2x32xf32>
    %cst_4 = arith.constant 9.99999974E-6 : f32
    %17 = vector.broadcast %cst_4 : f32 to vector<2x1xf32>
    %18 = arith.addf %14, %17 : vector<2x1xf32>
    %19 = math.rsqrt %18 : vector<2x1xf32>
    %20 = vector.broadcast %19 : vector<2x1xf32> to vector<2x32xf32>
    %21 = arith.mulf %16, %20 : vector<2x32xf32>
    %c6 = arith.constant 6 : index
    %c0_5 = arith.constant 0 : index
    %22 = vector.load %arg6[%c6, %c0_5] : memref<18x160xf32, #tpu.memory_space<vmem>>, vector<1x32xf32>
    %23 = vector.broadcast %22 : vector<1x32xf32> to vector<2x32xf32>
    %24 = arith.mulf %21, %23 : vector<2x32xf32>
    %c7 = arith.constant 7 : index
    %c0_6 = arith.constant 0 : index
    %25 = vector.load %arg6[%c7, %c0_6] : memref<18x160xf32, #tpu.memory_space<vmem>>, vector<1x32xf32>
    %26 = vector.broadcast %25 : vector<1x32xf32> to vector<2x32xf32>
    %27 = arith.addf %24, %26 : vector<2x32xf32>
    %c0_7 = arith.constant 0 : index
    %c0_8 = arith.constant 0 : index
    %28 = vector.load %arg8[%c0_7, %c0_8] : memref<2x224xf32, #tpu.memory_space<vmem>>, vector<2x32xf32>
    tpu.vector_store %arg8[%c0_7, %c0_8], %27 {strides = array<i32>} : memref<2x224xf32, #tpu.memory_space<vmem>>, vector<2x32xf32>,
    %29 = vector.extract_strided_slice %0 {offsets = [0, 32], sizes = [2, 32], strides = [1, 1]} : vector<2x128xf32> to vector<2x32xf32>
    %cst_9 = arith.constant dense<0.000000e+00> : vector<2xf32>
    %30 = vector.multi_reduction <add>, %29, %cst_9 [1] : vector<2x32xf32> to vector<2xf32>
    %31 = vector.shape_cast %30 : vector<2xf32> to vector<2x1xf32>
    %cst_10 = arith.constant 3.200000e+01 : f32
    %32 = vector.broadcast %cst_10 : f32 to vector<2x1xf32>
    %33 = arith.divf %31, %32 : vector<2x1xf32>
    %34 = vector.broadcast %33 : vector<2x1xf32> to vector<2x32xf32>
    %35 = arith.subf %29, %34 : vector<2x32xf32>
    %36 = vector.broadcast %33 : vector<2x1xf32> to vector<2x32xf32>
    %37 = arith.subf %29, %36 : vector<2x32xf32>
    %38 = arith.mulf %35, %37 : vector<2x32xf32>
    %cst_11 = arith.constant dense<0.000000e+00> : vector<2xf32>
    %39 = vector.multi_reduction <add>, %38, %cst_11 [1] : vector<2x32xf32> to vector<2xf32>
    %40 = vector.shape_cast %39 : vector<2xf32> to vector<2x1xf32>
    %cst_12 = arith.constant 3.200000e+01 : f32
    %41 = vector.broadcast %cst_12 : f32 to vector<2x1xf32>
    %42 = arith.divf %40, %41 : vector<2x1xf32>
    %43 = vector.broadcast %33 : vector<2x1xf32> to vector<2x32xf32>
    %44 = arith.subf %29, %43 : vector<2x32xf32>
    %cst_13 = arith.constant 9.99999974E-6 : f32
    %45 = vector.broadcast %cst_13 : f32 to vector<2x1xf32>
    %46 = arith.addf %42, %45 : vector<2x1xf32>
    %47 = math.rsqrt %46 : vector<2x1xf32>
    %48 = vector.broadcast %47 : vector<2x1xf32> to vector<2x32xf32>
    %49 = arith.mulf %44, %48 : vector<2x32xf32>
    %c8 = arith.constant 8 : index
    %c0_14 = arith.constant 0 : index
    %50 = vector.load %arg6[%c8, %c0_14] : memref<18x160xf32, #tpu.memory_space<vmem>>, vector<1x32xf32>
    %51 = vector.broadcast %50 : vector<1x32xf32> to vector<2x32xf32>
    %52 = arith.mulf %49, %51 : vector<2x32xf32>
    %c9 = arith.constant 9 : index
    %c0_15 = arith.constant 0 : index
    %53 = vector.load %arg6[%c9, %c0_15] : memref<18x160xf32, #tpu.memory_space<vmem>>, vector<1x32xf32>
    %54 = vector.broadcast %53 : vector<1x32xf32> to vector<2x32xf32>
    %55 = arith.addf %52, %54 : vector<2x32xf32>
    %c0_16 = arith.constant 0 : index
    %c32 = arith.constant 32 : index
    %56 = vector.load %arg8[%c0_16, %c32] : memref<2x224xf32, #tpu.memory_space<vmem>>, vector<2x32xf32>
    tpu.vector_store %arg8[%c0_16, %c32], %55 {strides = array<i32>} : memref<2x224xf32, #tpu.memory_space<vmem>>, vector<2x32xf32>,
    %57 = vector.extract_strided_slice %0 {offsets = [0, 64], sizes = [2, 64], strides = [1, 1]} : vector<2x128xf32> to vector<2x64xf32>
    %c0_17 = arith.constant 0 : index
    %c64 = arith.constant 64 : index
    %58 = vector.load %arg8[%c0_17, %c64] : memref<2x224xf32, #tpu.memory_space<vmem>>, vector<2x64xf32>
    tpu.vector_store %arg8[%c0_17, %c64], %57 {strides = array<i32>} : memref<2x224xf32, #tpu.memory_space<vmem>>, vector<2x64xf32>,
    %c0_18 = arith.constant 0 : index
    %c0_19 = arith.constant 0 : index
    %59 = vector.load %arg8[%c0_18, %c0_19] : memref<2x224xf32, #tpu.memory_space<vmem>>, vector<2x128xf32>
    %c0_20 = arith.constant 0 : index
    %c0_21 = arith.constant 0 : index
    %60 = vector.load %arg1[%c0_20, %c0_21] : memref<128x128xf32, #tpu.memory_space<vmem>>, vector<128x128xf32>
    %cst_22 = arith.constant dense<0.000000e+00> : vector<2x128xf32>
    %61 = tpu.matmul %59, %60, %cst_22 {dimension_numbers = #tpu.dot_dimension_numbers<[1], [0], [0], [1], [0, 0, 1, 1], [], []>, precision = #tpu.contract_precision<fp32>} : vector<2x128xf32>, vector<128x128xf32>, vector<2x128xf32> -> vector<2x128xf32>
    %c0_23 = arith.constant 0 : index
    %c0_24 = arith.constant 0 : index
    %62 = vector.load %arg6[%c0_23, %c0_24] : memref<18x160xf32, #tpu.memory_space<vmem>>, vector<1x128xf32>
    %63 = vector.broadcast %62 : vector<1x128xf32> to vector<2x128xf32>
    %64 = arith.addf %61, %63 : vector<2x128xf32>
    %65 = vector.extract_strided_slice %64 {offsets = [0, 0], sizes = [2, 32], strides = [1, 1]} : vector<2x128xf32> to vector<2x32xf32>
    %cst_25 = arith.constant 0.000000e+00 : f32
    %66 = vector.broadcast %cst_25 : f32 to vector<2x32xf32>
    %67 = arith.maximumf %65, %66 : vector<2x32xf32>
    %68 = vector.extract_strided_slice %64 {offsets = [0, 32], sizes = [2, 32], strides = [1, 1]} : vector<2x128xf32> to vector<2x32xf32>
    %cst_26 = arith.constant 0.000000e+00 : f32
    %69 = vector.broadcast %cst_26 : f32 to vector<2x32xf32>
    %70 = arith.maximumf %68, %69 : vector<2x32xf32>
    %71 = vector.extract_strided_slice %64 {offsets = [0, 64], sizes = [2, 32], strides = [1, 1]} : vector<2x128xf32> to vector<2x32xf32>
    %72 = vector.extract_strided_slice %64 {offsets = [0, 96], sizes = [2, 32], strides = [1, 1]} : vector<2x128xf32> to vector<2x32xf32>
    %c0_27 = arith.constant 0 : index
    %c0_28 = arith.constant 0 : index
    %73 = vector.load %arg8[%c0_27, %c0_28] : memref<2x224xf32, #tpu.memory_space<vmem>>, vector<2x32xf32>
    tpu.vector_store %arg8[%c0_27, %c0_28], %67 {strides = array<i32>} : memref<2x224xf32, #tpu.memory_space<vmem>>, vector<2x32xf32>,
    %c0_29 = arith.constant 0 : index
    %c32_30 = arith.constant 32 : index
    %74 = vector.load %arg8[%c0_29, %c32_30] : memref<2x224xf32, #tpu.memory_space<vmem>>, vector<2x32xf32>
    tpu.vector_store %arg8[%c0_29, %c32_30], %70 {strides = array<i32>} : memref<2x224xf32, #tpu.memory_space<vmem>>, vector<2x32xf32>,
    %c14 = arith.constant 14 : index
    %c0_31 = arith.constant 0 : index
    %75 = vector.load %arg6[%c14, %c0_31] : memref<18x160xf32, #tpu.memory_space<vmem>>, vector<1x32xf32>
    %76 = vector.broadcast %75 : vector<1x32xf32> to vector<2x32xf32>
    %77 = arith.mulf %71, %76 : vector<2x32xf32>
    %c15 = arith.constant 15 : index
    %c0_32 = arith.constant 0 : index
    %78 = vector.load %arg6[%c15, %c0_32] : memref<18x160xf32, #tpu.memory_space<vmem>>, vector<1x32xf32>
    %79 = vector.broadcast %78 : vector<1x32xf32> to vector<2x32xf32>
    %80 = arith.addf %77, %79 : vector<2x32xf32>
    %cst_33 = arith.constant 0.000000e+00 : f32
    %81 = vector.broadcast %cst_33 : f32 to vector<2x32xf32>
    %82 = arith.maximumf %80, %81 : vector<2x32xf32>
    %c0_34 = arith.constant 0 : index
    %c64_35 = arith.constant 64 : index
    %83 = vector.load %arg8[%c0_34, %c64_35] : memref<2x224xf32, #tpu.memory_space<vmem>>, vector<2x32xf32>
    tpu.vector_store %arg8[%c0_34, %c64_35], %82 {strides = array<i32>} : memref<2x224xf32, #tpu.memory_space<vmem>>, vector<2x32xf32>,
    %c16 = arith.constant 16 : index
    %c0_36 = arith.constant 0 : index
    %84 = vector.load %arg6[%c16, %c0_36] : memref<18x160xf32, #tpu.memory_space<vmem>>, vector<1x32xf32>
    %85 = vector.broadcast %84 : vector<1x32xf32> to vector<2x32xf32>
    %86 = arith.mulf %72, %85 : vector<2x32xf32>
    %c17 = arith.constant 17 : index
    %c0_37 = arith.constant 0 : index
    %87 = vector.load %arg6[%c17, %c0_37] : memref<18x160xf32, #tpu.memory_space<vmem>>, vector<1x32xf32>
    %88 = vector.broadcast %87 : vector<1x32xf32> to vector<2x32xf32>
    %89 = arith.addf %86, %88 : vector<2x32xf32>
    %cst_38 = arith.constant 0.000000e+00 : f32
    %90 = vector.broadcast %cst_38 : f32 to vector<2x32xf32>
    %91 = arith.maximumf %89, %90 : vector<2x32xf32>
    %c0_39 = arith.constant 0 : index
    %c96 = arith.constant 96 : index
    %92 = vector.load %arg8[%c0_39, %c96] : memref<2x224xf32, #tpu.memory_space<vmem>>, vector<2x32xf32>
    tpu.vector_store %arg8[%c0_39, %c96], %91 {strides = array<i32>} : memref<2x224xf32, #tpu.memory_space<vmem>>, vector<2x32xf32>,
    %c0_40 = arith.constant 0 : index
    %c0_41 = arith.constant 0 : index
    %93 = vector.load %arg8[%c0_40, %c0_41] : memref<2x224xf32, #tpu.memory_space<vmem>>, vector<2x128xf32>
    %c0_42 = arith.constant 0 : index
    %c0_43 = arith.constant 0 : index
    %94 = vector.load %arg2[%c0_42, %c0_43] : memref<128x96xf32, #tpu.memory_space<vmem>>, vector<128x96xf32>
    %cst_44 = arith.constant dense<0.000000e+00> : vector<2x96xf32>
    %95 = tpu.matmul %93, %94, %cst_44 {dimension_numbers = #tpu.dot_dimension_numbers<[1], [0], [0], [1], [0, 0, 1, 1], [], []>, precision = #tpu.contract_precision<fp32>} : vector<2x128xf32>, vector<128x96xf32>, vector<2x96xf32> -> vector<2x96xf32>
    %c1 = arith.constant 1 : index
    %c0_45 = arith.constant 0 : index
    %96 = vector.load %arg6[%c1, %c0_45] : memref<18x160xf32, #tpu.memory_space<vmem>>, vector<1x96xf32>
    %97 = vector.broadcast %96 : vector<1x96xf32> to vector<2x96xf32>
    %98 = arith.addf %95, %97 : vector<2x96xf32>
    %99 = vector.extract_strided_slice %98 {offsets = [0, 0], sizes = [2, 32], strides = [1, 1]} : vector<2x96xf32> to vector<2x32xf32>
    %100 = vector.extract_strided_slice %98 {offsets = [0, 32], sizes = [2, 32], strides = [1, 1]} : vector<2x96xf32> to vector<2x32xf32>
    %101 = vector.extract_strided_slice %98 {offsets = [0, 64], sizes = [2, 16], strides = [1, 1]} : vector<2x96xf32> to vector<2x16xf32>
    %102 = vector.extract_strided_slice %98 {offsets = [0, 80], sizes = [2, 16], strides = [1, 1]} : vector<2x96xf32> to vector<2x16xf32>
    %c0_46 = arith.constant 0 : index
    %c0_47 = arith.constant 0 : index
    %103 = vector.load %arg8[%c0_46, %c0_47] : memref<2x224xf32, #tpu.memory_space<vmem>>, vector<2x96xf32>
    tpu.vector_store %arg8[%c0_46, %c0_47], %98 {strides = array<i32>} : memref<2x224xf32, #tpu.memory_space<vmem>>, vector<2x96xf32>,
    %c0_48 = arith.constant 0 : index
    %c96_49 = arith.constant 96 : index
    %104 = vector.load %arg8[%c0_48, %c96_49] : memref<2x224xf32, #tpu.memory_space<vmem>>, vector<2x32xf32>
    tpu.vector_store %arg8[%c0_48, %c96_49], %71 {strides = array<i32>} : memref<2x224xf32, #tpu.memory_space<vmem>>, vector<2x32xf32>,
    %c0_50 = arith.constant 0 : index
    %c128 = arith.constant 128 : index
    %105 = vector.load %arg8[%c0_50, %c128] : memref<2x224xf32, #tpu.memory_space<vmem>>, vector<2x32xf32>
    tpu.vector_store %arg8[%c0_50, %c128], %72 {strides = array<i32>} : memref<2x224xf32, #tpu.memory_space<vmem>>, vector<2x32xf32>,
    %cst_51 = arith.constant dense<0.000000e+00> : vector<2xf32>
    %106 = vector.multi_reduction <add>, %99, %cst_51 [1] : vector<2x32xf32> to vector<2xf32>
    %107 = vector.shape_cast %106 : vector<2xf32> to vector<2x1xf32>
    %cst_52 = arith.constant 3.200000e+01 : f32
    %108 = vector.broadcast %cst_52 : f32 to vector<2x1xf32>
    %109 = arith.divf %107, %108 : vector<2x1xf32>
    %110 = vector.broadcast %109 : vector<2x1xf32> to vector<2x32xf32>
    %111 = arith.subf %99, %110 : vector<2x32xf32>
    %112 = vector.broadcast %109 : vector<2x1xf32> to vector<2x32xf32>
    %113 = arith.subf %99, %112 : vector<2x32xf32>
    %114 = arith.mulf %111, %113 : vector<2x32xf32>
    %cst_53 = arith.constant dense<0.000000e+00> : vector<2xf32>
    %115 = vector.multi_reduction <add>, %114, %cst_53 [1] : vector<2x32xf32> to vector<2xf32>
    %116 = vector.shape_cast %115 : vector<2xf32> to vector<2x1xf32>
    %cst_54 = arith.constant 3.200000e+01 : f32
    %117 = vector.broadcast %cst_54 : f32 to vector<2x1xf32>
    %118 = arith.divf %116, %117 : vector<2x1xf32>
    %119 = vector.broadcast %109 : vector<2x1xf32> to vector<2x32xf32>
    %120 = arith.subf %99, %119 : vector<2x32xf32>
    %cst_55 = arith.constant 9.99999974E-6 : f32
    %121 = vector.broadcast %cst_55 : f32 to vector<2x1xf32>
    %122 = arith.addf %118, %121 : vector<2x1xf32>
    %123 = math.rsqrt %122 : vector<2x1xf32>
    %124 = vector.broadcast %123 : vector<2x1xf32> to vector<2x32xf32>
    %125 = arith.mulf %120, %124 : vector<2x32xf32>
    %c10 = arith.constant 10 : index
    %c0_56 = arith.constant 0 : index
    %126 = vector.load %arg6[%c10, %c0_56] : memref<18x160xf32, #tpu.memory_space<vmem>>, vector<1x32xf32>
    %127 = vector.broadcast %126 : vector<1x32xf32> to vector<2x32xf32>
    %128 = arith.mulf %125, %127 : vector<2x32xf32>
    %c11 = arith.constant 11 : index
    %c0_57 = arith.constant 0 : index
    %129 = vector.load %arg6[%c11, %c0_57] : memref<18x160xf32, #tpu.memory_space<vmem>>, vector<1x32xf32>
    %130 = vector.broadcast %129 : vector<1x32xf32> to vector<2x32xf32>
    %131 = arith.addf %128, %130 : vector<2x32xf32>
    %cst_58 = arith.constant 0.000000e+00 : f32
    %132 = vector.broadcast %cst_58 : f32 to vector<2x32xf32>
    %133 = arith.maximumf %131, %132 : vector<2x32xf32>
    %c0_59 = arith.constant 0 : index
    %c160 = arith.constant 160 : index
    %134 = vector.load %arg8[%c0_59, %c160] : memref<2x224xf32, #tpu.memory_space<vmem>>, vector<2x32xf32>
    tpu.vector_store %arg8[%c0_59, %c160], %133 {strides = array<i32>} : memref<2x224xf32, #tpu.memory_space<vmem>>, vector<2x32xf32>,
    %cst_60 = arith.constant dense<0.000000e+00> : vector<2xf32>
    %135 = vector.multi_reduction <add>, %100, %cst_60 [1] : vector<2x32xf32> to vector<2xf32>
    %136 = vector.shape_cast %135 : vector<2xf32> to vector<2x1xf32>
    %cst_61 = arith.constant 3.200000e+01 : f32
    %137 = vector.broadcast %cst_61 : f32 to vector<2x1xf32>
    %138 = arith.divf %136, %137 : vector<2x1xf32>
    %139 = vector.broadcast %138 : vector<2x1xf32> to vector<2x32xf32>
    %140 = arith.subf %100, %139 : vector<2x32xf32>
    %141 = vector.broadcast %138 : vector<2x1xf32> to vector<2x32xf32>
    %142 = arith.subf %100, %141 : vector<2x32xf32>
    %143 = arith.mulf %140, %142 : vector<2x32xf32>
    %cst_62 = arith.constant dense<0.000000e+00> : vector<2xf32>
    %144 = vector.multi_reduction <add>, %143, %cst_62 [1] : vector<2x32xf32> to vector<2xf32>
    %145 = vector.shape_cast %144 : vector<2xf32> to vector<2x1xf32>
    %cst_63 = arith.constant 3.200000e+01 : f32
    %146 = vector.broadcast %cst_63 : f32 to vector<2x1xf32>
    %147 = arith.divf %145, %146 : vector<2x1xf32>
    %148 = vector.broadcast %138 : vector<2x1xf32> to vector<2x32xf32>
    %149 = arith.subf %100, %148 : vector<2x32xf32>
    %cst_64 = arith.constant 9.99999974E-6 : f32
    %150 = vector.broadcast %cst_64 : f32 to vector<2x1xf32>
    %151 = arith.addf %147, %150 : vector<2x1xf32>
    %152 = math.rsqrt %151 : vector<2x1xf32>
    %153 = vector.broadcast %152 : vector<2x1xf32> to vector<2x32xf32>
    %154 = arith.mulf %149, %153 : vector<2x32xf32>
    %c12 = arith.constant 12 : index
    %c0_65 = arith.constant 0 : index
    %155 = vector.load %arg6[%c12, %c0_65] : memref<18x160xf32, #tpu.memory_space<vmem>>, vector<1x32xf32>
    %156 = vector.broadcast %155 : vector<1x32xf32> to vector<2x32xf32>
    %157 = arith.mulf %154, %156 : vector<2x32xf32>
    %c13 = arith.constant 13 : index
    %c0_66 = arith.constant 0 : index
    %158 = vector.load %arg6[%c13, %c0_66] : memref<18x160xf32, #tpu.memory_space<vmem>>, vector<1x32xf32>
    %159 = vector.broadcast %158 : vector<1x32xf32> to vector<2x32xf32>
    %160 = arith.addf %157, %159 : vector<2x32xf32>
    %cst_67 = arith.constant 0.000000e+00 : f32
    %161 = vector.broadcast %cst_67 : f32 to vector<2x32xf32>
    %162 = arith.maximumf %160, %161 : vector<2x32xf32>
    %c0_68 = arith.constant 0 : index
    %c192 = arith.constant 192 : index
    %163 = vector.load %arg8[%c0_68, %c192] : memref<2x224xf32, #tpu.memory_space<vmem>>, vector<2x32xf32>
    tpu.vector_store %arg8[%c0_68, %c192], %162 {strides = array<i32>} : memref<2x224xf32, #tpu.memory_space<vmem>>, vector<2x32xf32>,
    %c0_69 = arith.constant 0 : index
    %c0_70 = arith.constant 0 : index
    %164 = vector.load %arg8[%c0_69, %c0_70] : memref<2x224xf32, #tpu.memory_space<vmem>>, vector<2x224xf32>
    %c0_71 = arith.constant 0 : index
    %c0_72 = arith.constant 0 : index
    %165 = vector.load %arg3[%c0_71, %c0_72] : memref<224x160xf32, #tpu.memory_space<vmem>>, vector<224x160xf32>
    %cst_73 = arith.constant dense<0.000000e+00> : vector<2x160xf32>
    %166 = tpu.matmul %164, %165, %cst_73 {dimension_numbers = #tpu.dot_dimension_numbers<[1], [0], [0], [1], [0, 0, 1, 1], [], []>, precision = #tpu.contract_precision<fp32>} : vector<2x224xf32>, vector<224x160xf32>, vector<2x160xf32> -> vector<2x160xf32>
    %c2 = arith.constant 2 : index
    %c0_74 = arith.constant 0 : index
    %167 = vector.load %arg6[%c2, %c0_74] : memref<18x160xf32, #tpu.memory_space<vmem>>, vector<1x160xf32>
    %168 = vector.broadcast %167 : vector<1x160xf32> to vector<2x160xf32>
    %169 = arith.addf %166, %168 : vector<2x160xf32>
    %170 = vector.extract_strided_slice %169 {offsets = [0, 128], sizes = [2, 16], strides = [1, 1]} : vector<2x160xf32> to vector<2x16xf32>
    %171 = vector.extract_strided_slice %169 {offsets = [0, 144], sizes = [2, 16], strides = [1, 1]} : vector<2x160xf32> to vector<2x16xf32>
    %172 = vector.extract_strided_slice %169 {offsets = [0, 0], sizes = [2, 128], strides = [1, 1]} : vector<2x160xf32> to vector<2x128xf32>
    %cst_75 = arith.constant 0.000000e+00 : f32
    %173 = vector.broadcast %cst_75 : f32 to vector<2x128xf32>
    %174 = arith.maximumf %172, %173 : vector<2x128xf32>
    %c0_76 = arith.constant 0 : index
    %c0_77 = arith.constant 0 : index
    %175 = vector.load %arg4[%c0_76, %c0_77] : memref<128x96xf32, #tpu.memory_space<vmem>>, vector<128x96xf32>
    %cst_78 = arith.constant dense<0.000000e+00> : vector<2x96xf32>
    %176 = tpu.matmul %174, %175, %cst_78 {dimension_numbers = #tpu.dot_dimension_numbers<[1], [0], [0], [1], [0, 0, 1, 1], [], []>, precision = #tpu.contract_precision<fp32>} : vector<2x128xf32>, vector<128x96xf32>, vector<2x96xf32> -> vector<2x96xf32>
    %c3 = arith.constant 3 : index
    %c0_79 = arith.constant 0 : index
    %177 = vector.load %arg6[%c3, %c0_79] : memref<18x160xf32, #tpu.memory_space<vmem>>, vector<1x96xf32>
    %178 = vector.broadcast %177 : vector<1x96xf32> to vector<2x96xf32>
    %179 = arith.addf %176, %178 : vector<2x96xf32>
    %180 = vector.extract_strided_slice %179 {offsets = [0, 0], sizes = [2, 32], strides = [1, 1]} : vector<2x96xf32> to vector<2x32xf32>
    %181 = vector.extract_strided_slice %179 {offsets = [0, 32], sizes = [2, 32], strides = [1, 1]} : vector<2x96xf32> to vector<2x32xf32>
    %182 = vector.extract_strided_slice %179 {offsets = [0, 64], sizes = [2, 16], strides = [1, 1]} : vector<2x96xf32> to vector<2x16xf32>
    %183 = vector.extract_strided_slice %179 {offsets = [0, 80], sizes = [2, 16], strides = [1, 1]} : vector<2x96xf32> to vector<2x16xf32>
    %184 = vector.extract_strided_slice %179 {offsets = [0, 0], sizes = [2, 64], strides = [1, 1]} : vector<2x96xf32> to vector<2x64xf32>
    %c0_80 = arith.constant 0 : index
    %c0_81 = arith.constant 0 : index
    %185 = vector.load %arg5[%c0_80, %c0_81] : memref<64x96xf32, #tpu.memory_space<vmem>>, vector<64x64xf32>
    %cst_82 = arith.constant dense<0.000000e+00> : vector<2x64xf32>
    %186 = tpu.matmul %184, %185, %cst_82 {dimension_numbers = #tpu.dot_dimension_numbers<[1], [0], [0], [1], [0, 0, 1, 1], [], []>, precision = #tpu.contract_precision<fp32>} : vector<2x64xf32>, vector<64x64xf32>, vector<2x64xf32> -> vector<2x64xf32>
    %c4 = arith.constant 4 : index
    %c0_83 = arith.constant 0 : index
    %187 = vector.load %arg6[%c4, %c0_83] : memref<18x160xf32, #tpu.memory_space<vmem>>, vector<1x64xf32>
    %188 = vector.broadcast %187 : vector<1x64xf32> to vector<2x64xf32>
    %189 = arith.addf %186, %188 : vector<2x64xf32>
    %cst_84 = arith.constant 0.000000e+00 : f32
    %190 = vector.broadcast %cst_84 : f32 to vector<2x64xf32>
    %191 = arith.maximumf %189, %190 : vector<2x64xf32>
    %c0_85 = arith.constant 0 : index
    %c64_86 = arith.constant 64 : index
    %192 = vector.load %arg5[%c0_85, %c64_86] : memref<64x96xf32, #tpu.memory_space<vmem>>, vector<64x32xf32>
    %cst_87 = arith.constant dense<0.000000e+00> : vector<2x32xf32>
    %193 = tpu.matmul %191, %192, %cst_87 {dimension_numbers = #tpu.dot_dimension_numbers<[1], [0], [0], [1], [0, 0, 1, 1], [], []>, precision = #tpu.contract_precision<fp32>} : vector<2x64xf32>, vector<64x32xf32>, vector<2x32xf32> -> vector<2x32xf32>
    %c5 = arith.constant 5 : index
    %c0_88 = arith.constant 0 : index
    %194 = vector.load %arg6[%c5, %c0_88] : memref<18x160xf32, #tpu.memory_space<vmem>>, vector<1x32xf32>
    %195 = vector.broadcast %194 : vector<1x32xf32> to vector<2x32xf32>
    %196 = arith.addf %193, %195 : vector<2x32xf32>
    %197 = arith.mulf %101, %101 : vector<2x16xf32>
    %cst_89 = arith.constant dense<0.000000e+00> : vector<2xf32>
    %198 = vector.multi_reduction <add>, %197, %cst_89 [1] : vector<2x16xf32> to vector<2xf32>
    %199 = vector.shape_cast %198 : vector<2xf32> to vector<2x1xf32>
    %200 = math.sqrt %199 : vector<2x1xf32>
    %cst_90 = arith.constant 9.99999996E-13 : f32
    %201 = vector.broadcast %cst_90 : f32 to vector<2x1xf32>
    %202 = arith.maximumf %200, %201 : vector<2x1xf32>
    %203 = vector.broadcast %202 : vector<2x1xf32> to vector<2x16xf32>
    %204 = arith.divf %101, %203 : vector<2x16xf32>
    %c0_91 = arith.constant 0 : index
    %c0_92 = arith.constant 0 : index
    %205 = vector.load %arg7[%c0_91, %c0_92] : memref<2x256xf32, #tpu.memory_space<vmem>>, vector<2x16xf32>
    tpu.vector_store %arg7[%c0_91, %c0_92], %204 {strides = array<i32>} : memref<2x256xf32, #tpu.memory_space<vmem>>, vector<2x16xf32>,
    %206 = arith.mulf %170, %170 : vector<2x16xf32>
    %cst_93 = arith.constant dense<0.000000e+00> : vector<2xf32>
    %207 = vector.multi_reduction <add>, %206, %cst_93 [1] : vector<2x16xf32> to vector<2xf32>
    %208 = vector.shape_cast %207 : vector<2xf32> to vector<2x1xf32>
    %209 = math.sqrt %208 : vector<2x1xf32>
    %cst_94 = arith.constant 9.99999996E-13 : f32
    %210 = vector.broadcast %cst_94 : f32 to vector<2x1xf32>
    %211 = arith.maximumf %209, %210 : vector<2x1xf32>
    %212 = vector.broadcast %211 : vector<2x1xf32> to vector<2x16xf32>
    %213 = arith.divf %170, %212 : vector<2x16xf32>
    %c0_95 = arith.constant 0 : index
    %c16_96 = arith.constant 16 : index
    %214 = vector.load %arg7[%c0_95, %c16_96] : memref<2x256xf32, #tpu.memory_space<vmem>>, vector<2x16xf32>
    tpu.vector_store %arg7[%c0_95, %c16_96], %213 {strides = array<i32>} : memref<2x256xf32, #tpu.memory_space<vmem>>, vector<2x16xf32>,
    %215 = arith.mulf %102, %102 : vector<2x16xf32>
    %cst_97 = arith.constant dense<0.000000e+00> : vector<2xf32>
    %216 = vector.multi_reduction <add>, %215, %cst_97 [1] : vector<2x16xf32> to vector<2xf32>
    %217 = vector.shape_cast %216 : vector<2xf32> to vector<2x1xf32>
    %218 = math.sqrt %217 : vector<2x1xf32>
    %cst_98 = arith.constant 9.99999996E-13 : f32
    %219 = vector.broadcast %cst_98 : f32 to vector<2x1xf32>
    %220 = arith.maximumf %218, %219 : vector<2x1xf32>
    %221 = vector.broadcast %220 : vector<2x1xf32> to vector<2x16xf32>
    %222 = arith.divf %102, %221 : vector<2x16xf32>
    %c0_99 = arith.constant 0 : index
    %c32_100 = arith.constant 32 : index
    %223 = vector.load %arg7[%c0_99, %c32_100] : memref<2x256xf32, #tpu.memory_space<vmem>>, vector<2x16xf32>
    tpu.vector_store %arg7[%c0_99, %c32_100], %222 {strides = array<i32>} : memref<2x256xf32, #tpu.memory_space<vmem>>, vector<2x16xf32>,
    %224 = arith.mulf %171, %171 : vector<2x16xf32>
    %cst_101 = arith.constant dense<0.000000e+00> : vector<2xf32>
    %225 = vector.multi_reduction <add>, %224, %cst_101 [1] : vector<2x16xf32> to vector<2xf32>
    %226 = vector.shape_cast %225 : vector<2xf32> to vector<2x1xf32>
    %227 = math.sqrt %226 : vector<2x1xf32>
    %cst_102 = arith.constant 9.99999996E-13 : f32
    %228 = vector.broadcast %cst_102 : f32 to vector<2x1xf32>
    %229 = arith.maximumf %227, %228 : vector<2x1xf32>
    %230 = vector.broadcast %229 : vector<2x1xf32> to vector<2x16xf32>
    %231 = arith.divf %171, %230 : vector<2x16xf32>
    %c0_103 = arith.constant 0 : index
    %c48 = arith.constant 48 : index
    %232 = vector.load %arg7[%c0_103, %c48] : memref<2x256xf32, #tpu.memory_space<vmem>>, vector<2x16xf32>
    tpu.vector_store %arg7[%c0_103, %c48], %231 {strides = array<i32>} : memref<2x256xf32, #tpu.memory_space<vmem>>, vector<2x16xf32>,
    %233 = arith.mulf %181, %181 : vector<2x32xf32>
    %cst_104 = arith.constant dense<0.000000e+00> : vector<2xf32>
    %234 = vector.multi_reduction <add>, %233, %cst_104 [1] : vector<2x32xf32> to vector<2xf32>
    %235 = vector.shape_cast %234 : vector<2xf32> to vector<2x1xf32>
    %236 = math.sqrt %235 : vector<2x1xf32>
    %cst_105 = arith.constant 9.99999996E-13 : f32
    %237 = vector.broadcast %cst_105 : f32 to vector<2x1xf32>
    %238 = arith.maximumf %236, %237 : vector<2x1xf32>
    %239 = vector.broadcast %238 : vector<2x1xf32> to vector<2x32xf32>
    %240 = arith.divf %181, %239 : vector<2x32xf32>
    %c0_106 = arith.constant 0 : index
    %c64_107 = arith.constant 64 : index
    %241 = vector.load %arg7[%c0_106, %c64_107] : memref<2x256xf32, #tpu.memory_space<vmem>>, vector<2x32xf32>
    tpu.vector_store %arg7[%c0_106, %c64_107], %240 {strides = array<i32>} : memref<2x256xf32, #tpu.memory_space<vmem>>, vector<2x32xf32>,
    %242 = arith.mulf %180, %180 : vector<2x32xf32>
    %cst_108 = arith.constant dense<0.000000e+00> : vector<2xf32>
    %243 = vector.multi_reduction <add>, %242, %cst_108 [1] : vector<2x32xf32> to vector<2xf32>
    %244 = vector.shape_cast %243 : vector<2xf32> to vector<2x1xf32>
    %245 = math.sqrt %244 : vector<2x1xf32>
    %cst_109 = arith.constant 9.99999996E-13 : f32
    %246 = vector.broadcast %cst_109 : f32 to vector<2x1xf32>
    %247 = arith.maximumf %245, %246 : vector<2x1xf32>
    %248 = vector.broadcast %247 : vector<2x1xf32> to vector<2x32xf32>
    %249 = arith.divf %180, %248 : vector<2x32xf32>
    %c0_110 = arith.constant 0 : index
    %c96_111 = arith.constant 96 : index
    %250 = vector.load %arg7[%c0_110, %c96_111] : memref<2x256xf32, #tpu.memory_space<vmem>>, vector<2x32xf32>
    tpu.vector_store %arg7[%c0_110, %c96_111], %249 {strides = array<i32>} : memref<2x256xf32, #tpu.memory_space<vmem>>, vector<2x32xf32>,
    %c0_112 = arith.constant 0 : index
    %c128_113 = arith.constant 128 : index
    %251 = vector.load %arg7[%c0_112, %c128_113] : memref<2x256xf32, #tpu.memory_space<vmem>>, vector<2x16xf32>
    tpu.vector_store %arg7[%c0_112, %c128_113], %182 {strides = array<i32>} : memref<2x256xf32, #tpu.memory_space<vmem>>, vector<2x16xf32>,
    %c0_114 = arith.constant 0 : index
    %c144 = arith.constant 144 : index
    %252 = vector.load %arg7[%c0_114, %c144] : memref<2x256xf32, #tpu.memory_space<vmem>>, vector<2x16xf32>
    tpu.vector_store %arg7[%c0_114, %c144], %183 {strides = array<i32>} : memref<2x256xf32, #tpu.memory_space<vmem>>, vector<2x16xf32>,
    %253 = vector.extract_strided_slice %196 {offsets = [0, 0], sizes = [2, 16], strides = [1, 1]} : vector<2x32xf32> to vector<2x16xf32>
    %c0_115 = arith.constant 0 : index
    %c160_116 = arith.constant 160 : index
    %254 = vector.load %arg7[%c0_115, %c160_116] : memref<2x256xf32, #tpu.memory_space<vmem>>, vector<2x16xf32>
    tpu.vector_store %arg7[%c0_115, %c160_116], %253 {strides = array<i32>} : memref<2x256xf32, #tpu.memory_space<vmem>>, vector<2x16xf32>,
    %255 = vector.extract_strided_slice %196 {offsets = [0, 16], sizes = [2, 16], strides = [1, 1]} : vector<2x32xf32> to vector<2x16xf32>
    %c0_117 = arith.constant 0 : index
    %c176 = arith.constant 176 : index
    %256 = vector.load %arg7[%c0_117, %c176] : memref<2x256xf32, #tpu.memory_space<vmem>>, vector<2x16xf32>
    tpu.vector_store %arg7[%c0_117, %c176], %255 {strides = array<i32>} : memref<2x256xf32, #tpu.memory_space<vmem>>, vector<2x16xf32>,
    %cst_118 = arith.constant 0.000000e+00 : f32
    %257 = vector.broadcast %cst_118 : f32 to vector<2x64xf32>
    %c0_119 = arith.constant 0 : index
    %c192_120 = arith.constant 192 : index
    %258 = vector.load %arg7[%c0_119, %c192_120] : memref<2x256xf32, #tpu.memory_space<vmem>>, vector<2x64xf32>
    tpu.vector_store %arg7[%c0_119, %c192_120], %257 {strides = array<i32>} : memref<2x256xf32, #tpu.memory_space<vmem>>, vector<2x64xf32>,
    return
  }
}

</mosaic_0001>

<bundles_post_ra>
// kernel: siamese_forward.1
= control target key start
LH: loop header
LB: loop body
LE: loop exit
PB: predicated region body
PF: predicated region fallthrough
CT: control target
= control target key end

     0   :  { %vm27_vm0 = vcmask 254976   ;;  %s6098_s26 = smov 96   ;;  %s6099_s28 = smov 32   ;;  %v9129_v24 = vmov 0.0   ;;  %vm6101_vm1 = vmmov 0   ;;  %vm80_vm2 = vcmask 517376   ;;  %s9114_s0 = inlined_call_operand.vmem [shape: f32[2,128], index: 0, kind: input, shape index: {}]   ;;  %s9115_s6 = inlined_call_operand.vmem [shape: f32[18,160], index: 6, kind: input, shape index: {}]   ;;  %s9116_s1 = inlined_call_operand.vmem [shape: f32[128,128], index: 1, kind: input, shape index: {}]   ;;  %s9117_s2 = inlined_call_operand.vmem [shape: f32[128,96], index: 2, kind: input, shape index: {}]   ;;  %s9118_s5 = inlined_call_operand.vmem [shape: f32[64,96], index: 5, kind: input, shape index: {}]   ;;  %s9119_s3 = inlined_call_operand.vmem [shape: f32[224,160], index: 3, kind: input, shape index: {}]   ;;  %s9120_s4 = inlined_call_operand.vmem [shape: f32[128,96], index: 4, kind: input, shape index: {}]   ;;  %s9121_s7 = inlined_call_operand.vmem [shape: f32[2,256], index: 7, kind: output, shape index: {}]  }
   0x1   :  { %v6151_v0 = vld [vmem:[%s9114_s0] sm:$0x3]  ;;  %v74_v13 = vld [vmem:[%s9115_s6 + $0x11] ss:$0 sm:$0xff]  ;;  %v100_v16 = vld [vmem:[%s9116_s1 + $0x78] sm:$0xff]  ;;  %5190 = vmatprep.subr.mxu0 %v9129_v24  ;;  %5225 = vmatprep.subr.mxu1 %v9129_v24  ;;  %s6102_s23 = smov 64  }
   0x2   :  { %48 = vrot.lane.b32.xlu0 %v6151_v0, %s6098_s26  ;;  %v28_v1 = vsel %vm27_vm0, %v6151_v0, 0.0  ;;  %v6178_v17 = vand.u32 4294901760, %v100_v16  ;;  %v99_v18 = vld [vmem:[%s9116_s1 + $0x70] sm:$0xff]  ;;  %v98_v21 = vld [vmem:[%s9116_s1 + $0x68] sm:$0xff]  ;;  %v97_v22 = vld [vmem:[%s9116_s1 + $0x60] sm:$0xff]  ;;  %5222 = vmatprep.mubr.msk.f32.mxu0 %vm6101_vm1, %v9129_v24  ;;  %vm82_vm3 = vcmask 1041920  }
   0x3   :  { %29 = vadd.xlane.f32.xlu1 %v28_v1  ;;  %v6186_v20 = vand.u32 4294901760, %v99_v18  ;;  %v96_v23 = vld [vmem:[%s9116_s1 + $0x58] sm:$0xff]  ;;  %v6203_v27 = vand.u32 4294901760, %v98_v21  ;;  %v6205_v28 = vand.u32 4294901760, %v97_v22  ;;  %v68_v35 = vld [vmem:[%s9115_s6 + $0x10] ss:$0 sm:$0xff]  ;;  %5257 = vmatprep.mubr.msk.f32.mxu1 %vm6101_vm1, %v9129_v24 }
   0x4   :  { %v6184_v19 = vsub.f32 %v100_v16, %v6178_v17  ;;  %5191 = vmatpush3.msra.mxu0 %v6178_v17  ;;  %v6208_v29 = vand.u32 4294901760, %v96_v23  ;;  %v95_v41 = vld [vmem:[%s9116_s1 + $0x50] sm:$0xff]  ;;  %v94_v47 = vld [vmem:[%s9116_s1 + $0x48] sm:$0xff]  ;;  %v93_v52 = vld [vmem:[%s9116_s1 + $0x40] sm:$0xff]  ;;  %vm759_vm4 = vcmask 779776   ;;  %vm774_vm5 = vcmask 1042176  }
   0x5   :  { %v6201_v26 = vsub.f32 %v99_v18, %v6186_v20  ;;  %5192 = vmatprep.subr.mxu0 %v9129_v24  ;;  %v6216_v32 = vsub.f32 %v98_v21, %v6203_v27  ;;  %v6219_v33 = vsub.f32 %v97_v22, %v6205_v28  ;;  %v6246_v45 = vand.u32 4294901760, %v95_v41  ;;  %v92_v57 = vld [vmem:[%s9116_s1 + $0x38] sm:$0xff]  ;;  %v91_v62 = vld [vmem:[%s9116_s1 + $0x30] sm:$0xff]  ;;  %s6105_s29 = smov 112   ;;  %s6106_s21 = smov 80  }
   0x6   :  { %v196_v25 = vand.u32 4294901760, %v6184_v19  ;;  %5193 = vmatpush3.msra.mxu0 %v6186_v20  ;;  %v6223_v34 = vsub.f32 %v96_v23, %v6208_v29  ;;  %v6260_v51 = vand.u32 4294901760, %v94_v47  ;;  %v6272_v56 = vand.u32 4294901760, %v93_v52  ;;  %v88_v22 = vld [vmem:[%s9116_s1 + $0x18] sm:$0xff]  ;;  %s6107_s25 = smov 16  }
   0x7   :  { %v203_v31 = vand.u32 4294901760, %v6201_v26  ;;  %5194 = vmatprep.subr.mxu0 %v9129_v24  ;;  %v210_v38 = vand.u32 4294901760, %v6216_v32  ;;  %v217_v39 = vand.u32 4294901760, %v6219_v33  ;;  %v6258_v50 = vsub.f32 %v95_v41, %v6246_v45  ;;  %v86_v41 = vld [vmem:[%s9116_s1 + $0x8] sm:$0xff] }
   0x8   :  { %v197_v30 = vsub.f32 %v6184_v19, %v196_v25  ;;  %5195 = vmatpush3.msra.mxu0 %v6203_v27  ;;  %v224_v40 = vand.u32 4294901760, %v6223_v34  ;;  %v6270_v55 = vsub.f32 %v94_v47, %v6260_v51  ;;  %v6285_v60 = vsub.f32 %v93_v52, %v6272_v56 }
   0x9   :  { %v204_v37 = vsub.f32 %v6201_v26, %v203_v31  ;;  %v211_v43 = vsub.f32 %v6216_v32, %v210_v38  ;;  %5196 = vmatprep.subr.mxu0 %v9129_v24  ;;  %v218_v44 = vsub.f32 %v6219_v33, %v217_v39  ;;  %v231_v54 = vand.u32 4294901760, %v6258_v50 }
   0xa   :  { %v198_v36 = vand.u32 4294901760, %v197_v30  ;;  %v225_v46 = vsub.f32 %v6223_v34, %v224_v40  ;;  %5197 = vmatpush3.msra.mxu0 %v6205_v28  ;;  %v238_v59 = vand.u32 4294901760, %v6270_v55  ;;  %v6287_v61 = vand.u32 4294901760, %v92_v57 }
   0xb   :  { %v205_v42 = vand.u32 4294901760, %v204_v37  ;;  %v212_v48 = vand.u32 4294901760, %v211_v43  ;;  %v219_v49 = vand.u32 4294901760, %v218_v44  ;;  %5198 = vmatprep.subr.mxu0 %v9129_v24  ;;  %v232_v58 = vsub.f32 %v6258_v50, %v231_v54  ;;  %v87_v37 = vld [vmem:[%s9116_s1 + $0x10] sm:$0xff] }
   0xc   :  { %5226 = vmatpush3.msra.mxu1 %v198_v36  ;;  %5199 = vmatpush3.msra.mxu0 %v6208_v29  ;;  %v226_v53 = vand.u32 4294901760, %v225_v46  ;;  %v239_v1 = vsub.f32 %v6270_v55, %v238_v59  ;;  %v6344_v36 = vand.u32 4294901760, %v88_v22  ;;  %v6360_v44 = vand.u32 4294901760, %v87_v37 }
   0xd   :  { %5227 = vmatprep.subr.mxu1 %v9129_v24  ;;  %5200 = vmatprep.subr.mxu0 %v9129_v24  ;;  %v233_v63 = vand.u32 4294901760, %v232_v58  ;;  %v6362_v46 = vand.u32 4294901760, %v86_v41  ;;  %vm1435_vm6 = vcmask 779264   ;;  %vm1606_vm7 = vcmask 785408  }
   0xe   :  { %5228 = vmatpush3.msra.mxu1 %v205_v42  ;;  %5201 = vmatpush3.msra.mxu0 %v6246_v45  ;;  %v85_v42 = vld [vmem:[%s9116_s1] sm:$0xff]  ;;  %v6372_v52 = vsub.f32 %v88_v22, %v6344_v36  ;;  %vm4577_vm8 = vcmask 123904   ;;  %vm3457_vm11 = vcmask 523264  }
   0xf   :  { %5229 = vmatprep.subr.mxu1 %v9129_v24  ;;  %5202 = vmatprep.subr.mxu0 %v9129_v24  ;;  %v6364_v47 = vand.u32 4294901760, %v85_v42  ;;  %v6380_v58 = vsub.f32 %v86_v41, %v6362_v46 }
  0x10   :  { %5230 = vmatpush3.msra.mxu1 %v212_v48  ;;  %5203 = vmatpush3.msra.mxu0 %v6260_v51 }
  0x11   :  { %5231 = vmatprep.subr.mxu1 %v9129_v24  ;;  %5204 = vmatprep.subr.mxu0 %v9129_v24 }
  0x12   :  { %5232 = vmatpush3.msra.mxu1 %v219_v49  ;;  %5205 = vmatpush3.msra.mxu0 %v6272_v56 }
  0x13   :  { %5233 = vmatprep.subr.mxu1 %v9129_v24  ;;  %5206 = vmatprep.subr.mxu0 %v9129_v24 }
  0x14   :  { %5234 = vmatpush3.msra.mxu1 %v226_v53  ;;  %5207 = vmatpush3.msra.mxu0 %v6287_v61 }
  0x15   :  { %5235 = vmatprep.subr.mxu1 %v9129_v24  ;;  %5208 = vmatprep.subr.mxu0 %v9129_v24 }
  0x16   :  { %5236 = vmatpush3.msra.mxu1 %v233_v63 }
  0x17   :  { %5237 = vmatprep.subr.mxu1 %v9129_v24 }
  0x74   :  { %v49_v2 = vpop.permute.xlu0 %48 }
  0x75   :  { %v51_v3 = vsel %vm27_vm0, %v49_v2, 0.0  ;;  %v245_v2 = vand.u32 4294901760, %v6285_v60 }
  0x76   :  { %52 = vadd.xlane.f32.xlu0 %v51_v3  ;;  %v6300_v3 = vsub.f32 %v92_v57, %v6287_v61  ;;  %v6377_v57 = vsub.f32 %v87_v37, %v6360_v44 }
  0x8c   :  { %v30_v8 = vpop.xlane.xlu1 %29 }
  0x8d   :  { %v32_v9 = vmul.f32 0.03125, %v30_v8  ;;  %v246_v8 = vsub.f32 %v6285_v60, %v245_v2 }
  0x8f   :  { %v6165_v10 = vsub.f32 %v6151_v0, %v32_v9  ;;  %v252_v9 = vand.u32 4294901760, %v6300_v3 }
  0x91   :  { %v34_v11 = vmul.f32 %v6165_v10, %v6165_v10 }
  0x93   :  { %v35_v12 = vsel %vm27_vm0, %v34_v11, 0.0 }
  0xff   :  { %v53_v4 = vpop.xlane.xlu0 %52 }
 0x100   :  { %v54_v5 = vmul.f32 0.03125, %v53_v4  ;;  %v6304_v4 = vand.u32 4294901760, %v91_v62 }
 0x102   :  { %v6159_v6 = vsub.f32 %v6151_v0, %v54_v5  ;;  %v90_v5 = vld [vmem:[%s9116_s1 + $0x28] sm:$0xff]  ;;  %5209 = vmatpush3.msra.mxu0 %v6304_v4 }
 0x103   :  { %v6314_v11 = vand.u32 4294901760, %v90_v5  ;;  %5210 = vmatprep.subr.mxu0 %v9129_v24 }
 0x104   :  { %v56_v7 = vmul.f32 %v6159_v6, %v6159_v6 }
 0x105   :  { %v6329_v16 = vsub.f32 %v90_v5, %v6314_v11  ;;  %5211 = vmatpush3.msra.mxu0 %v6314_v11  ;;  %v280_v5 = vand.u32 4294901760, %v6372_v52 }
 0x106   :  { %58 = vrot.lane.b32.xlu1 %v56_v7, %s6098_s26  ;;  %v240_v7 = vand.u32 4294901760, %v239_v1  ;;  %5212 = vmatprep.subr.mxu0 %v9129_v24 }
 0x107   :  { %v266_v30 = vand.u32 4294901760, %v6329_v16 }
 0x108   :  { %5238 = vmatpush3.msra.mxu1 %v240_v7  ;;  %v287_v7 = vand.u32 4294901760, %v6377_v57 }
 0x109   :  { %5239 = vmatprep.subr.mxu1 %v9129_v24  ;;  %v267_v48 = vsub.f32 %v6329_v16, %v266_v30 }
 0x10a   :  { %v288_v22 = vsub.f32 %v6377_v57, %v287_v7 }
 0x10b   :  { %v268_v63 = vand.u32 4294901760, %v267_v48 }
 0x10c   :  { %v289_v41 = vand.u32 4294901760, %v288_v22 }
 0x12a   :  { %36 = vadd.xlane.f32.xlu1 %v35_v12  ;;  %v6319_v12 = vsub.f32 %v91_v62, %v6304_v4  ;;  %v6383_v62 = vsub.f32 %v85_v42, %v6364_v47 }
 0x12c   :  { %v259_v21 = vand.u32 4294901760, %v6319_v12 }
 0x12e   :  { %v260_v43 = vsub.f32 %v6319_v12, %v259_v21 }
 0x130   :  { %v261_v53 = vand.u32 4294901760, %v260_v43 }
 0x13b   :  { %76 = vrot.lane.b32.xlu1 %v74_v13, %s6099_s28  ;;  %v89_v13 = vld [vmem:[%s9116_s1 + $0x20] sm:$0xff]  ;;  %s6104_s1 = smov 48  }
 0x13c   :  { %v6331_v18 = vand.u32 4294901760, %v89_v13 }
 0x13e   :  { %5213 = vmatpush3.msra.mxu0 %v6331_v18 }
 0x13f   :  { %5214 = vmatprep.subr.mxu0 %v9129_v24 }
 0x140   :  { %5215 = vmatpush3.msra.mxu0 %v6344_v36 }
 0x141   :  { %5216 = vmatprep.subr.mxu0 %v9129_v24 }
 0x142   :  { %5217 = vmatpush3.msra.mxu0 %v6360_v44 }
 0x143   :  { %5218 = vmatprep.subr.mxu0 %v9129_v24 }
 0x144   :  { %5219 = vmatpush3.msra.mxu0 %v6362_v46 }
 0x145   :  { %5220 = vmatprep.subr.mxu0 %v9129_v24 }
 0x146   :  { %5221 = vmatpush3.msra.mxu0 %v6364_v47 }
 0x147   :  { %5260 = vmatprep.subr.mxu0 %v9129_v24 }
 0x178   :  { %v59_v14 = vpop.permute.xlu1 %58 }
 0x179   :  { %v61_v15 = vsel %vm27_vm0, %v59_v14, 0.0  ;;  %v247_v14 = vand.u32 4294901760, %v246_v8  ;;  %v294_v8 = vand.u32 4294901760, %v6380_v58 }
 0x17a   :  { %62 = vadd.xlane.f32.xlu0 %v61_v15  ;;  %v253_v15 = vsub.f32 %v6300_v3, %v252_v9 }
 0x17b   :  { %5240 = vmatpush3.msra.mxu1 %v247_v14 }
 0x17c   :  { %v254_v23 = vand.u32 4294901760, %v253_v15  ;;  %5241 = vmatprep.subr.mxu1 %v9129_v24  ;;  %v281_v15 = vsub.f32 %v6372_v52, %v280_v5 }
 0x17e   :  { %5242 = vmatpush3.msra.mxu1 %v254_v23  ;;  %v295_v23 = vsub.f32 %v6380_v58, %v294_v8  ;;  %v282_v37 = vand.u32 4294901760, %v281_v15  ;;  %v42_v15 = vld [vmem:[%s9115_s6 + $0x6] ss:$0 sm:$0xff] }
 0x17f   :  { %5243 = vmatprep.subr.mxu1 %v9129_v24 }
 0x180   :  { %5244 = vmatpush3.msra.mxu1 %v261_v53  ;;  %v296_v43 = vand.u32 4294901760, %v295_v23  ;;  %v44_v23 = vld [vmem:[%s9115_s6 + $0x7] ss:$0 sm:$0xff] }
 0x181   :  { %5245 = vmatprep.subr.mxu1 %v9129_v24 }
 0x182   :  { %5246 = vmatpush3.msra.mxu1 %v268_v63 }
 0x183   :  { %5247 = vmatprep.subr.mxu1 %v9129_v24 }
 0x190   :  { %70 = vrot.lane.b32.xlu0 %v68_v35, %s6099_s28  ;;  %v6342_v35 = vsub.f32 %v89_v13, %v6331_v18  ;;  %v301_v13 = vand.u32 4294901760, %v6383_v62 }
 0x192   :  { %v273_v49 = vand.u32 4294901760, %v6342_v35  ;;  %v302_v42 = vsub.f32 %v6383_v62, %v301_v13 }
 0x194   :  { %v274_v1 = vsub.f32 %v6342_v35, %v273_v49  ;;  %v303_v48 = vand.u32 4294901760, %v302_v42  ;;  %v746_v42 = vld [vmem:[%s9115_s6 + $0x16] ss:$0 sm:$0xff] }
 0x195   :  { %748 = vrot.lane.b32.xlu0 %v746_v42, %s6102_s23 }
 0x196   :  { %v275_v14 = vand.u32 4294901760, %v274_v1 }
 0x198   :  { %5248 = vmatpush3.msra.mxu1 %v275_v14 }
 0x199   :  { %5249 = vmatprep.subr.mxu1 %v9129_v24 }
 0x19a   :  { %5250 = vmatpush3.msra.mxu1 %v282_v37 }
 0x19b   :  { %5251 = vmatprep.subr.mxu1 %v9129_v24 }
 0x19c   :  { %5252 = vmatpush3.msra.mxu1 %v289_v41 }
 0x19d   :  { %5253 = vmatprep.subr.mxu1 %v9129_v24 }
 0x19e   :  { %5254 = vmatpush3.msra.mxu1 %v296_v43  ;;  %v761_v43 = vld [vmem:[%s9115_s6 + $0x20] ss:$0 sm:$0xff] }
 0x19f   :  { %5255 = vmatprep.subr.mxu1 %v9129_v24  ;;  %763 = vrot.lane.b32.xlu0 %v761_v43, %s6098_s26 }
 0x1a0   :  { %5256 = vmatpush3.msra.mxu1 %v303_v48  ;;  %v767_v48 = vld [vmem:[%s9115_s6 + $0x21] ss:$0 sm:$0xff] }
 0x1a1   :  { %5295 = vmatprep.subr.mxu1 %v9129_v24 }
 0x1b3   :  { %v37_v53 = vpop.xlane.xlu1 %36 }
 0x1b4   :  { %v38_v63 = vmul.f32 0.03125, %v37_v53 }
 0x1b6   :  { %v39_v1 = vadd.f32 1e-05, %v38_v63 }
 0x1b8   :  { %6058 = vrsqrt.f32 %v39_v1 }
 0x1c5   :  { %v6059_v14 = vpop.eup %6058 }
 0x1c6   :  { %v41_v22 = vmul.f32 %v6059_v14, %v6165_v10  ;;  %v752_v10 = vld [vmem:[%s9115_s6 + $0x17] ss:$0 sm:$0xff] }
 0x1c7   :  { %754 = vrot.lane.b32.xlu0 %v752_v10, %s6102_s23 }
 0x1c8   :  { %v43_v37 = vmul.f32 %v42_v15, %v41_v22 }
 0x1ca   :  { %v45_v41 = vadd.f32 %v44_v23, %v43_v37  ;;  %v77_v23 = vpop.permute.xlu1 %76 }
 0x1cb   :  { %769 = vrot.lane.b32.xlu0 %v767_v48, %s6098_s26 }
 0x1cc   :  { %46 = vst.msk [vmem:[#allocation2] sm:$0x3] %vm27_vm0, %v45_v41 }
 0x203   :  { %v63_v53 = vpop.xlane.xlu0 %62 }
 0x204   :  { %v64_v63 = vmul.f32 0.03125, %v63_v53 }
 0x206   :  { %v65_v1 = vadd.f32 1e-05, %v64_v63 }
 0x207   :  { %v71_v15 = vpop.permute.xlu0 %70 }
 0x208   :  { %6060 = vrsqrt.f32 %v65_v1  ;;  %v782_v1 = vld [vmem:[%s9117_s2 + $0x28] sm:$0xff] }
 0x215   :  { %v6061_v14 = vpop.eup %6060 }
 0x216   :  { %v67_v22 = vmul.f32 %v6061_v14, %v6159_v6 }
 0x218   :  { %v73_v37 = vmul.f32 %v71_v15, %v67_v22 }
 0x21a   :  { %v79_v41 = vadd.f32 %v77_v23, %v73_v37  ;;  %v6756_v23 = vand.u32 4294901760, %v782_v1 }
 0x21c   :  { %81 = vst.msk [vmem:[#allocation2] sm:$0x3] %vm80_vm2, %v79_v41  ;;  %v781_v41 = vld [vmem:[%s9117_s2 + $0x20] sm:$0xff] }
 0x21d   :  { %83 = vst.msk [vmem:[#allocation2] sm:$0x3] %vm82_vm3, %v6151_v0 }
 0x224   :  { %v84_v42 = vld [vmem:[#allocation2] sm:$0x3] }
 0x225   :  { %v6453_v43 = vand.u32 4294901760, %v84_v42 }
 0x227   :  { %v6456_v10 = vsub.f32 %v84_v42, %v6453_v43  ;;  %5258 = vmatmul.mubr.f32.vlgmr.msra.gmra.mxu1 %v6453_v43 }
 0x228   :  { %5296 = vmatpush3.msra.mxu1 %v6178_v17  ;;  %5327 = vmatprep.mubr.msk.f32.mxu1 %vm6101_vm1, %v9129_v24 }
 0x229   :  { %v185_v6 = vand.u32 4294901760, %v6456_v10  ;;  %5297 = vmatprep.subr.mxu1 %v9129_v24 }
 0x22a   :  { %5298 = vmatpush3.msra.mxu1 %v6186_v20 }
 0x22b   :  { %v186_v0 = vsub.f32 %v6456_v10, %v185_v6  ;;  %5299 = vmatprep.subr.mxu1 %v9129_v24 }
 0x22c   :  { %5300 = vmatpush3.msra.mxu1 %v6203_v27 }
 0x22d   :  { %v187_v48 = vand.u32 4294901760, %v186_v0  ;;  %5301 = vmatprep.subr.mxu1 %v9129_v24 }
 0x22e   :  { %5302 = vmatpush3.msra.mxu1 %v6205_v28 }
 0x22f   :  { %5223 = vmatmul.mubr.f32.vlgmr.msra.gmra.mxu0 %v187_v48  ;;  %5303 = vmatprep.subr.mxu1 %v9129_v24  ;;  %v780_v48 = vld [vmem:[%s9117_s2 + $0x18] sm:$0xff] }
 0x230   :  { %5261 = vmatpush3.msra.mxu0 %v6184_v19  ;;  %5304 = vmatpush3.msra.mxu1 %v6208_v29  ;;  %v791_v19 = vld [vmem:[%s9117_s2 + $0x70] sm:$0xff] }
 0x231   :  { %5262 = vmatprep.subr.mxu0 %v9129_v24  ;;  %5305 = vmatprep.subr.mxu1 %v9129_v24 }
 0x232   :  { %5263 = vmatpush3.msra.mxu0 %v6201_v26  ;;  %5306 = vmatpush3.msra.mxu1 %v6246_v45  ;;  %v6631_v26 = vand.u32 4294901760, %v791_v19 }
 0x233   :  { %5264 = vmatprep.subr.mxu0 %v9129_v24  ;;  %5307 = vmatprep.subr.mxu1 %v9129_v24 }
 0x234   :  { %5265 = vmatpush3.msra.mxu0 %v6216_v32  ;;  %5308 = vmatpush3.msra.mxu1 %v6260_v51 }
 0x235   :  { %5266 = vmatprep.subr.mxu0 %v9129_v24  ;;  %5309 = vmatprep.subr.mxu1 %v9129_v24 }
 0x236   :  { %5267 = vmatpush3.msra.mxu0 %v6219_v33  ;;  %5310 = vmatpush3.msra.mxu1 %v6272_v56 }
 0x237   :  { %5268 = vmatprep.subr.mxu0 %v9129_v24  ;;  %5311 = vmatprep.subr.mxu1 %v9129_v24 }
 0x238   :  { %5269 = vmatpush3.msra.mxu0 %v6223_v34  ;;  %5312 = vmatpush3.msra.mxu1 %v6287_v61  ;;  %v6649_v34 = vsub.f32 %v791_v19, %v6631_v26 }
 0x239   :  { %5270 = vmatprep.subr.mxu0 %v9129_v24  ;;  %5313 = vmatprep.subr.mxu1 %v9129_v24 }
 0x23a   :  { %5271 = vmatpush3.msra.mxu0 %v6258_v50  ;;  %5314 = vmatpush3.msra.mxu1 %v6304_v4  ;;  %v895_v50 = vand.u32 4294901760, %v6649_v34 }
 0x23b   :  { %5272 = vmatprep.subr.mxu0 %v9129_v24  ;;  %5315 = vmatprep.subr.mxu1 %v9129_v24 }
 0x23c   :  { %5273 = vmatpush3.msra.mxu0 %v6270_v55  ;;  %5316 = vmatpush3.msra.mxu1 %v6314_v11 }
 0x23d   :  { %5274 = vmatprep.subr.mxu0 %v9129_v24  ;;  %5317 = vmatprep.subr.mxu1 %v9129_v24 }
 0x23e   :  { %5275 = vmatpush3.msra.mxu0 %v6285_v60  ;;  %5318 = vmatpush3.msra.mxu1 %v6331_v18 }
 0x23f   :  { %5276 = vmatprep.subr.mxu0 %v9129_v24  ;;  %5319 = vmatprep.subr.mxu1 %v9129_v24 }
 0x240   :  { %5277 = vmatpush3.msra.mxu0 %v6300_v3  ;;  %5320 = vmatpush3.msra.mxu1 %v6344_v36 }
 0x241   :  { %5278 = vmatprep.subr.mxu0 %v9129_v24  ;;  %5321 = vmatprep.subr.mxu1 %v9129_v24 }
 0x242   :  { %5279 = vmatpush3.msra.mxu0 %v6319_v12  ;;  %5322 = vmatpush3.msra.mxu1 %v6360_v44 }
 0x243   :  { %5280 = vmatprep.subr.mxu0 %v9129_v24  ;;  %5323 = vmatprep.subr.mxu1 %v9129_v24 }
 0x244   :  { %5281 = vmatpush3.msra.mxu0 %v6329_v16  ;;  %5324 = vmatpush3.msra.mxu1 %v6362_v46  ;;  %v787_v16 = vld [vmem:[%s9117_s2 + $0x50] sm:$0xff] }
 0x245   :  { %5282 = vmatprep.subr.mxu0 %v9129_v24  ;;  %5325 = vmatprep.subr.mxu1 %v9129_v24 }
 0x246   :  { %5283 = vmatpush3.msra.mxu0 %v6342_v35  ;;  %5292 = vmatprep.mubr.msk.f32.mxu0 %vm6101_vm1, %v9129_v24 }
 0x247   :  { %5284 = vmatprep.subr.mxu0 %v9129_v24  ;;  %5326 = vmatpush3.msra.mxu1 %v6364_v47 }
 0x248   :  { %5285 = vmatpush3.msra.mxu0 %v6372_v52  ;;  %5365 = vmatprep.subr.mxu1 %v9129_v24 }
 0x249   :  { %5286 = vmatprep.subr.mxu0 %v9129_v24  ;;  %5328 = vmatmul.mubr.f32.vlgmr.msra.gmra.mxu1 %v185_v6  ;;  %v6772_v6 = vand.u32 4294901760, %v781_v41 }
 0x24a   :  { %5287 = vmatpush3.msra.mxu0 %v6377_v57  ;;  %5366 = vmatpush3.msra.mxu1 %v6178_v17  ;;  %v792_v17 = vld [vmem:[%s9117_s2 + $0x78] sm:$0xff] }
 0x24b   :  { %5288 = vmatprep.subr.mxu0 %v9129_v24  ;;  %5367 = vmatprep.subr.mxu1 %v9129_v24 }
 0x24c   :  { %5289 = vmatpush3.msra.mxu0 %v6380_v58  ;;  %5368 = vmatpush3.msra.mxu1 %v6186_v20  ;;  %v790_v20 = vld [vmem:[%s9117_s2 + $0x68] sm:$0xff] }
 0x24d   :  { %5290 = vmatprep.subr.mxu0 %v9129_v24  ;;  %5369 = vmatprep.subr.mxu1 %v9129_v24 }
 0x24e   :  { %5291 = vmatpush3.msra.mxu0 %v6383_v62  ;;  %5370 = vmatpush3.msra.mxu1 %v6203_v27  ;;  %v6633_v27 = vand.u32 4294901760, %v790_v20 }
 0x24f   :  { %5293 = vmatmul.mubr.f32.vlgmr.msra.gmra.mxu0 %v6456_v10  ;;  %5330 = vmatprep.subr.mxu0 %v9129_v24  ;;  %v6770_v10 = vsub.f32 %v782_v1, %v6756_v23 }
 0x250   :  { %5331 = vmatpush3.msra.mxu0 %v196_v25  ;;  %5371 = vmatprep.subr.mxu1 %v9129_v24  ;;  %v6629_v25 = vand.u32 4294901760, %v792_v17 }
 0x251   :  { %5332 = vmatprep.subr.mxu0 %v9129_v24  ;;  %5372 = vmatpush3.msra.mxu1 %v6205_v28  ;;  %v789_v28 = vld [vmem:[%s9117_s2 + $0x60] sm:$0xff]  ;;  %v9127_v19 = vand.u32 4294901760, %v6770_v10 }
 0x252   :  { %5333 = vmatpush3.msra.mxu0 %v203_v31  ;;  %5373 = vmatprep.subr.mxu1 %v9129_v24  ;;  %v6641_v31 = vand.u32 4294901760, %v789_v28  ;;  %v6646_v33 = vsub.f32 %v792_v17, %v6629_v25 }
 0x253   :  { %5334 = vmatprep.subr.mxu0 %v9129_v24  ;;  %5374 = vmatpush3.msra.mxu1 %v6208_v29  ;;  %v788_v29 = vld [vmem:[%s9117_s2 + $0x58] sm:$0xff] }
 0x254   :  { %5335 = vmatpush3.msra.mxu0 %v210_v38  ;;  %5375 = vmatprep.subr.mxu1 %v9129_v24  ;;  %v6643_v32 = vand.u32 4294901760, %v788_v29  ;;  %v6652_v38 = vsub.f32 %v790_v20, %v6633_v27  ;;  %v6783_v20 = vsub.f32 %v781_v41, %v6772_v6 }
 0x255   :  { %5336 = vmatprep.subr.mxu0 %v9129_v24  ;;  %5376 = vmatpush3.msra.mxu1 %v6246_v45  ;;  %v888_v45 = vand.u32 4294901760, %v6646_v33 }
 0x256   :  { %5337 = vmatpush3.msra.mxu0 %v217_v39  ;;  %5377 = vmatprep.subr.mxu1 %v9129_v24  ;;  %v6656_v39 = vsub.f32 %v789_v28, %v6641_v31  ;;  %v6785_v28 = vand.u32 4294901760, %v780_v48 }
 0x257   :  { %5338 = vmatprep.subr.mxu0 %v9129_v24  ;;  %5378 = vmatpush3.msra.mxu1 %v6260_v51  ;;  %v902_v51 = vand.u32 4294901760, %v6652_v38  ;;  %v889_v55 = vsub.f32 %v6646_v33, %v888_v45 }
 0x258   :  { %5339 = vmatpush3.msra.mxu0 %v224_v40  ;;  %5379 = vmatprep.subr.mxu1 %v9129_v24  ;;  %v6659_v40 = vsub.f32 %v788_v29, %v6643_v32 }
 0x259   :  { %5340 = vmatprep.subr.mxu0 %v9129_v24  ;;  %5380 = vmatpush3.msra.mxu1 %v6272_v56  ;;  %v896_v56 = vsub.f32 %v6649_v34, %v895_v50 }
 0x25a   :  { %5341 = vmatpush3.msra.mxu0 %v231_v54  ;;  %5381 = vmatprep.subr.mxu1 %v9129_v24  ;;  %v909_v54 = vand.u32 4294901760, %v6656_v39  ;;  %v916_v60 = vand.u32 4294901760, %v6659_v40 }
 0x25b   :  { %5342 = vmatprep.subr.mxu0 %v9129_v24  ;;  %5382 = vmatpush3.msra.mxu1 %v6287_v61  ;;  %v890_v61 = vand.u32 4294901760, %v889_v55  ;;  %v779_v55 = vld [vmem:[%s9117_s2 + $0x10] sm:$0xff] }
 0x25c   :  { %5343 = vmatpush3.msra.mxu0 %v238_v59  ;;  %5383 = vmatprep.subr.mxu1 %v9129_v24  ;;  %v903_v59 = vsub.f32 %v6652_v38, %v902_v51  ;;  %v910_v3 = vsub.f32 %v6656_v39, %v909_v54 }
 0x25d   :  { %5344 = vmatprep.subr.mxu0 %v9129_v24  ;;  %5384 = vmatpush3.msra.mxu1 %v6304_v4 }
 0x25e   :  { %5345 = vmatpush3.msra.mxu0 %v245_v2  ;;  %5385 = vmatprep.subr.mxu1 %v9129_v24  ;;  %v897_v2 = vand.u32 4294901760, %v896_v56  ;;  %v904_v4 = vand.u32 4294901760, %v903_v59  ;;  %v959_v56 = vsub.f32 %v6770_v10, %v9127_v19  ;;  %v9126_v59 = vand.u32 4294901760, %v6783_v20 }
 0x25f   :  { %5346 = vmatprep.subr.mxu0 %v9129_v24  ;;  %5386 = vmatpush3.msra.mxu1 %v6314_v11  ;;  %v911_v11 = vand.u32 4294901760, %v910_v3 }
 0x260   :  { %5347 = vmatpush3.msra.mxu0 %v252_v9  ;;  %5387 = vmatprep.subr.mxu1 %v9129_v24  ;;  %v917_v9 = vsub.f32 %v6659_v40, %v916_v60 }
 0x261   :  { %5348 = vmatprep.subr.mxu0 %v9129_v24  ;;  %5388 = vmatpush3.msra.mxu1 %v6331_v18  ;;  %v6697_v18 = vand.u32 4294901760, %v787_v16 }
 0x262   :  { %5349 = vmatpush3.msra.mxu0 %v259_v21  ;;  %5389 = vmatprep.subr.mxu1 %v9129_v24  ;;  %v918_v12 = vand.u32 4294901760, %v917_v9  ;;  %v786_v21 = vld [vmem:[%s9117_s2 + $0x48] sm:$0xff]  ;;  %v960_v9 = vand.u32 4294901760, %v959_v56 }
 0x263   :  { %5350 = vmatprep.subr.mxu0 %v9129_v24  ;;  %5390 = vmatpush3.msra.mxu1 %v6344_v36  ;;  %v6706_v35 = vand.u32 4294901760, %v786_v21  ;;  %v785_v36 = vld [vmem:[%s9117_s2 + $0x40] sm:$0xff] }
 0x264   :  { %5351 = vmatpush3.msra.mxu0 %v266_v30  ;;  %5391 = vmatprep.subr.mxu1 %v9129_v24  ;;  %v6704_v30 = vsub.f32 %v787_v16, %v6697_v18 }
 0x265   :  { %5352 = vmatprep.subr.mxu0 %v9129_v24  ;;  %5392 = vmatpush3.msra.mxu1 %v6360_v44 }
 0x266   :  { %5353 = vmatpush3.msra.mxu0 %v273_v49  ;;  %5393 = vmatprep.subr.mxu1 %v9129_v24  ;;  %v923_v44 = vand.u32 4294901760, %v6704_v30  ;;  %v784_v49 = vld [vmem:[%s9117_s2 + $0x38] sm:$0xff] }
 0x267   :  { %5354 = vmatprep.subr.mxu0 %v9129_v24  ;;  %5394 = vmatpush3.msra.mxu1 %v6362_v46  ;;  %v6715_v46 = vsub.f32 %v786_v21, %v6706_v35  ;;  %v6731_v62 = vand.u32 4294901760, %v784_v49 }
 0x268   :  { %5355 = vmatpush3.msra.mxu0 %v280_v5  ;;  %5395 = vmatprep.subr.mxu1 %v9129_v24  ;;  %v924_v52 = vsub.f32 %v6704_v30, %v923_v44  ;;  %v783_v5 = vld [vmem:[%s9117_s2 + $0x30] sm:$0xff] }
 0x269   :  { %5356 = vmatprep.subr.mxu0 %v9129_v24  ;;  %5362 = vmatprep.mubr.msk.f32.mxu0 %vm6101_vm1, %v9129_v24  ;;  %v930_v57 = vand.u32 4294901760, %v6715_v46  ;;  %v6743_v53 = vsub.f32 %v784_v49, %v6731_v62  ;;  %v6746_v63 = vand.u32 4294901760, %v783_v5 }
 0x26a   :  { %5357 = vmatpush3.msra.mxu0 %v287_v7  ;;  %5396 = vmatpush3.msra.mxu1 %v6364_v47  ;;  %v6717_v47 = vand.u32 4294901760, %v785_v36  ;;  %v925_v7 = vand.u32 4294901760, %v924_v52 }
 0x26b   :  { %5358 = vmatprep.subr.mxu0 %v9129_v24  ;;  %5397 = vmatprep.mubr.msk.f32.mxu1 %vm6101_vm1, %v9129_v24  ;;  %v944_v22 = vand.u32 4294901760, %v6743_v53  ;;  %v6760_v37 = vsub.f32 %v783_v5, %v6746_v63 }
 0x26c   :  { %5359 = vmatpush3.msra.mxu0 %v294_v8  ;;  %5398 = vmatmul.mubr.f32.vlgmr.msra.gmra.mxu1 %v6453_v43  ;;  %v6729_v58 = vsub.f32 %v785_v36, %v6717_v47  ;;  %v931_v8 = vsub.f32 %v6715_v46, %v930_v57  ;;  %v777_v36 = vld [vmem:[%s9117_s2] sm:$0xff] }
 0x26d   :  { %5360 = vmatprep.subr.mxu0 %v9129_v24  ;;  %5435 = vmatprep.subr.mxu1 %v9129_v24  ;;  %v9128_v0 = vand.u32 4294901760, %v6760_v37  ;;  %v6829_v5 = vand.u32 4294901760, %v777_v36 }
 0x26e   :  { %5361 = vmatpush3.msra.mxu0 %v301_v13  ;;  %5467 = vmatprep.mubr.msk.f32.mxu1 %vm6101_vm1, %v9129_v24  ;;  %v937_v13 = vand.u32 4294901760, %v6729_v58  ;;  %v932_v14 = vand.u32 4294901760, %v931_v8 }
 0x26f   :  { %5363 = vmatmul.mubr.f32.vlgmr.msra.gmra.mxu0 %v6453_v43  ;;  %5400 = vmatprep.subr.mxu0 %v9129_v24  ;;  %v945_v43 = vsub.f32 %v6743_v53, %v944_v22  ;;  %v952_v29 = vsub.f32 %v6760_v37, %v9128_v0 }
 0x270   :  { %5432 = vmatprep.mubr.msk.f32.mxu0 %vm6101_vm1, %v9129_v24  ;;  %5401 = vmatpush3.msra.mxu0 %v6629_v25  ;;  %v938_v15 = vsub.f32 %v6729_v58, %v937_v13 }
 0x271   :  { %5402 = vmatprep.subr.mxu0 %v9129_v24  ;;  %5436 = vmatpush3.msra.mxu1 %v890_v61  ;;  %v946_v17 = vand.u32 4294901760, %v945_v43  ;;  %v6801_v61 = vsub.f32 %v780_v48, %v6785_v28  ;;  %v953_v3 = vand.u32 4294901760, %v952_v29 }
 0x272   :  { %5403 = vmatpush3.msra.mxu0 %v6631_v26  ;;  %5437 = vmatprep.subr.mxu1 %v9129_v24  ;;  %v939_v42 = vand.u32 4294901760, %v938_v15 }
 0x273   :  { %5404 = vmatprep.subr.mxu0 %v9129_v24  ;;  %5438 = vmatpush3.msra.mxu1 %v897_v2  ;;  %v6803_v2 = vand.u32 4294901760, %v779_v55 }
 0x274   :  { %5405 = vmatpush3.msra.mxu0 %v6633_v27  ;;  %5439 = vmatprep.subr.mxu1 %v9129_v24 }
 0x275   :  { %5406 = vmatprep.subr.mxu0 %v9129_v24  ;;  %5440 = vmatpush3.msra.mxu1 %v904_v4  ;;  %v778_v4 = vld [vmem:[%s9117_s2 + $0x8] sm:$0xff]  ;;  %v6817_v16 = vsub.f32 %v779_v55, %v6803_v2 }
 0x276   :  { %5407 = vmatpush3.msra.mxu0 %v6641_v31  ;;  %5441 = vmatprep.subr.mxu1 %v9129_v24  ;;  %v6819_v21 = vand.u32 4294901760, %v778_v4 }
 0x277   :  { %5408 = vmatprep.subr.mxu0 %v9129_v24  ;;  %5442 = vmatpush3.msra.mxu1 %v911_v11  ;;  %v966_v11 = vsub.f32 %v6783_v20, %v9126_v59 }
 0x278   :  { %5409 = vmatpush3.msra.mxu0 %v6643_v32  ;;  %5443 = vmatprep.subr.mxu1 %v9129_v24  ;;  %v6834_v8 = vsub.f32 %v778_v4, %v6819_v21 }
 0x279   :  { %5410 = vmatprep.subr.mxu0 %v9129_v24  ;;  %5444 = vmatpush3.msra.mxu1 %v918_v12  ;;  %v9125_v12 = vand.u32 4294901760, %v6801_v61  ;;  %v967_v49 = vand.u32 4294901760, %v966_v11 }
 0x27a   :  { %5445 = vmatprep.subr.mxu1 %v9129_v24  ;;  %5411 = vmatpush3.msra.mxu0 %v6697_v18  ;;  %v9123_v41 = vand.u32 4294901760, %v6834_v8 }
 0x27b   :  { %5412 = vmatprep.subr.mxu0 %v9129_v24  ;;  %5446 = vmatpush3.msra.mxu1 %v925_v7  ;;  %v973_v52 = vsub.f32 %v6801_v61, %v9125_v12  ;;  %v9124_v7 = vand.u32 4294901760, %v6817_v16 }
 0x27c   :  { %5413 = vmatpush3.msra.mxu0 %v6706_v35  ;;  %5447 = vmatprep.subr.mxu1 %v9129_v24  ;;  %v987_v48 = vsub.f32 %v6834_v8, %v9123_v41 }
 0x27d   :  { %5414 = vmatprep.subr.mxu0 %v9129_v24  ;;  %5448 = vmatpush3.msra.mxu1 %v932_v14  ;;  %v974_v1 = vand.u32 4294901760, %v973_v52  ;;  %v6839_v14 = vsub.f32 %v777_v36, %v6829_v5  ;;  %v980_v15 = vsub.f32 %v6817_v16, %v9124_v7 }
 0x27e   :  { %5415 = vmatpush3.msra.mxu0 %v6717_v47  ;;  %5449 = vmatprep.subr.mxu1 %v9129_v24  ;;  %v988_v29 = vand.u32 4294901760, %v987_v48 }
 0x27f   :  { %5416 = vmatprep.subr.mxu0 %v9129_v24  ;;  %5450 = vmatpush3.msra.mxu1 %v939_v42  ;;  %v9122_v42 = vand.u32 4294901760, %v6839_v14  ;;  %v981_v43 = vand.u32 4294901760, %v980_v15  ;;  %v749_v15 = vpop.permute.xlu0 %748 }
 0x280   :  { %5417 = vmatpush3.msra.mxu0 %v6731_v62  ;;  %5451 = vmatprep.subr.mxu1 %v9129_v24 }
 0x281   :  { %5418 = vmatprep.subr.mxu0 %v9129_v24  ;;  %5452 = vmatpush3.msra.mxu1 %v946_v17  ;;  %v994_v17 = vsub.f32 %v6839_v14, %v9122_v42 }
 0x282   :  { %5419 = vmatpush3.msra.mxu0 %v6746_v63  ;;  %5453 = vmatprep.subr.mxu1 %v9129_v24 }
 0x283   :  { %5420 = vmatprep.subr.mxu0 %v9129_v24  ;;  %5454 = vmatpush3.msra.mxu1 %v953_v3  ;;  %v995_v55 = vand.u32 4294901760, %v994_v17  ;;  %v764_v48 = vpop.permute.xlu0 %763 }
 0x284   :  { %5421 = vmatpush3.msra.mxu0 %v6756_v23  ;;  %5455 = vmatprep.subr.mxu1 %v9129_v24 }
 0x285   :  { %5422 = vmatprep.subr.mxu0 %v9129_v24  ;;  %5456 = vmatpush3.msra.mxu1 %v960_v9 }
 0x286   :  { %5423 = vmatpush3.msra.mxu0 %v6772_v6  ;;  %5457 = vmatprep.subr.mxu1 %v9129_v24 }
 0x287   :  { %5424 = vmatprep.subr.mxu0 %v9129_v24  ;;  %5458 = vmatpush3.msra.mxu1 %v967_v49  ;;  %v755_v42 = vpop.permute.xlu0 %754 }
 0x288   :  { %5425 = vmatpush3.msra.mxu0 %v6785_v28  ;;  %5459 = vmatprep.subr.mxu1 %v9129_v24 }
 0x289   :  { %5426 = vmatprep.subr.mxu0 %v9129_v24  ;;  %5460 = vmatpush3.msra.mxu1 %v974_v1  ;;  %v101_v1 = vld [vmem:[%s9115_s6] ss:$0 sm:$0xff] }
 0x28a   :  { %5427 = vmatpush3.msra.mxu0 %v6803_v2  ;;  %5461 = vmatprep.subr.mxu1 %v9129_v24 }
 0x28b   :  { %5428 = vmatprep.subr.mxu0 %v9129_v24  ;;  %5462 = vmatpush3.msra.mxu1 %v981_v43 }
 0x28c   :  { %5429 = vmatpush3.msra.mxu0 %v6819_v21  ;;  %5463 = vmatprep.subr.mxu1 %v9129_v24 }
 0x28d   :  { %5430 = vmatprep.subr.mxu0 %v9129_v24  ;;  %5464 = vmatpush3.msra.mxu1 %v988_v29 }
 0x28e   :  { %5431 = vmatpush3.msra.mxu0 %v6829_v5  ;;  %5465 = vmatprep.subr.mxu1 %v9129_v24 }
 0x28f   :  { %5470 = vmatprep.subr.mxu0 %v9129_v24  ;;  %5466 = vmatpush3.msra.mxu1 %v995_v55 }
 0x290   :  { %5505 = vmatprep.subr.mxu1 %v9129_v24 }
 0x2e7   :  { %v340_v56 = vpop.f32.mrf.mxu1 }
 0x2e9   :  { %v5259_v3 = vpop.f32.mrf.mxu1 }
 0x2ef   :  { %v189_v4 = vpop.f32.mrf.mxu0 }
 0x2f0   :  { %v190_v43 = vadd.f32 %v189_v4, %v101_v1 }
 0x2f1   :  { %v5224_v9 = vpop.f32.mrf.mxu0 }
 0x2f2   :  { %v341_v17 = vadd.f32 %v340_v56, %v190_v43  ;;  %v1507_v43 = vld [vmem:[%s9115_s6 + $0x15] ss:$0 sm:$0xff] }
 0x309   :  { %v533_v11 = vpop.f32.mrf.mxu1 }
 0x30b   :  { %v5329_v36 = vpop.f32.mrf.mxu1 }
 0x30c   :  { %v770_v36 = vpop.permute.xlu0 %769 }
 0x30f   :  { %v444_v49 = vpop.f32.mrf.mxu0 }
 0x310   :  { %v445_v29 = vadd.f32 %v444_v49, %v341_v17 }
 0x311   :  { %v5294_v52 = vpop.f32.mrf.mxu0 }
 0x312   :  { %v534_v41 = vadd.f32 %v533_v11, %v445_v29 }
 0x32c   :  { %v739_v55 = vpop.f32.mrf.mxu1 }
 0x32e   :  { %v5399_v7 = vpop.f32.mrf.mxu1 }
 0x32f   :  { %v652_v3 = vpop.f32.mrf.mxu0 }
 0x330   :  { %v653_v12 = vadd.f32 %v652_v3, %v534_v41 }
 0x331   :  { %v5364_v9 = vpop.f32.mrf.mxu0 }
 0x332   :  { %v6863_v59 = vadd.f32 %v739_v55, %v653_v12 }
 0x334   :  { %v743_v52 = vmax.f32 %v6863_v59, 0.0  ;;  %v751_v19 = vmul.f32 %v749_v15, %v6863_v59  ;;  %v766_v0 = vmul.f32 %v764_v48, %v6863_v59 }
 0x336   :  { %744 = vst.msk [vmem:[#allocation2] sm:$0x3] %vm27_vm0, %v743_v52  ;;  %v757_v56 = vadd.f32 %v755_v42, %v751_v19  ;;  %v772_v4 = vadd.f32 %v770_v36, %v766_v0  ;;  %v1463_v36 = vld [vmem:[%s9115_s6 + $0x12] ss:$0 sm:$0xff] }
 0x337   :  { %745 = vst.msk [vmem:[#allocation2] sm:$0x3] %vm80_vm2, %v743_v52 }
 0x338   :  { %v758_v7 = vmax.f32 %v757_v56, 0.0  ;;  %v773_v41 = vmax.f32 %v772_v4, 0.0  ;;  %v1465_v56 = vld [vmem:[%s9115_s6 + $0x13] ss:$0 sm:$0xff] }
 0x33a   :  { %760 = vst.msk [vmem:[#allocation2] sm:$0x3] %vm759_vm4, %v758_v7 }
 0x33b   :  { %775 = vst.msk [vmem:[#allocation2] sm:$0x3] %vm774_vm5, %v773_v41 }
 0x342   :  { %v776_v12 = vld [vmem:[#allocation2] sm:$0x3] }
 0x343   :  { %v6872_v11 = vand.u32 4294901760, %v776_v12 }
 0x345   :  { %5468 = vmatmul.mubr.f32.vlgmr.msra.gmra.mxu1 %v6872_v11  ;;  %v6876_v49 = vsub.f32 %v776_v12, %v6872_v11  ;;  %v3455_v12 = vld [vmem:[%s9118_s5 + $0x38] sm:$0xff] }
 0x346   :  { %5506 = vmatpush3.msra.mxu1 %v6629_v25  ;;  %5537 = vmatprep.mubr.msk.f32.mxu1 %vm6101_vm1, %v9129_v24 }
 0x347   :  { %5507 = vmatprep.subr.mxu1 %v9129_v24  ;;  %v877_v0 = vand.u32 4294901760, %v6876_v49 }
 0x348   :  { %5508 = vmatpush3.msra.mxu1 %v6631_v26 }
 0x349   :  { %5509 = vmatprep.subr.mxu1 %v9129_v24  ;;  %v878_v19 = vsub.f32 %v6876_v49, %v877_v0 }
 0x34a   :  { %5510 = vmatpush3.msra.mxu1 %v6633_v27 }
 0x34b   :  { %5511 = vmatprep.subr.mxu1 %v9129_v24  ;;  %v879_v42 = vand.u32 4294901760, %v878_v19 }
 0x34c   :  { %5512 = vmatpush3.msra.mxu1 %v6641_v31 }
 0x34d   :  { %5513 = vmatprep.subr.mxu1 %v9129_v24  ;;  %5433 = vmatmul.mubr.f32.vlgmr.msra.gmra.mxu0 %v879_v42 }
 0x34e   :  { %5471 = vmatpush3.msra.mxu0 %v6646_v33  ;;  %5514 = vmatpush3.msra.mxu1 %v6643_v32  ;;  %v9328_v33 = vand.u32 4294901760, %v6834_v8 }
 0x34f   :  { %5472 = vmatprep.subr.mxu0 %v9129_v24  ;;  %5515 = vmatprep.subr.mxu1 %v9129_v24 }
 0x350   :  { %5473 = vmatpush3.msra.mxu0 %v6649_v34  ;;  %5516 = vmatpush3.msra.mxu1 %v6697_v18  ;;  %v9329_v34 = vand.u32 4294901760, %v6839_v14 }
 0x351   :  { %5474 = vmatprep.subr.mxu0 %v9129_v24  ;;  %5517 = vmatprep.subr.mxu1 %v9129_v24 }
 0x352   :  { %5475 = vmatpush3.msra.mxu0 %v6652_v38  ;;  %5518 = vmatpush3.msra.mxu1 %v6706_v35 }
 0x353   :  { %5476 = vmatprep.subr.mxu0 %v9129_v24  ;;  %5519 = vmatprep.subr.mxu1 %v9129_v24 }
 0x354   :  { %5477 = vmatpush3.msra.mxu0 %v6656_v39  ;;  %5520 = vmatpush3.msra.mxu1 %v6717_v47 }
 0x355   :  { %5478 = vmatprep.subr.mxu0 %v9129_v24  ;;  %5521 = vmatprep.subr.mxu1 %v9129_v24 }
 0x356   :  { %5479 = vmatpush3.msra.mxu0 %v6659_v40  ;;  %5522 = vmatpush3.msra.mxu1 %v6731_v62 }
 0x357   :  { %5480 = vmatprep.subr.mxu0 %v9129_v24  ;;  %5523 = vmatprep.subr.mxu1 %v9129_v24 }
 0x358   :  { %5481 = vmatpush3.msra.mxu0 %v6704_v30  ;;  %5524 = vmatpush3.msra.mxu1 %v6746_v63 }
 0x359   :  { %5482 = vmatprep.subr.mxu0 %v9129_v24  ;;  %5525 = vmatprep.subr.mxu1 %v9129_v24 }
 0x35a   :  { %5483 = vmatpush3.msra.mxu0 %v6715_v46  ;;  %5526 = vmatpush3.msra.mxu1 %v6756_v23 }
 0x35b   :  { %5484 = vmatprep.subr.mxu0 %v9129_v24  ;;  %5527 = vmatprep.subr.mxu1 %v9129_v24 }
 0x35c   :  { %5485 = vmatpush3.msra.mxu0 %v6729_v58  ;;  %5528 = vmatpush3.msra.mxu1 %v6772_v6 }
 0x35d   :  { %5486 = vmatprep.subr.mxu0 %v9129_v24  ;;  %5529 = vmatprep.subr.mxu1 %v9129_v24 }
 0x35e   :  { %5487 = vmatpush3.msra.mxu0 %v6743_v53  ;;  %5530 = vmatpush3.msra.mxu1 %v6785_v28 }
 0x35f   :  { %5488 = vmatprep.subr.mxu0 %v9129_v24  ;;  %5531 = vmatprep.subr.mxu1 %v9129_v24 }
 0x360   :  { %5489 = vmatpush3.msra.mxu0 %v6760_v37  ;;  %5532 = vmatpush3.msra.mxu1 %v6803_v2 }
 0x361   :  { %5490 = vmatprep.subr.mxu0 %v9129_v24  ;;  %5533 = vmatprep.subr.mxu1 %v9129_v24 }
 0x362   :  { %5491 = vmatpush3.msra.mxu0 %v6770_v10  ;;  %5534 = vmatpush3.msra.mxu1 %v6819_v21 }
 0x363   :  { %5492 = vmatprep.subr.mxu0 %v9129_v24  ;;  %5535 = vmatprep.subr.mxu1 %v9129_v24 }
 0x364   :  { %5493 = vmatpush3.msra.mxu0 %v6783_v20  ;;  %5536 = vmatpush3.msra.mxu1 %v6829_v5 }
 0x365   :  { %5494 = vmatprep.subr.mxu0 %v9129_v24  ;;  %5538 = vmatmul.mubr.f32.vlgmr.msra.gmra.mxu1 %v877_v0  ;;  %v3449_v0 = vld [vmem:[%s9118_s5 + $0x8] sm:$0xff] }
 0x366   :  { %5575 = vmatprep.subr.mxu1 %v9129_v24  ;;  %5495 = vmatpush3.msra.mxu0 %v6801_v61 }
 0x367   :  { %5576 = vmatpush3.msra.mxu1 %v6629_v25  ;;  %5496 = vmatprep.subr.mxu0 %v9129_v24  ;;  %v9323_v25 = vand.u32 4294901760, %v6760_v37 }
 0x368   :  { %5577 = vmatprep.subr.mxu1 %v9129_v24  ;;  %5497 = vmatpush3.msra.mxu0 %v6817_v16 }
 0x369   :  { %5578 = vmatpush3.msra.mxu1 %v6631_v26  ;;  %5498 = vmatprep.subr.mxu0 %v9129_v24  ;;  %v9324_v26 = vand.u32 4294901760, %v6770_v10 }
 0x36a   :  { %5579 = vmatprep.subr.mxu1 %v9129_v24  ;;  %5499 = vmatpush3.msra.mxu0 %v6834_v8 }
 0x36b   :  { %5580 = vmatpush3.msra.mxu1 %v6633_v27  ;;  %5500 = vmatprep.subr.mxu0 %v9129_v24  ;;  %v9325_v27 = vand.u32 4294901760, %v6783_v20 }
 0x36c   :  { %5581 = vmatprep.subr.mxu1 %v9129_v24  ;;  %5501 = vmatpush3.msra.mxu0 %v6839_v14 }
 0x36d   :  { %5502 = vmatprep.mubr.msk.f32.mxu0 %vm6101_vm1, %v9129_v24  ;;  %5582 = vmatpush3.msra.mxu1 %v6641_v31  ;;  %v9326_v31 = vand.u32 4294901760, %v6801_v61 }
 0x36e   :  { %5503 = vmatmul.mubr.f32.vlgmr.msra.gmra.mxu0 %v6876_v49  ;;  %5540 = vmatprep.subr.mxu0 %v9129_v24  ;;  %v3451_v49 = vld [vmem:[%s9118_s5 + $0x18] sm:$0xff] }
 0x36f   :  { %5583 = vmatprep.subr.mxu1 %v9129_v24  ;;  %5541 = vmatpush3.msra.mxu0 %v888_v45 }
 0x370   :  { %5584 = vmatpush3.msra.mxu1 %v6643_v32  ;;  %5542 = vmatprep.subr.mxu0 %v9129_v24  ;;  %v9327_v32 = vand.u32 4294901760, %v6817_v16  ;;  %v6103_v16 = vmov 1983009808  }
 0x371   :  { %5585 = vmatprep.subr.mxu1 %v9129_v24  ;;  %5543 = vmatpush3.msra.mxu0 %v895_v50 }
 0x372   :  { %5586 = vmatpush3.msra.mxu1 %v6697_v18  ;;  %5544 = vmatprep.subr.mxu0 %v9129_v24  ;;  %v793_v18 = vld [vmem:[%s9115_s6 + $0x1] ss:$0 sm:$0xff] }
 0x373   :  { %5587 = vmatprep.subr.mxu1 %v9129_v24  ;;  %5545 = vmatpush3.msra.mxu0 %v902_v51 }
 0x374   :  { %5588 = vmatpush3.msra.mxu1 %v6706_v35  ;;  %5546 = vmatprep.subr.mxu0 %v9129_v24 }
 0x375   :  { %5589 = vmatprep.subr.mxu1 %v9129_v24  ;;  %5547 = vmatpush3.msra.mxu0 %v909_v54 }
 0x376   :  { %5590 = vmatpush3.msra.mxu1 %v6717_v47  ;;  %5548 = vmatprep.subr.mxu0 %v9129_v24 }
 0x377   :  { %5591 = vmatprep.subr.mxu1 %v9129_v24  ;;  %5549 = vmatpush3.msra.mxu0 %v916_v60 }
 0x378   :  { %5592 = vmatpush3.msra.mxu1 %v6731_v62  ;;  %5550 = vmatprep.subr.mxu0 %v9129_v24 }
 0x379   :  { %5593 = vmatprep.subr.mxu1 %v9129_v24  ;;  %5551 = vmatpush3.msra.mxu0 %v923_v44 }
 0x37a   :  { %5594 = vmatpush3.msra.mxu1 %v6746_v63  ;;  %5552 = vmatprep.subr.mxu0 %v9129_v24 }
 0x37b   :  { %5595 = vmatprep.subr.mxu1 %v9129_v24  ;;  %5553 = vmatpush3.msra.mxu0 %v930_v57 }
 0x37c   :  { %5596 = vmatpush3.msra.mxu1 %v6756_v23  ;;  %5554 = vmatprep.subr.mxu0 %v9129_v24 }
 0x37d   :  { %5597 = vmatprep.subr.mxu1 %v9129_v24  ;;  %5555 = vmatpush3.msra.mxu0 %v937_v13 }
 0x37e   :  { %5598 = vmatpush3.msra.mxu1 %v6772_v6  ;;  %5556 = vmatprep.subr.mxu0 %v9129_v24 }
 0x37f   :  { %5599 = vmatprep.subr.mxu1 %v9129_v24  ;;  %5557 = vmatpush3.msra.mxu0 %v944_v22 }
 0x380   :  { %5600 = vmatpush3.msra.mxu1 %v6785_v28  ;;  %5558 = vmatprep.subr.mxu0 %v9129_v24 }
 0x381   :  { %5601 = vmatprep.subr.mxu1 %v9129_v24  ;;  %5559 = vmatpush3.msra.mxu0 %v9323_v25 }
 0x382   :  { %5602 = vmatpush3.msra.mxu1 %v6803_v2  ;;  %5560 = vmatprep.subr.mxu0 %v9129_v24 }
 0x383   :  { %5603 = vmatprep.subr.mxu1 %v9129_v24  ;;  %5561 = vmatpush3.msra.mxu0 %v9324_v26 }
 0x384   :  { %5604 = vmatpush3.msra.mxu1 %v6819_v21  ;;  %5562 = vmatprep.subr.mxu0 %v9129_v24  ;;  %v1439_v21 = vunpack.c.l.s4 %v6103_v16 }
 0x385   :  { %5605 = vmatprep.subr.mxu1 %v9129_v24  ;;  %5563 = vmatpush3.msra.mxu0 %v9325_v27 }
 0x386   :  { %5606 = vmatpush3.msra.mxu1 %v6829_v5  ;;  %5607 = vmatprep.mubr.msk.f32.mxu1 %vm6101_vm1, %v9129_v24  ;;  %v1441_v5 = vlaneseq  ;;  %v1440_v1 = vunpack.c.0.s8 %v1439_v21 }
 0x387   :  { %5564 = vmatprep.subr.mxu0 %v9129_v24  ;;  %5608 = vmatmul.mubr.f32.vlgmr.msra.gmra.mxu1 %v6872_v11 }
 0x388   :  { %5565 = vmatpush3.msra.mxu0 %v9326_v31  ;;  %5572 = vmatprep.mubr.msk.f32.mxu0 %vm6101_vm1, %v9129_v24  ;;  %v7051_v15 = vshrl.u32 %v1441_v5, 7  ;;  %v1501_v31 = vld [vmem:[%s9115_s6 + $0x14] ss:$0 sm:$0xff] }
 0x389   :  { %5566 = vmatprep.subr.mxu0 %v9129_v24 }
 0x38a   :  { %5567 = vmatpush3.msra.mxu0 %v9327_v32  ;;  %9331 = vst [vmem:[#allocation4_spill] sm:$0xff] %v7051_v15  ;;  %v7058_v48 = vsub.s32 %v1440_v1, %v7051_v15  ;;  %v1558_v32 = vld [vmem:[%s9119_s3 + $0xf8] sm:$0xff] }
 0x38b   :  { %5568 = vmatprep.subr.mxu0 %v9129_v24 }
 0x38c   :  { %5569 = vmatpush3.msra.mxu0 %v9328_v33  ;;  %9332 = vst [vmem:[#allocation5_spill] sm:$0xff] %v7058_v48  ;;  %v1444_v17 = vrot.slane %v6863_v59, %v7058_v48  ;;  %v1557_v33 = vld [vmem:[%s9119_s3 + $0xf0] sm:$0xff] }
 0x38d   :  { %5570 = vmatprep.subr.mxu0 %v9129_v24 }
 0x38e   :  { %5571 = vmatpush3.msra.mxu0 %v9329_v34  ;;  %v1556_v34 = vld [vmem:[%s9119_s3 + $0xe8] sm:$0xff] }
 0x38f   :  { %5573 = vmatmul.mubr.f32.vlgmr.msra.gmra.mxu0 %v6872_v11  ;;  %v3453_v11 = vld [vmem:[%s9118_s5 + $0x28] sm:$0xff] }
 0x405   :  { %v1032_v38 = vpop.f32.mrf.mxu1 }
 0x407   :  { %v5469_v39 = vpop.f32.mrf.mxu1 }
 0x408   :  { %v7114_v39 = vand.u32 4294901760, %v1557_v33 }
 0x40d   :  { %v881_v40 = vpop.f32.mrf.mxu0 }
 0x40e   :  { %v882_v30 = vadd.f32 %v881_v40, %v793_v18  ;;  %v7116_v40 = vand.u32 4294901760, %v1556_v34 }
 0x40f   :  { %v5434_v45 = vpop.f32.mrf.mxu0 }
 0x410   :  { %v1033_v44 = vadd.f32 %v1032_v38, %v882_v30  ;;  %v7112_v38 = vand.u32 4294901760, %v1558_v32  ;;  %v1555_v45 = vld [vmem:[%s9119_s3 + $0xe0] sm:$0xff]  ;;  %v1552_v30 = vld [vmem:[%s9119_s3 + $0xc8] sm:$0xff] }
 0x412   :  { %1610 = vmatprep.subr.mxu0 %v7112_v38 }
 0x413   :  { %1612 = vmatpush1.msra.mxu0 %v7114_v39 }
 0x414   :  { %1614 = vmatprep.subr.mxu0 %v7116_v40 }
 0x425   :  { %v1225_v50 = vpop.f32.mrf.mxu1 }
 0x427   :  { %v5539_v51 = vpop.f32.mrf.mxu1 }
 0x428   :  { %v1553_v51 = vld [vmem:[%s9119_s3 + $0xd0] sm:$0xff] }
 0x429   :  { %v7131_v18 = vand.u32 4294901760, %v1553_v51 }
 0x42e   :  { %v1136_v54 = vpop.f32.mrf.mxu0 }
 0x42f   :  { %v1137_v47 = vadd.f32 %v1136_v54, %v1033_v44  ;;  %v7127_v54 = vand.u32 4294901760, %v1555_v45  ;;  %v7140_v44 = vsub.f32 %v1558_v32, %v7112_v38  ;;  %v1543_v32 = vld [vmem:[%s9119_s3 + $0x80] sm:$0xff] }
 0x430   :  { %v5504_v60 = vpop.f32.mrf.mxu0 }
 0x431   :  { %v1226_v57 = vadd.f32 %v1225_v50, %v1137_v47  ;;  %v1554_v50 = vld [vmem:[%s9119_s3 + $0xd8] sm:$0xff]  ;;  %v7146_v47 = vsub.f32 %v1556_v34, %v7116_v40  ;;  %1616 = vmatpush1.msra.mxu0 %v7127_v54 }
 0x432   :  { %v7129_v60 = vand.u32 4294901760, %v1554_v50 }
 0x434   :  { %1618 = vmatprep.subr.mxu0 %v7129_v60 }
 0x435   :  { %1620 = vmatpush1.msra.mxu0 %v7131_v18 }
 0x447   :  { %v1431_v35 = vpop.f32.mrf.mxu1 }
 0x449   :  { %v5609_v46 = vpop.f32.mrf.mxu1 }
 0x44a   :  { %v7143_v46 = vsub.f32 %v1557_v33, %v7114_v39 }
 0x44f   :  { %v1344_v58 = vpop.f32.mrf.mxu0 }
 0x450   :  { %v1345_v62 = vadd.f32 %v1344_v58, %v1226_v57  ;;  %v7148_v57 = vand.u32 4294901760, %v1552_v30  ;;  %v7152_v58 = vsub.f32 %v1555_v45, %v7127_v54 }
 0x451   :  { %v5574_v13 = vpop.f32.mrf.mxu0 }
 0x452   :  { %v7036_v53 = vadd.f32 %v1431_v35, %v1345_v62  ;;  %v1551_v35 = vld [vmem:[%s9119_s3 + $0xc0] sm:$0xff]  ;;  %v7155_v62 = vsub.f32 %v1554_v50, %v7129_v60  ;;  %v7158_v13 = vsub.f32 %v1553_v51, %v7131_v18  ;;  %1622 = vmatprep.subr.mxu0 %v7148_v57 }
 0x454   :  { %9330 = vst [vmem:[#allocation3_spill] sm:$0xff] %v7036_v53  ;;  %1481 = vrot.lane.b32.xlu1 %v7036_v53, %s6098_s26  ;;  %1436 = vst.msk [vmem:[#allocation2] sm:$0x3] %vm1435_vm6, %v7036_v53  ;;  %v1450_v63 = vsel %vm27_vm0, %v7036_v53, 0.0  ;;  %v7090_v19 = vmul.f32 %v7036_v53, %v7036_v53 }
 0x478   :  { %1451 = vadd.xlane.f32.xlu1 %v1450_v63  ;;  %v7160_v63 = vand.u32 4294901760, %v1551_v35 }
 0x47a   :  { %1624 = vmatpush1.msra.mxu0 %v7160_v63 }
 0x4c6   :  { %v1482_v22 = vpop.permute.xlu1 %1481 }
 0x4c7   :  { %v1484_v23 = vsel %vm27_vm0, %v1482_v22, 0.0  ;;  %v9146_v22 = vand.u32 4294901760, %v7140_v44 }
 0x4c8   :  { %1485 = vadd.xlane.f32.xlu0 %v1484_v23  ;;  %v9145_v23 = vand.u32 4294901760, %v7143_v46 }
 0x4ca   :  { %v1755_v16 = vsub.f32 %v7143_v46, %v9145_v23 }
 0x501   :  { %v1452_v37 = vpop.xlane.xlu1 %1451 }
 0x502   :  { %v1453_v10 = vmul.f32 0.03125, %v1452_v37  ;;  %v9144_v37 = vand.u32 4294901760, %v7146_v47 }
 0x504   :  { %v1454_v6 = vsub.f32 %v7036_v53, %v1453_v10  ;;  %v7167_v10 = vsub.f32 %v1552_v30, %v7148_v57  ;;  %v1761_v21 = vsub.f32 %v7146_v47, %v9144_v37 }
 0x506   :  { %v1455_v20 = vmul.f32 %v1454_v6, %v1454_v6  ;;  %v9139_v5 = vand.u32 4294901760, %v7167_v10 }
 0x508   :  { %v1456_v28 = vsel %vm27_vm0, %v1455_v20, 0.0  ;;  %v9141_v20 = vand.u32 4294901760, %v7155_v62 }
 0x509   :  { %1457 = vadd.xlane.f32.xlu1 %v1456_v28  ;;  %v9140_v28 = vand.u32 4294901760, %v7158_v13 }
 0x50a   :  { %v1773_v1 = vsub.f32 %v7155_v62, %v9141_v20 }
 0x551   :  { %v1486_v61 = vpop.xlane.xlu0 %1485 }
 0x552   :  { %v1487_v2 = vmul.f32 0.03125, %v1486_v61  ;;  %v7174_v61 = vsub.f32 %v1551_v35, %v7160_v63 }
 0x554   :  { %v7047_v8 = vsub.f32 %v7036_v53, %v1487_v2  ;;  %v1749_v2 = vsub.f32 %v7140_v44, %v9146_v22 }
 0x556   :  { %v1489_v14 = vmul.f32 %v7047_v8, %v7047_v8 }
 0x558   :  { %1491 = vrot.lane.b32.xlu0 %v1489_v14, %s6098_s26 }
 0x55c   :  { %1509 = vrot.lane.b32.xlu0 %v1507_v43, %s6099_s28  ;;  %v1779_v43 = vsub.f32 %v7158_v13, %v9140_v28 }
 0x560   :  { %1445 = vrot.lane.b32.xlu0 %v1444_v17, %s6099_s28  ;;  %v9138_v17 = vand.u32 4294901760, %v7174_v61 }
 0x592   :  { %v1458_v29 = vpop.xlane.xlu1 %1457 }
 0x593   :  { %v1459_v55 = vmul.f32 0.03125, %v1458_v29  ;;  %v1550_v29 = vld [vmem:[%s9119_s3 + $0xb8] sm:$0xff] }
 0x595   :  { %v1460_v3 = vadd.f32 1e-05, %v1459_v55  ;;  %v1549_v55 = vld [vmem:[%s9119_s3 + $0xb0] sm:$0xff] }
 0x597   :  { %6062 = vrsqrt.f32 %v1460_v3  ;;  %v1548_v3 = vld [vmem:[%s9119_s3 + $0xa8] sm:$0xff] }
 0x5a4   :  { %v6063_v9 = vpop.eup %6062 }
 0x5a5   :  { %v1462_v52 = vmul.f32 %v6063_v9, %v1454_v6  ;;  %v9142_v6 = vand.u32 4294901760, %v7152_v58  ;;  %v1750_v9 = vand.u32 4294901760, %v1749_v2 }
 0x5a7   :  { %v1464_v4 = vmul.f32 %v1463_v36, %v1462_v52  ;;  %v1767_v14 = vsub.f32 %v7152_v58, %v9142_v6  ;;  %v1756_v36 = vand.u32 4294901760, %v1755_v16  ;;  %v1762_v52 = vand.u32 4294901760, %v1761_v21  ;;  %1751 = vmatprep.subr.mxu1 %v1750_v9 }
 0x5a9   :  { %v1466_v7 = vadd.f32 %v1465_v56, %v1464_v4  ;;  %v1785_v56 = vsub.f32 %v7167_v10, %v9139_v5  ;;  %v1547_v4 = vld [vmem:[%s9119_s3 + $0xa0] sm:$0xff]  ;;  %1757 = vmatpush1.msra.mxu1 %v1756_v36 }
 0x5aa   :  { %v7237_v34 = vand.u32 4294901760, %v1547_v4  ;;  %1763 = vmatprep.subr.mxu1 %v1762_v52 }
 0x5ab   :  { %v1467_v41 = vmax.f32 %v1466_v7, 0.0  ;;  %v1546_v7 = vld [vmem:[%s9119_s3 + $0x98] sm:$0xff] }
 0x5ac   :  { %v7239_v45 = vand.u32 4294901760, %v1546_v7  ;;  %v7256_v16 = vsub.f32 %v1547_v4, %v7237_v34 }
 0x5ad   :  { %v1475_v59 = vrot.slane %v1467_v41, %v7058_v48  ;;  %v1545_v41 = vld [vmem:[%s9119_s3 + $0x90] sm:$0xff] }
 0x5ae   :  { %v7241_v50 = vand.u32 4294901760, %v1545_v41  ;;  %v7259_v21 = vsub.f32 %v1546_v7, %v7239_v45  ;;  %v9132_v9 = vand.u32 4294901760, %v7256_v16 }
 0x5af   :  { %1476 = vrot.lane.b32.xlu0 %v1475_v59, %s6099_s28  ;;  %v1768_v59 = vand.u32 4294901760, %v1767_v14 }
 0x5b0   :  { %v7262_v14 = vsub.f32 %v1545_v41, %v7241_v50  ;;  %v9131_v36 = vand.u32 4294901760, %v7259_v21 }
 0x5b1   :  { %1769 = vmatpush1.msra.mxu1 %v1768_v59 }
 0x5b2   :  { %v9133_v52 = vand.u32 4294901760, %v7262_v14 }
 0x5b3   :  { %4022 = vrot.lane.b32.xlu0 %v3455_v12, %s6102_s23  ;;  %v1774_v12 = vand.u32 4294901760, %v1773_v1  ;;  %v7264_v1 = vand.u32 4294901760, %v1543_v32 }
 0x5b5   :  { %1775 = vmatprep.subr.mxu1 %v1774_v12  ;;  %v1815_v12 = vsub.f32 %v7256_v16, %v9132_v9 }
 0x5b7   :  { %4018 = vrot.lane.b32.xlu0 %v3453_v11, %s6102_s23  ;;  %v1780_v11 = vand.u32 4294901760, %v1779_v43 }
 0x5b9   :  { %1781 = vmatpush1.msra.mxu1 %v1780_v11  ;;  %v1821_v11 = vsub.f32 %v7259_v21, %v9131_v36 }
 0x5bb   :  { %4014 = vrot.lane.b32.xlu0 %v3451_v49, %s6102_s23  ;;  %v1791_v49 = vsub.f32 %v7174_v61, %v9138_v17  ;;  %v1536_v17 = vld [vmem:[%s9119_s3 + $0x48] sm:$0xff] }
 0x5bc   :  { %v7356_v22 = vand.u32 4294901760, %v1536_v17 }
 0x5bd   :  { %v1792_v33 = vand.u32 4294901760, %v1791_v49  ;;  %v1827_v49 = vsub.f32 %v7262_v14, %v9133_v52 }
 0x5be   :  { %9338 = vst [vmem:[#allocation11_spill] sm:$0xff] %v7356_v22 }
 0x5bf   :  { %4010 = vrot.lane.b32.xlu0 %v3449_v0, %s6102_s23  ;;  %v1544_v0 = vld [vmem:[%s9119_s3 + $0x88] sm:$0xff] }
 0x5c0   :  { %v7252_v2 = vand.u32 4294901760, %v1544_v0 }
 0x5c3   :  { %4574 = vrot.lane.b32.xlu0 %v7090_v19, %s6102_s23 }
 0x5ca   :  { %v1492_v42 = vpop.permute.xlu0 %1491 }
 0x5cb   :  { %v1494_v25 = vsel %vm27_vm0, %v1492_v42, 0.0  ;;  %v1786_v42 = vand.u32 4294901760, %v1785_v56  ;;  %v7278_v56 = vsub.f32 %v1543_v32, %v7264_v1  ;;  %v1541_v32 = vld [vmem:[%s9119_s3 + $0x70] sm:$0xff] }
 0x5cc   :  { %1495 = vadd.xlane.f32.xlu1 %v1494_v25  ;;  %v7228_v25 = vand.u32 4294901760, %v1550_v29  ;;  %v7334_v20 = vand.u32 4294901760, %v1541_v32 }
 0x5cd   :  { %9334 = vst [vmem:[#allocation7_spill] sm:$0xff] %v7278_v56  ;;  %1787 = vmatprep.subr.mxu1 %v1786_v42  ;;  %v1542_v42 = vld [vmem:[%s9119_s3 + $0x78] sm:$0xff] }
 0x5ce   :  { %v7095_v26 = vpop.permute.xlu0 %1509  ;;  %v7244_v51 = vsub.f32 %v1550_v29, %v7228_v25  ;;  %1626 = vmatprep.subr.mxu0 %v7228_v25  ;;  %1793 = vmatpush1.msra.mxu1 %v1792_v33  ;;  %v1540_v33 = vld [vmem:[%s9119_s3 + $0x68] sm:$0xff]  ;;  %v7332_v28 = vand.u32 4294901760, %v1542_v42 }
 0x5cf   :  { %v7336_v6 = vand.u32 4294901760, %v1540_v33 }
 0x5d0   :  { %v9136_v43 = vand.u32 4294901760, %v7244_v51 }
 0x5d1   :  { %v7354_v23 = vsub.f32 %v1540_v33, %v7336_v6 }
 0x5d2   :  { %v1446_v27 = vpop.permute.xlu0 %1445  ;;  %v1797_v4 = vsub.f32 %v7244_v51, %v9136_v43  ;;  %v1537_v43 = vld [vmem:[%s9119_s3 + $0x50] sm:$0xff] }
 0x5d3   :  { %1448 = vst.msk [vmem:[#allocation2] sm:$0x3] %vm774_vm5, %v1446_v27  ;;  %v7345_v37 = vand.u32 4294901760, %v1537_v43  ;;  %9337 = vst [vmem:[#allocation10_spill] sm:$0xff] %v7354_v23 }
 0x5d4   :  { %1449 = vst.msk [vmem:[#allocation2 + $0x2] sm:$0x3] %vm27_vm0, %v1446_v27  ;;  %v7230_v27 = vand.u32 4294901760, %v1549_v55  ;;  %v1798_v24 = vand.u32 4294901760, %v1797_v4  ;;  %v1816_v4 = vand.u32 4294901760, %v1815_v12  ;;  %v1535_v12 = vld [vmem:[%s9119_s3 + $0x40] sm:$0xff] }
 0x5d6   :  { %v7247_v30 = vsub.f32 %v1549_v55, %v7230_v27  ;;  %1628 = vmatpush1.msra.mxu0 %v7230_v27  ;;  %1799 = vmatprep.subr.mxu1 %v1798_v24  ;;  %v7348_v24 = vsub.f32 %v1542_v42, %v7332_v28  ;;  %v7368_v42 = vand.u32 4294901760, %v1535_v12 }
 0x5d8   :  { %v9135_v29 = vand.u32 4294901760, %v7247_v30  ;;  %9335 = vst [vmem:[#allocation8_spill] sm:$0xff] %v7348_v24  ;;  %9342 = vst [vmem:[#allocation15_spill] sm:$0xff] %v7368_v42 }
 0x5da   :  { %v1803_v7 = vsub.f32 %v7247_v30, %v9135_v29  ;;  %v1538_v29 = vld [vmem:[%s9119_s3 + $0x58] sm:$0xff] }
 0x5dc   :  { %v1804_v36 = vand.u32 4294901760, %v1803_v7  ;;  %v1822_v7 = vand.u32 4294901760, %v1821_v11 }
 0x5dd   :  { %1503 = vrot.lane.b32.xlu1 %v1501_v31, %s6099_s28  ;;  %v7232_v31 = vand.u32 4294901760, %v1548_v3 }
 0x5de   :  { %1805 = vmatpush1.msra.mxu1 %v1804_v36 }
 0x5df   :  { %v7250_v35 = vsub.f32 %v1548_v3, %v7232_v31  ;;  %v7271_v3 = vsub.f32 %v1544_v0, %v7252_v2  ;;  %1630 = vmatprep.subr.mxu0 %v7232_v31  ;;  %v9143_v0 = vand.u32 4294901760, %v7278_v56 }
 0x5e0   :  { %1632 = vmatpush1.msra.mxu0 %v7237_v34 }
 0x5e1   :  { %v9134_v55 = vand.u32 4294901760, %v7250_v35  ;;  %9333 = vst [vmem:[#allocation6_spill] sm:$0xff] %v7271_v3  ;;  %v9137_v59 = vand.u32 4294901760, %v7271_v3  ;;  %1634 = vmatprep.subr.mxu0 %v7239_v45 }
 0x5e2   :  { %1636 = vmatpush1.msra.mxu0 %v7241_v50 }
 0x5e3   :  { %v1809_v41 = vsub.f32 %v7250_v35, %v9134_v55  ;;  %v1833_v52 = vsub.f32 %v7271_v3, %v9137_v59  ;;  %v1539_v55 = vld [vmem:[%s9119_s3 + $0x60] sm:$0xff]  ;;  %1638 = vmatprep.subr.mxu0 %v7252_v2  ;;  %v1839_v59 = vsub.f32 %v7278_v56, %v9143_v0  ;;  %v7343_v0 = vand.u32 4294901760, %v1538_v29 }
 0x5e4   :  { %1640 = vmatpush1.msra.mxu0 %v7264_v1 }
 0x5e5   :  { %v1810_v9 = vand.u32 4294901760, %v1809_v41  ;;  %v1828_v41 = vand.u32 4294901760, %v1827_v49  ;;  %v1834_v5 = vand.u32 4294901760, %v1833_v52  ;;  %v1840_v11 = vand.u32 4294901760, %v1839_v59  ;;  %1642 = vmatprep.subr.mxu0 %v7332_v28 }
 0x5e6   :  { %v7341_v49 = vand.u32 4294901760, %v1539_v55  ;;  %v7351_v52 = vsub.f32 %v1541_v32, %v7334_v20  ;;  %v7363_v59 = vsub.f32 %v1538_v29, %v7343_v0  ;;  %1644 = vmatpush1.msra.mxu0 %v7334_v20  ;;  %v9151_v32 = vand.u32 4294901760, %v7348_v24 }
 0x5e7   :  { %1811 = vmatprep.subr.mxu1 %v1810_v9  ;;  %v7366_v9 = vsub.f32 %v1537_v43, %v7345_v37  ;;  %1646 = vmatprep.subr.mxu0 %v7336_v6 }
 0x5e8   :  { %9336 = vst [vmem:[#allocation9_spill] sm:$0xff] %v7351_v52  ;;  %1817 = vmatpush1.msra.mxu1 %v1816_v4  ;;  %v7360_v36 = vsub.f32 %v1539_v55, %v7341_v49  ;;  %9340 = vst [vmem:[#allocation13_spill] sm:$0xff] %v7363_v59  ;;  %v9152_v33 = vand.u32 4294901760, %v7351_v52  ;;  %v9155_v4 = vand.u32 4294901760, %v7354_v23  ;;  %v7375_v55 = vsub.f32 %v1536_v17, %v7356_v22 }
 0x5e9   :  { %9341 = vst [vmem:[#allocation14_spill] sm:$0xff] %v7366_v9  ;;  %1823 = vmatprep.subr.mxu1 %v1822_v7  ;;  %v9159_v53 = vand.u32 4294901760, %v7363_v59  ;;  %v7382_v7 = vsub.f32 %v1535_v12, %v7368_v42  ;;  %1648 = vmatpush1.msra.mxu0 %v7341_v49  ;;  %v1845_v17 = vsub.f32 %v7348_v24, %v9151_v32  ;;  %v9345_v32 = vand.u32 4294901760, %v7366_v9 }
 0x5ea   :  { %9339 = vst [vmem:[#allocation12_spill] sm:$0xff] %v7360_v36  ;;  %9343 = vst [vmem:[#allocation16_spill] sm:$0xff] %v7375_v55  ;;  %1829 = vmatpush1.msra.mxu1 %v1828_v41  ;;  %v9156_v43 = vand.u32 4294901760, %v7360_v36  ;;  %v1851_v41 = vsub.f32 %v7351_v52, %v9152_v33  ;;  %v1857_v15 = vsub.f32 %v7354_v23, %v9155_v4  ;;  %1650 = vmatprep.subr.mxu0 %v7343_v0  ;;  %v1534_v4 = vld [vmem:[%s9119_s3 + $0x38] sm:$0xff]  ;;  %v1531_v52 = vld [vmem:[%s9119_s3 + $0x20] sm:$0xff] }
 0x5eb   :  { %9344 = vst [vmem:[#allocation17_spill] sm:$0xff] %v7382_v7  ;;  %1835 = vmatprep.subr.mxu1 %v1834_v5  ;;  %v1875_v33 = vsub.f32 %v7366_v9, %v9345_v32  ;;  %1652 = vmatpush1.msra.mxu0 %v7345_v37  ;;  %v1532_v32 = vld [vmem:[%s9119_s3 + $0x28] sm:$0xff]  ;;  %v1530_v9 = vld [vmem:[%s9119_s3 + $0x18] sm:$0xff]  ;;  %v7434_v23 = vand.u32 4294901760, %v1534_v4 }
 0x5ec   :  { %1841 = vmatpush1.msra.mxu1 %v1840_v11  ;;  %v1863_v5 = vsub.f32 %v7360_v36, %v9156_v43  ;;  %v1533_v11 = vld [vmem:[%s9119_s3 + $0x30] sm:$0xff]  ;;  %v1846_v43 = vand.u32 4294901760, %v1845_v17  ;;  %v1852_v12 = vand.u32 4294901760, %v1851_v41  ;;  %v1858_v36 = vand.u32 4294901760, %v1857_v15  ;;  %1654 = vmatprep.subr.mxu0 %v7356_v22 }
 0x5ed   :  { %v9347_v15 = vand.u32 4294901760, %v7382_v7  ;;  %1656 = vmatpush1.msra.mxu0 %v7368_v42  ;;  %9348 = vst [vmem:[#allocation18_spill] sm:$0xff] %v7434_v23  ;;  %v7436_v24 = vand.u32 4294901760, %v1533_v11  ;;  %v1876_v56 = vand.u32 4294901760, %v1875_v33  ;;  %v7438_v22 = vand.u32 4294901760, %v1532_v32 }
 0x5ee   :  { %v1864_v17 = vand.u32 4294901760, %v1863_v5  ;;  %1847 = vmatprep.subr.mxu1 %v1846_v43  ;;  %v7440_v5 = vand.u32 4294901760, %v1531_v52  ;;  %v7442_v3 = vand.u32 4294901760, %v1530_v9  ;;  %1658 = vmatprep.subr.mxu0 %v7434_v23 }
 0x5ef   :  { %v1887_v41 = vsub.f32 %v7382_v7, %v9347_v15  ;;  %9349 = vst [vmem:[#allocation19_spill] sm:$0xff] %v7436_v24  ;;  %1853 = vmatpush1.msra.mxu1 %v1852_v12  ;;  %9350 = vst [vmem:[#allocation20_spill] sm:$0xff] %v7438_v22  ;;  %v7445_v7 = vsub.f32 %v1534_v4, %v7434_v23  ;;  %v7448_v43 = vsub.f32 %v1533_v11, %v7436_v24 }
 0x5f0   :  { %9351 = vst [vmem:[#allocation21_spill] sm:$0xff] %v7440_v5  ;;  %9352 = vst [vmem:[#allocation22_spill] sm:$0xff] %v7442_v3  ;;  %1859 = vmatprep.subr.mxu1 %v1858_v36  ;;  %v7454_v12 = vsub.f32 %v1532_v32, %v7438_v22  ;;  %v7457_v42 = vsub.f32 %v1531_v52, %v7440_v5  ;;  %v7460_v36 = vsub.f32 %v1530_v9, %v7442_v3 }
 0x5f1   :  { %9353 = vst [vmem:[#allocation23_spill] sm:$0xff] %v7445_v7  ;;  %9354 = vst [vmem:[#allocation24_spill] sm:$0xff] %v7448_v43  ;;  %1865 = vmatpush1.msra.mxu1 %v1864_v17  ;;  %v1888_v33 = vand.u32 4294901760, %v1887_v41  ;;  %1660 = vmatpush1.msra.mxu0 %v7436_v24  ;;  %v9182_v4 = vand.u32 4294901760, %v7445_v7  ;;  %v9183_v11 = vand.u32 4294901760, %v7448_v43 }
 0x5f2   :  { %9356 = vst [vmem:[#allocation26_spill] sm:$0xff] %v7454_v12  ;;  %9357 = vst [vmem:[#allocation27_spill] sm:$0xff] %v7457_v42  ;;  %1662 = vmatprep.subr.mxu0 %v7438_v22  ;;  %v9184_v52 = vand.u32 4294901760, %v7454_v12  ;;  %v9185_v32 = vand.u32 4294901760, %v7457_v42 }
 0x5f3   :  { %9358 = vst [vmem:[#allocation28_spill] sm:$0xff] %v7460_v36  ;;  %1664 = vmatpush1.msra.mxu0 %v7440_v5 }
 0x5f4   :  { %v1905_v9 = vsub.f32 %v7454_v12, %v9184_v52  ;;  %1666 = vmatprep.subr.mxu0 %v7442_v3  ;;  %v1582_v52 = vld [vmem:[%s9119_s3 + $0x1b8] sm:$0xff] }
 0x5f5   :  { %v7517_v22 = vand.u32 4294901760, %v1582_v52 }
 0x5f7   :  { %9365 = vst [vmem:[#allocation33_spill] sm:$0xff] %v7517_v22 }
 0x621   :  { %v1477_v29 = vpop.permute.xlu0 %1476 }
 0x622   :  { %1479 = vst.msk [vmem:[#allocation2 + $0x2] sm:$0x3] %vm80_vm2, %v1477_v29  ;;  %v1869_v29 = vsub.f32 %v7363_v59, %v9159_v53  ;;  %v9346_v53 = vand.u32 4294901760, %v7375_v55 }
 0x624   :  { %v1881_v59 = vsub.f32 %v7375_v55, %v9346_v53  ;;  %v1529_v53 = vld [vmem:[%s9119_s3 + $0x10] sm:$0xff]  ;;  %v1870_v55 = vand.u32 4294901760, %v1869_v29 }
 0x625   :  { %v7450_v29 = vand.u32 4294901760, %v1529_v53 }
 0x626   :  { %v1882_v15 = vand.u32 4294901760, %v1881_v59  ;;  %v1528_v59 = vld [vmem:[%s9119_s3 + $0x8] sm:$0xff]  ;;  %1871 = vmatprep.subr.mxu1 %v1870_v55  ;;  %v1893_v55 = vsub.f32 %v7445_v7, %v9182_v4 }
 0x627   :  { %9355 = vst [vmem:[#allocation25_spill] sm:$0xff] %v7450_v29  ;;  %1877 = vmatpush1.msra.mxu1 %v1876_v56  ;;  %v7473_v17 = vsub.f32 %v1529_v53, %v7450_v29  ;;  %v1899_v56 = vsub.f32 %v7448_v43, %v9183_v11  ;;  %v7482_v41 = vand.u32 4294901760, %v1528_v59  ;;  %v1911_v53 = vsub.f32 %v7457_v42, %v9185_v32  ;;  %v1527_v11 = vld [vmem:[%s9119_s3] sm:$0xff]  ;;  %v1581_v32 = vld [vmem:[%s9119_s3 + $0x1b0] sm:$0xff] }
 0x628   :  { %1883 = vmatprep.subr.mxu1 %v1882_v15  ;;  %v9361_v15 = vand.u32 4294901760, %v7460_v36  ;;  %1668 = vmatpush1.msra.mxu0 %v7450_v29  ;;  %v7515_v3 = vand.u32 4294901760, %v1527_v11  ;;  %v7519_v29 = vand.u32 4294901760, %v1581_v32 }
 0x629   :  { %9359 = vst [vmem:[#allocation29_spill] sm:$0xff] %v7473_v17  ;;  %9360 = vst [vmem:[#allocation30_spill] sm:$0xff] %v7482_v41  ;;  %1889 = vmatpush1.msra.mxu1 %v1888_v33  ;;  %v1894_v33 = vand.u32 4294901760, %v1893_v55  ;;  %v1900_v4 = vand.u32 4294901760, %v1899_v56  ;;  %v1912_v42 = vand.u32 4294901760, %v1911_v53  ;;  %1670 = vmatprep.subr.mxu0 %v7482_v41  ;;  %v9362_v12 = vand.u32 4294901760, %v7473_v17 }
 0x62a   :  { %v1917_v5 = vsub.f32 %v7460_v36, %v9361_v15  ;;  %v1580_v15 = vld [vmem:[%s9119_s3 + $0x1a8] sm:$0xff]  ;;  %v1906_v36 = vand.u32 4294901760, %v1905_v9  ;;  %v7513_v7 = vsub.f32 %v1528_v59, %v7482_v41  ;;  %9364 = vst [vmem:[#allocation32_spill] sm:$0xff] %v7515_v3  ;;  %9366 = vst [vmem:[#allocation34_spill] sm:$0xff] %v7519_v29  ;;  %v7528_v59 = vsub.f32 %v1527_v11, %v7515_v3 }
 0x62b   :  { %1895 = vmatprep.subr.mxu1 %v1894_v33  ;;  %v1923_v43 = vsub.f32 %v7473_v17, %v9362_v12  ;;  %v7521_v9 = vand.u32 4294901760, %v1580_v15  ;;  %v7534_v53 = vsub.f32 %v1581_v32, %v7519_v29  ;;  %1672 = vmatpush1.msra.mxu0 %v7515_v3  ;;  %v1578_v32 = vld [vmem:[%s9119_s3 + $0x198] sm:$0xff] }
 0x62c   :  { %v1918_v55 = vand.u32 4294901760, %v1917_v5  ;;  %9363 = vst [vmem:[#allocation31_spill] sm:$0xff] %v7513_v7  ;;  %1901 = vmatpush1.msra.mxu1 %v1900_v4  ;;  %v1579_v5 = vld [vmem:[%s9119_s3 + $0x1a0] sm:$0xff]  ;;  %v9202_v12 = vand.u32 4294901760, %v7513_v7  ;;  %9368 = vst [vmem:[#allocation36_spill] sm:$0xff] %v7528_v59  ;;  %v7531_v4 = vsub.f32 %v1582_v52, %v7517_v22  ;;  %1682 = vmatprep.subr.mxu0 %v7517_v22 }
 0x62d   :  { %9367 = vst [vmem:[#allocation35_spill] sm:$0xff] %v7521_v9  ;;  %1907 = vmatprep.subr.mxu1 %v1906_v36  ;;  %v1924_v56 = vand.u32 4294901760, %v1923_v43  ;;  %9370 = vst [vmem:[#allocation38_spill] sm:$0xff] %v7534_v53  ;;  %v7538_v33 = vsub.f32 %v1580_v15, %v7521_v9  ;;  %v7540_v36 = vand.u32 4294901760, %v1579_v5  ;;  %v9211_v43 = vand.u32 4294901760, %v7528_v59  ;;  %1684 = vmatpush2.msra.mxu0 %v7519_v29 }
 0x62e   :  { %1913 = vmatpush1.msra.mxu1 %v1912_v42  ;;  %9369 = vst [vmem:[#allocation37_spill] sm:$0xff] %v7531_v4  ;;  %v1929_v42 = vsub.f32 %v7513_v7, %v9202_v12  ;;  %v9212_v11 = vand.u32 4294901760, %v7531_v4  ;;  %1686 = vmatprep.subr.mxu0 %v7521_v9  ;;  %v9374_v15 = vand.u32 4294901760, %v7534_v53  ;;  %v7575_v9 = vand.u32 4294901760, %v1578_v32 }
 0x62f   :  { %1919 = vmatprep.subr.mxu1 %v1918_v55  ;;  %9371 = vst [vmem:[#allocation39_spill] sm:$0xff] %v7538_v33  ;;  %9372 = vst [vmem:[#allocation40_spill] sm:$0xff] %v7540_v36  ;;  %v7555_v55 = vsub.f32 %v1579_v5, %v7540_v36  ;;  %v1935_v52 = vsub.f32 %v7528_v59, %v9211_v43  ;;  %1688 = vmatpush2.msra.mxu0 %v7540_v36  ;;  %v9375_v17 = vand.u32 4294901760, %v7538_v33  ;;  %v1576_v43 = vld [vmem:[%s9119_s3 + $0x188] sm:$0xff] }
 0x630   :  { %1925 = vmatpush1.msra.mxu1 %v1924_v56  ;;  %v1577_v56 = vld [vmem:[%s9119_s3 + $0x190] sm:$0xff]  ;;  %v1930_v12 = vand.u32 4294901760, %v1929_v42  ;;  %v1949_v7 = vsub.f32 %v7531_v4, %v9212_v11  ;;  %v1955_v5 = vsub.f32 %v7534_v53, %v9374_v15  ;;  %9376 = vst [vmem:[#allocation42_spill] sm:$0xff] %v7575_v9  ;;  %v1575_v11 = vld [vmem:[%s9119_s3 + $0x180] sm:$0xff]  ;;  %v1574_v15 = vld [vmem:[%s9119_s3 + $0x178] sm:$0xff]  ;;  %1690 = vmatprep.subr.mxu0 %v7575_v9 }
 0x631   :  { %9373 = vst [vmem:[#allocation41_spill] sm:$0xff] %v7555_v55  ;;  %v1961_v29 = vsub.f32 %v7538_v33, %v9375_v17  ;;  %v1936_v53 = vand.u32 4294901760, %v1935_v52  ;;  %v7586_v33 = vand.u32 4294901760, %v1577_v56  ;;  %v1573_v42 = vld [vmem:[%s9119_s3 + $0x170] sm:$0xff]  ;;  %v1572_v59 = vld [vmem:[%s9119_s3 + $0x168] sm:$0xff]  ;;  %v9378_v22 = vand.u32 4294901760, %v7555_v55 }
 0x632   :  { %1931 = vmatprep.subr.mxu1 %v1930_v12  ;;  %v1950_v4 = vand.u32 4294901760, %v1949_v7  ;;  %v1956_v17 = vand.u32 4294901760, %v1955_v5  ;;  %v7598_v12 = vsub.f32 %v1578_v32, %v7575_v9  ;;  %v7604_v52 = vand.u32 4294901760, %v1576_v43 }
 0x633   :  { %9377 = vst [vmem:[#allocation43_spill] sm:$0xff] %v7586_v33  ;;  %v1962_v36 = vand.u32 4294901760, %v1961_v29  ;;  %v1967_v3 = vsub.f32 %v7555_v55, %v9378_v22  ;;  %1937 = vmatpush1.msra.mxu1 %v1936_v53  ;;  %v7602_v7 = vsub.f32 %v1577_v56, %v7586_v33  ;;  %v7606_v5 = vand.u32 4294901760, %v1575_v11  ;;  %1692 = vmatpush2.msra.mxu0 %v7586_v33 }
 0x634   :  { %9379 = vst [vmem:[#allocation44_spill] sm:$0xff] %v7598_v12  ;;  %9381 = vst [vmem:[#allocation46_spill] sm:$0xff] %v7604_v52  ;;  %v7608_v41 = vand.u32 4294901760, %v1574_v15  ;;  %1951 = vmatprep.subr.mxu1 %v1950_v4  ;;  %v9235_v22 = vand.u32 4294901760, %v7598_v12  ;;  %v7612_v32 = vand.u32 4294901760, %v1573_v42  ;;  %v7614_v55 = vand.u32 4294901760, %v1572_v59  ;;  %1694 = vmatprep.subr.mxu0 %v7604_v52 }
 0x635   :  { %9380 = vst [vmem:[#allocation45_spill] sm:$0xff] %v7602_v7  ;;  %9382 = vst [vmem:[#allocation47_spill] sm:$0xff] %v7606_v5  ;;  %v1968_v29 = vand.u32 4294901760, %v1967_v3  ;;  %1957 = vmatpush2.msra.mxu1 %v1956_v17  ;;  %v9236_v53 = vand.u32 4294901760, %v7602_v7  ;;  %v7618_v56 = vsub.f32 %v1576_v43, %v7604_v52  ;;  %v7621_v9 = vsub.f32 %v1575_v11, %v7606_v5 }
 0x636   :  { %9383 = vst [vmem:[#allocation48_spill] sm:$0xff] %v7608_v41  ;;  %9384 = vst [vmem:[#allocation49_spill] sm:$0xff] %v7612_v32  ;;  %v7624_v24 = vsub.f32 %v1574_v15, %v7608_v41  ;;  %1963 = vmatprep.subr.mxu1 %v1962_v36  ;;  %v1973_v3 = vsub.f32 %v7598_v12, %v9235_v22  ;;  %v7631_v4 = vsub.f32 %v1573_v42, %v7612_v32 }
 0x637   :  { %9385 = vst [vmem:[#allocation50_spill] sm:$0xff] %v7614_v55  ;;  %9386 = vst [vmem:[#allocation51_spill] sm:$0xff] %v7618_v56  ;;  %v7634_v17 = vsub.f32 %v1572_v59, %v7614_v55  ;;  %1696 = vmatpush2.msra.mxu0 %v7606_v5  ;;  %1969 = vmatpush2.msra.mxu1 %v1968_v29  ;;  %v1979_v43 = vsub.f32 %v7602_v7, %v9236_v53  ;;  %v9241_v11 = vand.u32 4294901760, %v7618_v56  ;;  %v1559_v5 = vld [vmem:[%s9119_s3 + $0x100] sm:$0xff] }
 0x638   :  { %9387 = vst [vmem:[#allocation52_spill] sm:$0xff] %v7621_v9  ;;  %9388 = vst [vmem:[#allocation53_spill] sm:$0xff] %v7624_v24  ;;  %v9246_v36 = vand.u32 4294901760, %v7621_v9  ;;  %v9249_v15 = vand.u32 4294901760, %v7624_v24  ;;  %1698 = vmatprep.subr.mxu0 %v7608_v41  ;;  %v1974_v42 = vand.u32 4294901760, %v1973_v3  ;;  %v9252_v22 = vand.u32 4294901760, %v7631_v4 }
 0x639   :  { %9389 = vst [vmem:[#allocation54_spill] sm:$0xff] %v7631_v4  ;;  %9390 = vst [vmem:[#allocation55_spill] sm:$0xff] %v7634_v17  ;;  %v9253_v59 = vand.u32 4294901760, %v7634_v17  ;;  %1700 = vmatpush2.msra.mxu0 %v7612_v32  ;;  %v1980_v29 = vand.u32 4294901760, %v1979_v43  ;;  %v1985_v53 = vsub.f32 %v7618_v56, %v9241_v11 }
 0x63a   :  { %v1991_v7 = vsub.f32 %v7621_v9, %v9246_v36  ;;  %v1997_v12 = vsub.f32 %v7624_v24, %v9249_v15  ;;  %1702 = vmatprep.subr.mxu0 %v7614_v55  ;;  %1975 = vmatprep.subr.mxu1 %v1974_v42  ;;  %v2003_v3 = vsub.f32 %v7631_v4, %v9252_v22  ;;  %v1571_v22 = vld [vmem:[%s9119_s3 + $0x160] sm:$0xff] }
 0x63b   :  { %v2009_v43 = vsub.f32 %v7634_v17, %v9253_v59  ;;  %1981 = vmatpush2.msra.mxu1 %v1980_v29  ;;  %v1986_v11 = vand.u32 4294901760, %v1985_v53  ;;  %v7666_v59 = vand.u32 4294901760, %v1571_v22  ;;  %v1568_v53 = vld [vmem:[%s9119_s3 + $0x148] sm:$0xff] }
 0x63c   :  { %v1992_v56 = vand.u32 4294901760, %v1991_v7  ;;  %v1998_v32 = vand.u32 4294901760, %v1997_v12  ;;  %v2004_v36 = vand.u32 4294901760, %v2003_v3  ;;  %v1570_v12 = vld [vmem:[%s9119_s3 + $0x158] sm:$0xff] }
 0x63d   :  { %1987 = vmatprep.subr.mxu1 %v1986_v11  ;;  %v2010_v9 = vand.u32 4294901760, %v2009_v43  ;;  %9391 = vst [vmem:[#allocation56_spill] sm:$0xff] %v7666_v59  ;;  %v7671_v7 = vand.u32 4294901760, %v1570_v12  ;;  %1704 = vmatpush2.msra.mxu0 %v7666_v59  ;;  %v7688_v11 = vand.u32 4294901760, %v1568_v53  ;;  %v1566_v3 = vld [vmem:[%s9119_s3 + $0x138] sm:$0xff] }
 0x63e   :  { %1993 = vmatpush2.msra.mxu1 %v1992_v56 }
 0x63f   :  { %1999 = vmatprep.subr.mxu1 %v1998_v32  ;;  %9392 = vst [vmem:[#allocation57_spill] sm:$0xff] %v7671_v7  ;;  %v7677_v32 = vsub.f32 %v1571_v22, %v7666_v59  ;;  %v7686_v56 = vsub.f32 %v1570_v12, %v7671_v7  ;;  %9396 = vst [vmem:[#allocation61_spill] sm:$0xff] %v7688_v11  ;;  %1706 = vmatprep.subr.mxu0 %v7671_v7  ;;  %v7708_v12 = vand.u32 4294901760, %v1566_v3 }
 0x640   :  { %2005 = vmatpush2.msra.mxu1 %v2004_v36  ;;  %v1567_v36 = vld [vmem:[%s9119_s3 + $0x140] sm:$0xff] }
 0x641   :  { %2011 = vmatprep.subr.mxu1 %v2010_v9  ;;  %v1569_v9 = vld [vmem:[%s9119_s3 + $0x150] sm:$0xff]  ;;  %9393 = vst [vmem:[#allocation58_spill] sm:$0xff] %v7677_v32  ;;  %9395 = vst [vmem:[#allocation60_spill] sm:$0xff] %v7686_v56  ;;  %v9266_v22 = vand.u32 4294901760, %v7677_v32  ;;  %v7698_v29 = vand.u32 4294901760, %v1567_v36  ;;  %v9403_v7 = vand.u32 4294901760, %v7686_v56 }
 0x642   :  { %9400 = vst [vmem:[#allocation65_spill] sm:$0xff] %v7708_v12 }
 0x643   :  { %9398 = vst [vmem:[#allocation63_spill] sm:$0xff] %v7698_v29  ;;  %v2015_v17 = vsub.f32 %v7677_v32, %v9266_v22  ;;  %v7732_v22 = vsub.f32 %v1566_v3, %v7708_v12  ;;  %v1562_v3 = vld [vmem:[%s9119_s3 + $0x118] sm:$0xff] }
 0x644   :  { %v7772_v52 = vand.u32 4294901760, %v1562_v3 }
 0x645   :  { %9404 = vst [vmem:[#allocation68_spill] sm:$0xff] %v7732_v22  ;;  %v2016_v32 = vand.u32 4294901760, %v2015_v17 }
 0x646   :  { %9412 = vst [vmem:[#allocation72_spill] sm:$0xff] %v7772_v52 }
 0x647   :  { %2017 = vmatpush2.msra.mxu1 %v2016_v32 }
 0x655   :  { %v1496_v42 = vpop.xlane.xlu1 %1495 }
 0x656   :  { %v1497_v15 = vmul.f32 0.03125, %v1496_v42  ;;  %v7706_v42 = vsub.f32 %v1568_v53, %v7688_v11  ;;  %v1564_v53 = vld [vmem:[%s9119_s3 + $0x128] sm:$0xff] }
 0x657   :  { %v7734_v4 = vand.u32 4294901760, %v1564_v53 }
 0x658   :  { %v1498_v24 = vadd.f32 1e-05, %v1497_v15  ;;  %9399 = vst [vmem:[#allocation64_spill] sm:$0xff] %v7706_v42  ;;  %v9408_v41 = vand.u32 4294901760, %v7706_v42 }
 0x659   :  { %9405 = vst [vmem:[#allocation69_spill] sm:$0xff] %v7734_v4 }
 0x65a   :  { %6064 = vrsqrt.f32 %v1498_v24  ;;  %v7679_v24 = vand.u32 4294901760, %v1569_v9  ;;  %v2033_v17 = vsub.f32 %v7706_v42, %v9408_v41 }
 0x65c   :  { %9394 = vst [vmem:[#allocation59_spill] sm:$0xff] %v7679_v24  ;;  %v7696_v15 = vsub.f32 %v1569_v9, %v7679_v24  ;;  %1708 = vmatpush2.msra.mxu0 %v7679_v24  ;;  %v1565_v9 = vld [vmem:[%s9119_s3 + $0x130] sm:$0xff]  ;;  %v7719_v24 = vsub.f32 %v1567_v36, %v7698_v29  ;;  %v1563_v36 = vld [vmem:[%s9119_s3 + $0x120] sm:$0xff] }
 0x65d   :  { %1710 = vmatprep.subr.mxu0 %v7688_v11  ;;  %v7721_v43 = vand.u32 4294901760, %v1565_v9  ;;  %v2021_v11 = vsub.f32 %v7686_v56, %v9403_v7  ;;  %v7766_v41 = vand.u32 4294901760, %v1563_v36 }
 0x65e   :  { %9397 = vst [vmem:[#allocation62_spill] sm:$0xff] %v7696_v15  ;;  %9401 = vst [vmem:[#allocation66_spill] sm:$0xff] %v7719_v24  ;;  %1712 = vmatpush2.msra.mxu0 %v7698_v29  ;;  %v9406_v29 = vand.u32 4294901760, %v7696_v15 }
 0x65f   :  { %9402 = vst [vmem:[#allocation67_spill] sm:$0xff] %v7721_v43  ;;  %1714 = vmatprep.subr.mxu0 %v7708_v12  ;;  %v7745_v59 = vsub.f32 %v1565_v9, %v7721_v43  ;;  %v2022_v56 = vand.u32 4294901760, %v2021_v11  ;;  %v1561_v9 = vld [vmem:[%s9119_s3 + $0x110] sm:$0xff]  ;;  %9410 = vst [vmem:[#allocation71_spill] sm:$0xff] %v7766_v41  ;;  %v2034_v12 = vand.u32 4294901760, %v2033_v17  ;;  %v7781_v17 = vsub.f32 %v1563_v36, %v7766_v41 }
 0x660   :  { %v2027_v55 = vsub.f32 %v7696_v15, %v9406_v29  ;;  %1716 = vmatpush2.msra.mxu0 %v7721_v43  ;;  %v7756_v29 = vsub.f32 %v1564_v53, %v7734_v4  ;;  %v9409_v15 = vand.u32 4294901760, %v7719_v24  ;;  %v9411_v53 = vand.u32 4294901760, %v7732_v22 }
 0x661   :  { %9407 = vst [vmem:[#allocation70_spill] sm:$0xff] %v7745_v59  ;;  %1718 = vmatprep.subr.mxu0 %v7734_v4  ;;  %2023 = vmatprep.subr.mxu1 %v2022_v56 }
 0x662   :  { %v2028_v7 = vand.u32 4294901760, %v2027_v55  ;;  %v2039_v11 = vsub.f32 %v7719_v24, %v9409_v15  ;;  %v2045_v42 = vsub.f32 %v7732_v22, %v9411_v53  ;;  %v1560_v55 = vld [vmem:[%s9119_s3 + $0x108] sm:$0xff]  ;;  %v1504_v15 = vpop.permute.xlu1 %1503  ;;  %v9413_v24 = vand.u32 4294901760, %v7745_v59  ;;  %1720 = vmatpush2.msra.mxu0 %v7766_v41 }
 0x663   :  { %v7783_v53 = vand.u32 4294901760, %v1561_v9  ;;  %1722 = vmatprep.subr.mxu0 %v7772_v52  ;;  %v7801_v41 = vand.u32 4294901760, %v1560_v55 }
 0x664   :  { %2029 = vmatpush2.msra.mxu1 %v2028_v7  ;;  %v2040_v43 = vand.u32 4294901760, %v2039_v11  ;;  %v2051_v56 = vsub.f32 %v7745_v59, %v9413_v24  ;;  %v2046_v7 = vand.u32 4294901760, %v2045_v42  ;;  %v9414_v11 = vand.u32 4294901760, %v7756_v29 }
 0x665   :  { %2035 = vmatprep.subr.mxu1 %v2034_v12  ;;  %v7794_v24 = vsub.f32 %v1562_v3, %v7772_v52  ;;  %v9305_v59 = vand.u32 4294901760, %v7781_v17  ;;  %v7799_v33 = vsub.f32 %v1561_v9, %v7783_v53  ;;  %1724 = vmatpush2.msra.mxu0 %v7783_v53  ;;  %v7805_v3 = vand.u32 4294901760, %v1559_v5 }
 0x666   :  { %v2057_v4 = vsub.f32 %v7756_v29, %v9414_v11  ;;  %2041 = vmatpush2.msra.mxu1 %v2040_v43  ;;  %v2052_v36 = vand.u32 4294901760, %v2051_v56  ;;  %v7812_v9 = vsub.f32 %v1560_v55, %v7801_v41  ;;  %1726 = vmatprep.subr.mxu0 %v7801_v41 }
 0x667   :  { %v6065_v32 = vpop.eup %6064  ;;  %2047 = vmatprep.subr.mxu1 %v2046_v7  ;;  %v9304_v12 = vand.u32 4294901760, %v7794_v24  ;;  %v2063_v43 = vsub.f32 %v7781_v17, %v9305_v59  ;;  %1728 = vmatpush2.msra.mxu0 %v7805_v3  ;;  %v9427_v59 = vld [vmem:[#allocation13_spill] sm:$0xff] }
 0x668   :  { %v1500_v22 = vmul.f32 %v6065_v32, %v7047_v8  ;;  %v2058_v42 = vand.u32 4294901760, %v2057_v4  ;;  %2053 = vmatpush2.msra.mxu1 %v2052_v36  ;;  %v9301_v32 = vand.u32 4294901760, %v7799_v33  ;;  %v9303_v7 = vand.u32 4294901760, %v7812_v9  ;;  %2101 = vmatprep.subr.mxu0 %v7140_v44 }
 0x669   :  { %v2069_v4 = vsub.f32 %v7794_v24, %v9304_v12  ;;  %v2064_v56 = vand.u32 4294901760, %v2063_v43  ;;  %v9426_v12 = vld [vmem:[#allocation21_spill] sm:$0xff] }
 0x66a   :  { %v1506_v8 = vmul.f32 %v1504_v15, %v1500_v22  ;;  %2059 = vmatprep.subr.mxu1 %v2058_v42  ;;  %v7820_v15 = vsub.f32 %v1559_v5, %v7805_v3  ;;  %v2075_v55 = vsub.f32 %v7799_v33, %v9301_v32  ;;  %v2081_v5 = vsub.f32 %v7812_v9, %v9303_v7  ;;  %v9425_v7 = vld [vmem:[#allocation12_spill] sm:$0xff] }
 0x66b   :  { %v2070_v11 = vand.u32 4294901760, %v2069_v4  ;;  %2065 = vmatpush2.msra.mxu1 %v2064_v56  ;;  %v3454_v4 = vld [vmem:[%s9118_s5 + $0x30] sm:$0xff]  ;;  %v3452_v56 = vld [vmem:[%s9118_s5 + $0x20] sm:$0xff] }
 0x66c   :  { %v1512_v22 = vadd.f32 %v7095_v26, %v1506_v8  ;;  %v9302_v36 = vand.u32 4294901760, %v7820_v15  ;;  %v2076_v8 = vand.u32 4294901760, %v2075_v55  ;;  %v2082_v32 = vand.u32 4294901760, %v2081_v5  ;;  %v3450_v55 = vld [vmem:[%s9118_s5 + $0x10] sm:$0xff] }
 0x66d   :  { %2071 = vmatprep.subr.mxu1 %v2070_v11 }
 0x66e   :  { %v1513_v26 = vmax.f32 %v1512_v22, 0.0  ;;  %v2087_v43 = vsub.f32 %v7820_v15, %v9302_v36  ;;  %2077 = vmatpush2.msra.mxu1 %v2076_v8  ;;  %v9424_v36 = vld [vmem:[#allocation20_spill] sm:$0xff] }
 0x66f   :  { %2083 = vmatprep.subr.mxu1 %v2082_v32  ;;  %v3448_v32 = vld [vmem:[%s9118_s5] sm:$0xff] }
 0x670   :  { %v1521_v42 = vrot.slane %v1513_v26, %v7058_v48  ;;  %v2088_v22 = vand.u32 4294901760, %v2087_v43  ;;  %v9429_v48 = vld [vmem:[#allocation14_spill] sm:$0xff] }
 0x672   :  { %1522 = vrot.lane.b32.xlu1 %v1521_v42, %s6099_s28  ;;  %2089 = vmatpush2.msra.mxu1 %v2088_v22 }
 0x673   :  { %2287 = vmatprep.subr.mxu1 %v7112_v38 }
 0x676   :  { %4020 = vrot.lane.b32.xlu1 %v3454_v4, %s6102_s23 }
 0x67a   :  { %4016 = vrot.lane.b32.xlu1 %v3452_v56, %s6102_s23 }
 0x67e   :  { %4012 = vrot.lane.b32.xlu1 %v3450_v55, %s6102_s23 }
 0x682   :  { %4008 = vrot.lane.b32.xlu1 %v3448_v32, %s6102_s23 }
 0x686   :  { %4630 = vrot.lane.b32.xlu1 %v7090_v19, %s6104_s1 }
 0x6e4   :  { %v1523_v26 = vpop.permute.xlu1 %1522 }
 0x6e5   :  { %1525 = vst.msk [vmem:[#allocation2 + $0x2] sm:$0x3] %vm759_vm4, %v1523_v26 }
 0x6ec   :  { %v4775_v11 = vld.sshfl [vmem:[#allocation2] sm:$0x33 pattern:$0x76325410] }
 0x6ed   :  { %v1604_v8 = vcombine.high %v4775_v11, %v4775_v11  ;;  %v7856_v5 = vand.u32 4294901760, %v4775_v11 }
 0x6ef   :  { %9415 = vst [vmem:[#allocation73_spill] sm:$0xff] %v7856_v5  ;;  %v1607_v42 = vsel %vm1606_vm7, %v1604_v8, 0  ;;  %v7859_v43 = vsub.f32 %v4775_v11, %v7856_v5  ;;  %v9416_v8 = vld [vmem:[#allocation6_spill] sm:$0xff] }
 0x6f0   :  { %v7861_v22 = vand.u32 4294901760, %v1607_v42 }
 0x6f1   :  { %v9306_v4 = vand.u32 4294901760, %v7859_v43 }
 0x6f2   :  { %2091 = vmatprep.mubr.f32.mxu1 %v7861_v22  ;;  %v1730_v19 = vsub.f32 %v1607_v42, %v7861_v22  ;;  %v9417_v42 = vld [vmem:[#allocation11_spill] sm:$0xff] }
 0x6f3   :  { %2093 = vmatmul.mubr.f32.vlgmr.msra.gmra.mxu1 %v7856_v5  ;;  %v1738_v55 = vsub.f32 %v7859_v43, %v9306_v4  ;;  %v9428_v4 = vld [vmem:[#allocation22_spill] sm:$0xff]  ;;  %v9430_v5 = vld [vmem:[#allocation25_spill] sm:$0xff] }
 0x6f4   :  { %2289 = vmatpush1.msra.mxu1 %v7114_v39  ;;  %v1731_v56 = vand.u32 4294901760, %v1730_v19 }
 0x6f5   :  { %2291 = vmatprep.subr.mxu1 %v7116_v40  ;;  %v1739_v11 = vand.u32 4294901760, %v1738_v55  ;;  %v9420_v55 = vld [vmem:[#allocation8_spill] sm:$0xff] }
 0x6f6   :  { %2293 = vmatpush1.msra.mxu1 %v7127_v54  ;;  %2409 = vmatprep.mubr.f32.mxu1 %v1731_v56  ;;  %v1732_v32 = vsub.f32 %v1730_v19, %v1731_v56  ;;  %v9419_v56 = vld [vmem:[#allocation15_spill] sm:$0xff] }
 0x6f7   :  { %2295 = vmatprep.subr.mxu1 %v7129_v60 }
 0x6f8   :  { %2297 = vmatpush1.msra.mxu1 %v7131_v18  ;;  %v1733_v26 = vand.u32 4294901760, %v1732_v32  ;;  %v9421_v32 = vld [vmem:[#allocation9_spill] sm:$0xff] }
 0x6f9   :  { %2299 = vmatprep.subr.mxu1 %v7148_v57 }
 0x6fa   :  { %2301 = vmatpush1.msra.mxu1 %v7160_v63  ;;  %1734 = vmatprep.mubr.f32.mxu0 %v1733_v26  ;;  %v9422_v26 = vld [vmem:[#allocation19_spill] sm:$0xff] }
 0x6fb   :  { %2303 = vmatprep.subr.mxu1 %v7228_v25  ;;  %1740 = vmatmul.mubr.f32.vlgmr.msra.gmra.mxu0 %v1739_v11  ;;  %v9423_v11 = vld [vmem:[#allocation10_spill] sm:$0xff] }
 0x6fc   :  { %2104 = vmatpush1.msra.mxu0 %v7143_v46  ;;  %2305 = vmatpush1.msra.mxu1 %v7230_v27 }
 0x6fd   :  { %2107 = vmatprep.subr.mxu0 %v7146_v47  ;;  %2277 = vmatprep.mubr.f32.mxu0 %v1730_v19  ;;  %v9418_v19 = vld [vmem:[#allocation7_spill] sm:$0xff] }
 0x6fe   :  { %2307 = vmatprep.subr.mxu1 %v7232_v31  ;;  %2110 = vmatpush1.msra.mxu0 %v7152_v58 }
 0x6ff   :  { %2309 = vmatpush1.msra.mxu1 %v7237_v34  ;;  %2113 = vmatprep.subr.mxu0 %v7155_v62 }
 0x700   :  { %2311 = vmatprep.subr.mxu1 %v7239_v45  ;;  %2116 = vmatpush1.msra.mxu0 %v7158_v13 }
 0x701   :  { %2313 = vmatpush1.msra.mxu1 %v7241_v50  ;;  %2119 = vmatprep.subr.mxu0 %v7167_v10 }
 0x702   :  { %2315 = vmatprep.subr.mxu1 %v7252_v2  ;;  %2122 = vmatpush1.msra.mxu0 %v7174_v61 }
 0x703   :  { %2317 = vmatpush1.msra.mxu1 %v7264_v1  ;;  %2125 = vmatprep.subr.mxu0 %v7244_v51 }
 0x704   :  { %2319 = vmatprep.subr.mxu1 %v7332_v28  ;;  %2128 = vmatpush1.msra.mxu0 %v7247_v30 }
 0x705   :  { %2321 = vmatpush1.msra.mxu1 %v7334_v20  ;;  %2131 = vmatprep.subr.mxu0 %v7250_v35 }
 0x706   :  { %2323 = vmatprep.subr.mxu1 %v7336_v6  ;;  %2134 = vmatpush1.msra.mxu0 %v7256_v16 }
 0x707   :  { %2325 = vmatpush1.msra.mxu1 %v7341_v49  ;;  %2137 = vmatprep.subr.mxu0 %v7259_v21 }
 0x708   :  { %2327 = vmatprep.subr.mxu1 %v7343_v0  ;;  %2140 = vmatpush1.msra.mxu0 %v7262_v14 }
 0x709   :  { %2329 = vmatpush1.msra.mxu1 %v7345_v37  ;;  %2143 = vmatprep.subr.mxu0 %v9416_v8 }
 0x70a   :  { %2331 = vmatprep.subr.mxu1 %v9417_v42  ;;  %2146 = vmatpush1.msra.mxu0 %v9418_v19 }
 0x70b   :  { %2333 = vmatpush1.msra.mxu1 %v9419_v56  ;;  %2149 = vmatprep.subr.mxu0 %v9420_v55 }
 0x70c   :  { %2335 = vmatprep.subr.mxu1 %v7434_v23  ;;  %2152 = vmatpush1.msra.mxu0 %v9421_v32  ;;  %v9431_v23 = vld [vmem:[#allocation16_spill] sm:$0xff]  ;;  %v9432_v32 = vld [vmem:[#allocation30_spill] sm:$0xff] }
 0x70d   :  { %2337 = vmatpush1.msra.mxu1 %v9422_v26  ;;  %2155 = vmatprep.subr.mxu0 %v9423_v11  ;;  %v9433_v26 = vld [vmem:[#allocation17_spill] sm:$0xff]  ;;  %v9434_v11 = vld [vmem:[#allocation32_spill] sm:$0xff] }
 0x70e   :  { %2339 = vmatprep.subr.mxu1 %v9424_v36  ;;  %2158 = vmatpush1.msra.mxu0 %v9425_v7  ;;  %v9435_v36 = vld [vmem:[#allocation23_spill] sm:$0xff]  ;;  %v9436_v7 = vld [vmem:[#allocation33_spill] sm:$0xff] }
 0x70f   :  { %2341 = vmatpush1.msra.mxu1 %v9426_v12  ;;  %2161 = vmatprep.subr.mxu0 %v9427_v59  ;;  %v9437_v12 = vld [vmem:[#allocation24_spill] sm:$0xff]  ;;  %v9438_v59 = vld [vmem:[#allocation34_spill] sm:$0xff] }
 0x710   :  { %2343 = vmatprep.subr.mxu1 %v9428_v4  ;;  %2164 = vmatpush1.msra.mxu0 %v9429_v48  ;;  %v9439_v4 = vld [vmem:[#allocation26_spill] sm:$0xff]  ;;  %v9440_v48 = vld [vmem:[#allocation35_spill] sm:$0xff] }
 0x711   :  { %2345 = vmatpush1.msra.mxu1 %v9430_v5  ;;  %2167 = vmatprep.subr.mxu0 %v9431_v23  ;;  %v9441_v5 = vld [vmem:[#allocation27_spill] sm:$0xff]  ;;  %v9442_v23 = vld [vmem:[#allocation40_spill] sm:$0xff] }
 0x712   :  { %2347 = vmatprep.subr.mxu1 %v9432_v32  ;;  %2170 = vmatpush1.msra.mxu0 %v9433_v26  ;;  %v9443_v32 = vld [vmem:[#allocation28_spill] sm:$0xff]  ;;  %v9444_v26 = vld [vmem:[#allocation42_spill] sm:$0xff] }
 0x713   :  { %2349 = vmatpush1.msra.mxu1 %v9434_v11  ;;  %2173 = vmatprep.subr.mxu0 %v9435_v36  ;;  %v9445_v11 = vld [vmem:[#allocation29_spill] sm:$0xff]  ;;  %v9446_v36 = vld [vmem:[#allocation43_spill] sm:$0xff] }
 0x714   :  { %2359 = vmatprep.subr.mxu1 %v9436_v7  ;;  %2176 = vmatpush1.msra.mxu0 %v9437_v12  ;;  %v9447_v7 = vld [vmem:[#allocation31_spill] sm:$0xff]  ;;  %v9448_v12 = vld [vmem:[#allocation46_spill] sm:$0xff] }
 0x715   :  { %2361 = vmatpush2.msra.mxu1 %v9438_v59  ;;  %2179 = vmatprep.subr.mxu0 %v9439_v4  ;;  %v9449_v59 = vld [vmem:[#allocation36_spill] sm:$0xff]  ;;  %v9450_v4 = vld [vmem:[#allocation47_spill] sm:$0xff] }
 0x716   :  { %2363 = vmatprep.subr.mxu1 %v9440_v48  ;;  %2182 = vmatpush1.msra.mxu0 %v9441_v5  ;;  %v9451_v48 = vld [vmem:[#allocation37_spill] sm:$0xff]  ;;  %v9452_v5 = vld [vmem:[#allocation48_spill] sm:$0xff] }
 0x717   :  { %2365 = vmatpush2.msra.mxu1 %v9442_v23  ;;  %2185 = vmatprep.subr.mxu0 %v9443_v32  ;;  %v9453_v23 = vld [vmem:[#allocation38_spill] sm:$0xff]  ;;  %v9454_v32 = vld [vmem:[#allocation49_spill] sm:$0xff] }
 0x718   :  { %2367 = vmatprep.subr.mxu1 %v9444_v26  ;;  %2188 = vmatpush1.msra.mxu0 %v9445_v11  ;;  %v9455_v26 = vld [vmem:[#allocation39_spill] sm:$0xff]  ;;  %v9456_v11 = vld [vmem:[#allocation50_spill] sm:$0xff] }
 0x719   :  { %2369 = vmatpush2.msra.mxu1 %v9446_v36  ;;  %2191 = vmatprep.subr.mxu0 %v9447_v7  ;;  %v9457_v36 = vld [vmem:[#allocation41_spill] sm:$0xff]  ;;  %v9458_v7 = vld [vmem:[#allocation56_spill] sm:$0xff] }
 0x71a   :  { %2371 = vmatprep.subr.mxu1 %v9448_v12  ;;  %2194 = vmatpush1.msra.mxu0 %v9449_v59  ;;  %v9459_v12 = vld [vmem:[#allocation44_spill] sm:$0xff]  ;;  %v9460_v59 = vld [vmem:[#allocation57_spill] sm:$0xff] }
 0x71b   :  { %2373 = vmatpush2.msra.mxu1 %v9450_v4  ;;  %2205 = vmatprep.subr.mxu0 %v9451_v48  ;;  %v9461_v4 = vld [vmem:[#allocation45_spill] sm:$0xff]  ;;  %v9462_v48 = vld [vmem:[#allocation59_spill] sm:$0xff] }
 0x71c   :  { %2375 = vmatprep.subr.mxu1 %v9452_v5  ;;  %2208 = vmatpush2.msra.mxu0 %v9453_v23  ;;  %v9463_v5 = vld [vmem:[#allocation51_spill] sm:$0xff]  ;;  %v9464_v23 = vld [vmem:[#allocation61_spill] sm:$0xff] }
 0x71d   :  { %2377 = vmatpush2.msra.mxu1 %v9454_v32  ;;  %2211 = vmatprep.subr.mxu0 %v9455_v26  ;;  %v9465_v32 = vld [vmem:[#allocation52_spill] sm:$0xff]  ;;  %v9466_v26 = vld [vmem:[#allocation63_spill] sm:$0xff] }
 0x71e   :  { %2379 = vmatprep.subr.mxu1 %v9456_v11  ;;  %2214 = vmatpush2.msra.mxu0 %v9457_v36  ;;  %v9467_v11 = vld [vmem:[#allocation53_spill] sm:$0xff] }
 0x71f   :  { %2381 = vmatpush2.msra.mxu1 %v9458_v7  ;;  %2217 = vmatprep.subr.mxu0 %v9459_v12  ;;  %v9468_v36 = vld [vmem:[#allocation65_spill] sm:$0xff]  ;;  %v9469_v7 = vld [vmem:[#allocation54_spill] sm:$0xff]  ;;  %v9470_v12 = vld [vmem:[#allocation67_spill] sm:$0xff] }
 0x720   :  { %2383 = vmatprep.subr.mxu1 %v9460_v59  ;;  %2220 = vmatpush2.msra.mxu0 %v9461_v4  ;;  %v9471_v59 = vld [vmem:[#allocation55_spill] sm:$0xff]  ;;  %v9472_v4 = vld [vmem:[#allocation69_spill] sm:$0xff] }
 0x721   :  { %2385 = vmatpush2.msra.mxu1 %v9462_v48  ;;  %2223 = vmatprep.subr.mxu0 %v9463_v5  ;;  %v9473_v48 = vld [vmem:[#allocation58_spill] sm:$0xff]  ;;  %v9474_v5 = vld [vmem:[#allocation71_spill] sm:$0xff] }
 0x722   :  { %2387 = vmatprep.subr.mxu1 %v9464_v23  ;;  %2226 = vmatpush2.msra.mxu0 %v9465_v32  ;;  %v9475_v23 = vld [vmem:[#allocation60_spill] sm:$0xff] }
 0x723   :  { %2389 = vmatpush2.msra.mxu1 %v9466_v26  ;;  %2229 = vmatprep.subr.mxu0 %v9467_v11  ;;  %v9476_v26 = vld [vmem:[#allocation62_spill] sm:$0xff] }
 0x724   :  { %2391 = vmatprep.subr.mxu1 %v9468_v36  ;;  %2232 = vmatpush2.msra.mxu0 %v9469_v7  ;;  %v9477_v36 = vld [vmem:[#allocation64_spill] sm:$0xff] }
 0x725   :  { %2393 = vmatpush2.msra.mxu1 %v9470_v12  ;;  %2235 = vmatprep.subr.mxu0 %v9471_v59  ;;  %v9478_v12 = vld [vmem:[#allocation66_spill] sm:$0xff] }
 0x726   :  { %2395 = vmatprep.subr.mxu1 %v9472_v4  ;;  %2238 = vmatpush2.msra.mxu0 %v9473_v48  ;;  %v9479_v4 = vld [vmem:[#allocation68_spill] sm:$0xff] }
 0x727   :  { %2397 = vmatpush2.msra.mxu1 %v9474_v5  ;;  %2241 = vmatprep.subr.mxu0 %v9475_v23  ;;  %v9480_v5 = vand.u32 4294901760, %v7859_v43 }
 0x728   :  { %2399 = vmatprep.subr.mxu1 %v7772_v52  ;;  %2244 = vmatpush2.msra.mxu0 %v9476_v26  ;;  %v9481_v52 = vld [vmem:[#allocation70_spill] sm:$0xff] }
 0x729   :  { %2401 = vmatpush2.msra.mxu1 %v7783_v53  ;;  %2247 = vmatprep.subr.mxu0 %v9477_v36 }
 0x72a   :  { %2403 = vmatprep.subr.mxu1 %v7801_v41  ;;  %2250 = vmatpush2.msra.mxu0 %v9478_v12 }
 0x72b   :  { %2405 = vmatpush2.msra.mxu1 %v7805_v3  ;;  %2253 = vmatprep.subr.mxu0 %v9479_v4 }
 0x72c   :  { %2413 = vmatmul.mubr.f32.vlgmr.msra.gmra.mxu1 %v9480_v5  ;;  %2661 = vmatprep.subr.mxu1 %v7112_v38  ;;  %v9482_v38 = vand.u32 4294901760, %v7140_v44  ;;  %v9488_v44 = vand.u32 4294901760, %v7167_v10  ;;  %v9496_v10 = vand.u32 4294901760, %v9416_v8  ;;  %v9518_v5 = vld [vmem:[#allocation17_spill] sm:$0xff]  ;;  %v9521_v8 = vld [vmem:[#allocation23_spill] sm:$0xff] }
 0x72d   :  { %2256 = vmatpush2.msra.mxu0 %v9481_v52  ;;  %2663 = vmatpush1.msra.mxu1 %v7114_v39  ;;  %v9483_v39 = vand.u32 4294901760, %v7143_v46  ;;  %v9489_v46 = vand.u32 4294901760, %v7174_v61  ;;  %v9500_v61 = vld [vmem:[#allocation9_spill] sm:$0xff] }
 0x72e   :  { %2781 = vmatprep.mubr.f32.mxu1 %v7861_v22  ;;  %2259 = vmatprep.subr.mxu0 %v7756_v29 }
 0x72f   :  { %2665 = vmatprep.subr.mxu1 %v7116_v40  ;;  %2262 = vmatpush2.msra.mxu0 %v7781_v17  ;;  %v9484_v40 = vand.u32 4294901760, %v7146_v47  ;;  %v9490_v47 = vand.u32 4294901760, %v7244_v51  ;;  %v9508_v51 = vld [vmem:[#allocation21_spill] sm:$0xff] }
 0x730   :  { %2667 = vmatpush1.msra.mxu1 %v7127_v54  ;;  %2265 = vmatprep.subr.mxu0 %v7794_v24  ;;  %v9485_v54 = vand.u32 4294901760, %v7152_v58  ;;  %v9492_v58 = vand.u32 4294901760, %v7250_v35 }
 0x731   :  { %2669 = vmatprep.subr.mxu1 %v7129_v60  ;;  %2268 = vmatpush2.msra.mxu0 %v7799_v33  ;;  %v9486_v60 = vand.u32 4294901760, %v7155_v62  ;;  %v9493_v62 = vand.u32 4294901760, %v7256_v16  ;;  %v9512_v16 = vld [vmem:[#allocation14_spill] sm:$0xff] }
 0x732   :  { %2671 = vmatpush1.msra.mxu1 %v7131_v18  ;;  %2271 = vmatprep.subr.mxu0 %v7812_v9  ;;  %v9487_v18 = vand.u32 4294901760, %v7158_v13  ;;  %v9494_v13 = vand.u32 4294901760, %v7259_v21  ;;  %v9513_v21 = vand.u32 4294901760, %v9512_v16  ;;  %v9556_v16 = vld [vmem:[#allocation56_spill] sm:$0xff] }
 0x733   :  { %2673 = vmatprep.subr.mxu1 %v7148_v57  ;;  %2274 = vmatpush2.msra.mxu0 %v7820_v15  ;;  %v9491_v57 = vand.u32 4294901760, %v7247_v30  ;;  %v9509_v30 = vld [vmem:[#allocation13_spill] sm:$0xff] }
 0x734   :  { %2675 = vmatpush1.msra.mxu1 %v7160_v63  ;;  %2280 = vmatmul.mubr.f32.vlgmr.msra.gmra.mxu0 %v7859_v43  ;;  %v9495_v63 = vand.u32 4294901760, %v7262_v14  ;;  %v9510_v35 = vand.u32 4294901760, %v9509_v30  ;;  %v9514_v14 = vld [vmem:[#allocation25_spill] sm:$0xff]  ;;  %v9519_v43 = vand.u32 4294901760, %v9518_v5  ;;  %v9553_v30 = vld [vmem:[#allocation50_spill] sm:$0xff]  ;;  %v9562_v5 = vld [vmem:[#allocation59_spill] sm:$0xff] }
 0x735   :  { %2422 = vmatprep.subr.mxu0 %v9482_v38  ;;  %2677 = vmatprep.subr.mxu1 %v7228_v25  ;;  %v9501_v25 = vand.u32 4294901760, %v9500_v61  ;;  %v9526_v38 = vld [vmem:[#allocation34_spill] sm:$0xff]  ;;  %v9544_v61 = vld [vmem:[#allocation47_spill] sm:$0xff] }
 0x736   :  { %2426 = vmatpush1.msra.mxu0 %v9483_v39  ;;  %2652 = vmatprep.mubr.f32.mxu0 %v7861_v22  ;;  %v9520_v22 = vld [vmem:[#allocation32_spill] sm:$0xff]  ;;  %v9527_v39 = vld [vmem:[#allocation26_spill] sm:$0xff] }
 0x737   :  { %2679 = vmatpush1.msra.mxu1 %v7230_v27  ;;  %2430 = vmatprep.subr.mxu0 %v9484_v40  ;;  %v9502_v27 = vld [vmem:[#allocation19_spill] sm:$0xff]  ;;  %v9528_v40 = vand.u32 4294901760, %v9527_v39 }
 0x738   :  { %2681 = vmatprep.subr.mxu1 %v7232_v31  ;;  %2434 = vmatpush1.msra.mxu0 %v9485_v54  ;;  %v9529_v54 = vld [vmem:[#allocation35_spill] sm:$0xff] }
 0x739   :  { %2683 = vmatpush1.msra.mxu1 %v7237_v34  ;;  %2438 = vmatprep.subr.mxu0 %v9486_v60  ;;  %v9505_v34 = vld [vmem:[#allocation20_spill] sm:$0xff]  ;;  %v9530_v60 = vld [vmem:[#allocation27_spill] sm:$0xff] }
 0x73a   :  { %2685 = vmatprep.subr.mxu1 %v7239_v45  ;;  %2442 = vmatpush1.msra.mxu0 %v9487_v18  ;;  %v9506_v45 = vld [vmem:[#allocation12_spill] sm:$0xff]  ;;  %v9531_v18 = vand.u32 4294901760, %v9530_v60  ;;  %v9571_v39 = vld [vmem:[#allocation67_spill] sm:$0xff] }
 0x73b   :  { %2687 = vmatpush1.msra.mxu1 %v7241_v50  ;;  %2446 = vmatprep.subr.mxu0 %v9488_v44  ;;  %v9507_v50 = vand.u32 4294901760, %v9506_v45  ;;  %v9532_v44 = vld [vmem:[#allocation40_spill] sm:$0xff]  ;;  %v9550_v45 = vld [vmem:[#allocation49_spill] sm:$0xff]  ;;  %v9575_v60 = vld [vmem:[#allocation71_spill] sm:$0xff] }
 0x73c   :  { %2689 = vmatprep.subr.mxu1 %v7252_v2  ;;  %2450 = vmatpush1.msra.mxu0 %v9489_v46  ;;  %v9511_v2 = vld [vmem:[#allocation22_spill] sm:$0xff]  ;;  %v9533_v46 = vld [vmem:[#allocation28_spill] sm:$0xff] }
 0x73d   :  { %2691 = vmatpush1.msra.mxu1 %v7264_v1  ;;  %2454 = vmatprep.subr.mxu0 %v9490_v47  ;;  %v9515_v1 = vld [vmem:[#allocation16_spill] sm:$0xff]  ;;  %v9534_v47 = vand.u32 4294901760, %v9533_v46  ;;  %v2802_v46 = vld [vmem:[%s9120_s4 + $0x60] sm:$0xff] }
 0x73e   :  { %2693 = vmatprep.subr.mxu1 %v7332_v28  ;;  %2458 = vmatpush1.msra.mxu0 %v9491_v57  ;;  %v9499_v28 = vld [vmem:[#allocation18_spill] sm:$0xff] }
 0x73f   :  { %2695 = vmatpush1.msra.mxu1 %v7334_v20  ;;  %2462 = vmatprep.subr.mxu0 %v9492_v58  ;;  %v9498_v20 = vand.u32 4294901760, %v9420_v55  ;;  %v9535_v57 = vld [vmem:[#allocation42_spill] sm:$0xff]  ;;  %v9536_v58 = vld [vmem:[#allocation29_spill] sm:$0xff] }
 0x740   :  { %2697 = vmatprep.subr.mxu1 %v7336_v6  ;;  %2466 = vmatpush1.msra.mxu0 %v9493_v62  ;;  %v9497_v6 = vand.u32 4294901760, %v9418_v19  ;;  %v9523_v19 = vld [vmem:[#allocation33_spill] sm:$0xff]  ;;  %v9537_v62 = vand.u32 4294901760, %v9536_v58  ;;  %v8185_v58 = vand.u32 4294901760, %v2802_v46 }
 0x741   :  { %2699 = vmatpush1.msra.mxu1 %v7341_v49  ;;  %2470 = vmatprep.subr.mxu0 %v9494_v13  ;;  %v9517_v49 = vld [vmem:[#allocation30_spill] sm:$0xff]  ;;  %v9538_v13 = vld [vmem:[#allocation43_spill] sm:$0xff] }
 0x742   :  { %2701 = vmatprep.subr.mxu1 %v7343_v0  ;;  %2474 = vmatpush1.msra.mxu0 %v9495_v63  ;;  %v9516_v0 = vand.u32 4294901760, %v9515_v1  ;;  %v9539_v63 = vld [vmem:[#allocation31_spill] sm:$0xff]  ;;  %v9559_v1 = vld [vmem:[#allocation57_spill] sm:$0xff] }
 0x743   :  { %2703 = vmatpush1.msra.mxu1 %v7345_v37  ;;  %2478 = vmatprep.subr.mxu0 %v9496_v10  ;;  %v9503_v37 = vld [vmem:[#allocation10_spill] sm:$0xff]  ;;  %v9540_v10 = vand.u32 4294901760, %v9539_v63  ;;  %v2799_v63 = vld [vmem:[%s9120_s4 + $0x48] sm:$0xff] }
 0x744   :  { %2705 = vmatprep.subr.mxu1 %v9417_v42  ;;  %2482 = vmatpush1.msra.mxu0 %v9497_v6  ;;  %v9504_v31 = vand.u32 4294901760, %v9503_v37  ;;  %v9522_v42 = vand.u32 4294901760, %v9521_v8  ;;  %v9541_v6 = vld [vmem:[#allocation46_spill] sm:$0xff]  ;;  %v9547_v37 = vld [vmem:[#allocation48_spill] sm:$0xff]  ;;  %v9565_v8 = vld [vmem:[#allocation61_spill] sm:$0xff] }
 0x745   :  { %2707 = vmatpush1.msra.mxu1 %v9419_v56  ;;  %2486 = vmatprep.subr.mxu0 %v9498_v20  ;;  %v9524_v56 = vld [vmem:[#allocation24_spill] sm:$0xff] }
 0x746   :  { %2709 = vmatprep.subr.mxu1 %v9499_v28  ;;  %2490 = vmatpush1.msra.mxu0 %v9501_v25  ;;  %v9525_v55 = vand.u32 4294901760, %v9524_v56  ;;  %v9542_v20 = vld [vmem:[#allocation36_spill] sm:$0xff]  ;;  %v9545_v25 = vld [vmem:[#allocation37_spill] sm:$0xff]  ;;  %v9568_v56 = vand.u32 4294901760, %v9467_v11  ;;  %v9576_v11 = vand.u32 4294901760, %v9475_v23  ;;  %v9581_v23 = vand.u32 4294901760, %v9479_v4 }
 0x747   :  { %2711 = vmatpush1.msra.mxu1 %v9502_v27  ;;  %2494 = vmatprep.subr.mxu0 %v9504_v31  ;;  %v9543_v28 = vand.u32 4294901760, %v9542_v20  ;;  %v9546_v27 = vand.u32 4294901760, %v9545_v25  ;;  %v9548_v31 = vld [vmem:[#allocation38_spill] sm:$0xff]  ;;  %v8210_v25 = vsub.f32 %v2802_v46, %v8185_v58 }
 0x748   :  { %2713 = vmatprep.subr.mxu1 %v9505_v34  ;;  %2498 = vmatpush1.msra.mxu0 %v9507_v50  ;;  %v9549_v34 = vand.u32 4294901760, %v9548_v31  ;;  %v9551_v50 = vld [vmem:[#allocation39_spill] sm:$0xff] }
 0x749   :  { %2715 = vmatpush1.msra.mxu1 %v9508_v51  ;;  %2502 = vmatprep.subr.mxu0 %v9510_v35  ;;  %v9552_v51 = vand.u32 4294901760, %v9551_v50  ;;  %v9554_v35 = vld [vmem:[#allocation41_spill] sm:$0xff] }
 0x74a   :  { %2717 = vmatprep.subr.mxu1 %v9511_v2  ;;  %2506 = vmatpush1.msra.mxu0 %v9513_v21  ;;  %v9555_v2 = vand.u32 4294901760, %v9554_v35  ;;  %v9557_v21 = vld [vmem:[#allocation44_spill] sm:$0xff] }
 0x74b   :  { %2719 = vmatpush1.msra.mxu1 %v9514_v14  ;;  %2510 = vmatprep.subr.mxu0 %v9516_v0  ;;  %v9558_v14 = vand.u32 4294901760, %v9557_v21  ;;  %v9560_v0 = vld [vmem:[#allocation45_spill] sm:$0xff] }
 0x74c   :  { %2721 = vmatprep.subr.mxu1 %v9517_v49  ;;  %2514 = vmatpush1.msra.mxu0 %v9519_v43  ;;  %v9561_v49 = vand.u32 4294901760, %v9560_v0  ;;  %v9563_v43 = vld [vmem:[#allocation51_spill] sm:$0xff] }
 0x74d   :  { %2723 = vmatpush1.msra.mxu1 %v9520_v22  ;;  %2518 = vmatprep.subr.mxu0 %v9522_v42  ;;  %v9564_v22 = vand.u32 4294901760, %v9563_v43  ;;  %v9566_v42 = vand.u32 4294901760, %v9465_v32  ;;  %v9574_v32 = vand.u32 4294901760, %v9473_v48  ;;  %v9580_v48 = vand.u32 4294901760, %v9478_v12 }
 0x74e   :  { %2733 = vmatprep.subr.mxu1 %v9523_v19  ;;  %2522 = vmatpush1.msra.mxu0 %v9525_v55  ;;  %v9567_v19 = vld [vmem:[#allocation63_spill] sm:$0xff]  ;;  %v9569_v55 = vld [vmem:[#allocation65_spill] sm:$0xff]  ;;  %v9587_v12 = vand.u32 4294901760, %v7794_v24 }
 0x74f   :  { %2735 = vmatpush2.msra.mxu1 %v9526_v38  ;;  %2526 = vmatprep.subr.mxu0 %v9528_v40  ;;  %v9570_v38 = vand.u32 4294901760, %v9469_v7  ;;  %v9572_v40 = vand.u32 4294901760, %v9471_v59  ;;  %v9578_v7 = vand.u32 4294901760, %v9476_v26  ;;  %v9579_v59 = vand.u32 4294901760, %v9477_v36  ;;  %v2803_v24 = vld [vmem:[%s9120_s4 + $0x68] sm:$0xff] }
 0x750   :  { %2737 = vmatprep.subr.mxu1 %v9529_v54  ;;  %2530 = vmatpush1.msra.mxu0 %v9531_v18  ;;  %v9573_v54 = vld [vmem:[#allocation69_spill] sm:$0xff]  ;;  %v9577_v18 = vld [vmem:[#allocation72_spill] sm:$0xff]  ;;  %v9583_v26 = vand.u32 4294901760, %v9481_v52  ;;  %v9585_v36 = vmov 0.0   ;;  %v9589_v52 = vand.u32 4294901760, %v7812_v9  ;;  %v8174_v4 = vand.u32 4294901760, %v2803_v24 }
 0x751   :  { %2739 = vmatpush2.msra.mxu1 %v9532_v44  ;;  %2534 = vmatprep.subr.mxu0 %v9534_v47  ;;  %v9582_v44 = vld [vmem:[#allocation73_spill] sm:$0xff] }
 0x752   :  { %2741 = vmatprep.subr.mxu1 %v9535_v57  ;;  %2538 = vmatpush1.msra.mxu0 %v9537_v62  ;;  %v2801_v47 = vld [vmem:[%s9120_s4 + $0x58] sm:$0xff]  ;;  %v2800_v57 = vld [vmem:[%s9120_s4 + $0x50] sm:$0xff] }
 0x753   :  { %2743 = vmatpush2.msra.mxu1 %v9538_v13  ;;  %2542 = vmatprep.subr.mxu0 %v9540_v10  ;;  %v8187_v62 = vand.u32 4294901760, %v2801_v47  ;;  %v8189_v13 = vand.u32 4294901760, %v2800_v57  ;;  %v2798_v10 = vld [vmem:[%s9120_s4 + $0x40] sm:$0xff] }
 0x754   :  { %2745 = vmatprep.subr.mxu1 %v9541_v6  ;;  %2546 = vmatpush1.msra.mxu0 %v9543_v28  ;;  %v8204_v28 = vsub.f32 %v2803_v24, %v8174_v4  ;;  %v8223_v50 = vand.u32 4294901760, %v2798_v10 }
 0x755   :  { %2747 = vmatpush2.msra.mxu1 %v9544_v61  ;;  %2558 = vmatprep.subr.mxu0 %v9546_v27  ;;  %v8207_v61 = vand.u32 4294901760, %v2799_v63  ;;  %v8213_v27 = vsub.f32 %v2801_v47, %v8187_v62 }
 0x756   :  { %2749 = vmatprep.subr.mxu1 %v9547_v37  ;;  %2562 = vmatpush2.msra.mxu0 %v9549_v34  ;;  %v8217_v37 = vsub.f32 %v2800_v57, %v8189_v13  ;;  %v2792_v57 = vld [vmem:[%s9120_s4 + $0x10] sm:$0xff] }
 0x757   :  { %2751 = vmatpush2.msra.mxu1 %v9550_v45  ;;  %2566 = vmatprep.subr.mxu0 %v9552_v51  ;;  %v2915_v45 = vand.u32 4294901760, %v8204_v28  ;;  %v2922_v51 = vand.u32 4294901760, %v8210_v25  ;;  %v2929_v21 = vand.u32 4294901760, %v8213_v27 }
 0x758   :  { %2753 = vmatprep.subr.mxu1 %v9553_v30  ;;  %2570 = vmatpush2.msra.mxu0 %v9555_v2  ;;  %v8228_v30 = vsub.f32 %v2799_v63, %v8207_v61 }
 0x759   :  { %2755 = vmatpush2.msra.mxu1 %v9556_v16  ;;  %2574 = vmatprep.subr.mxu0 %v9558_v14  ;;  %v2916_v16 = vsub.f32 %v8204_v28, %v2915_v45  ;;  %v2936_v14 = vand.u32 4294901760, %v8217_v37 }
 0x75a   :  { %2757 = vmatprep.subr.mxu1 %v9559_v1  ;;  %2578 = vmatpush2.msra.mxu0 %v9561_v49  ;;  %v2923_v49 = vsub.f32 %v8210_v25, %v2922_v51 }
 0x75b   :  { %2759 = vmatpush2.msra.mxu1 %v9562_v5  ;;  %2582 = vmatprep.subr.mxu0 %v9564_v22  ;;  %v8248_v5 = vsub.f32 %v2798_v10, %v8223_v50  ;;  %v2917_v43 = vand.u32 4294901760, %v2916_v16  ;;  %v2930_v22 = vsub.f32 %v8213_v27, %v2929_v21 }
 0x75c   :  { %2761 = vmatprep.subr.mxu1 %v9565_v8  ;;  %2586 = vmatpush2.msra.mxu0 %v9566_v42  ;;  %v9322_v8 = vand.u32 4294901760, %v8228_v30  ;;  %v2924_v42 = vand.u32 4294901760, %v2923_v49 }
 0x75d   :  { %2763 = vmatpush2.msra.mxu1 %v9567_v19  ;;  %2590 = vmatprep.subr.mxu0 %v9568_v56  ;;  %v2937_v19 = vsub.f32 %v8217_v37, %v2936_v14  ;;  %v9321_v56 = vand.u32 4294901760, %v8248_v5 }
 0x75e   :  { %2765 = vmatprep.subr.mxu1 %v9569_v55  ;;  %2594 = vmatpush2.msra.mxu0 %v9570_v38  ;;  %v2931_v55 = vand.u32 4294901760, %v2930_v22  ;;  %v2944_v38 = vsub.f32 %v8228_v30, %v9322_v8 }
 0x75f   :  { %2767 = vmatpush2.msra.mxu1 %v9571_v39  ;;  %2598 = vmatprep.subr.mxu0 %v9572_v40  ;;  %v2938_v39 = vand.u32 4294901760, %v2937_v19  ;;  %v2951_v40 = vsub.f32 %v8248_v5, %v9321_v56  ;;  %v2790_v19 = vld [vmem:[%s9120_s4] sm:$0xff] }
 0x760   :  { %2769 = vmatprep.subr.mxu1 %v9573_v54  ;;  %2602 = vmatpush2.msra.mxu0 %v9574_v32  ;;  %v2945_v54 = vand.u32 4294901760, %v2944_v38 }
 0x761   :  { %2771 = vmatpush2.msra.mxu1 %v9575_v60  ;;  %2606 = vmatprep.subr.mxu0 %v9576_v11  ;;  %v2952_v32 = vand.u32 4294901760, %v2951_v40  ;;  %v2797_v60 = vld [vmem:[%s9120_s4 + $0x38] sm:$0xff]  ;;  %v8371_v40 = vand.u32 4294901760, %v2790_v19 }
 0x762   :  { %2773 = vmatprep.subr.mxu1 %v9577_v18  ;;  %2610 = vmatpush2.msra.mxu0 %v9578_v7  ;;  %v8284_v11 = vand.u32 4294901760, %v2797_v60  ;;  %v2796_v18 = vld [vmem:[%s9120_s4 + $0x30] sm:$0xff] }
 0x763   :  { %2775 = vmatpush2.msra.mxu1 %v7783_v53  ;;  %2614 = vmatprep.subr.mxu0 %v9579_v59  ;;  %v9584_v53 = vand.u32 4294901760, %v7756_v29  ;;  %v9590_v29 = vand.u32 4294901760, %v7820_v15  ;;  %v8292_v59 = vand.u32 4294901760, %v2796_v18 }
 0x764   :  { %2777 = vmatprep.subr.mxu1 %v7801_v41  ;;  %2618 = vmatpush2.msra.mxu0 %v9580_v48  ;;  %v9586_v41 = vand.u32 4294901760, %v7781_v17  ;;  %v2805_v17 = vld [vmem:[%s9120_s4 + $0x78] sm:$0xff]  ;;  %v8290_v7 = vsub.f32 %v2797_v60, %v8284_v11  ;;  %v2795_v48 = vld [vmem:[%s9120_s4 + $0x28] sm:$0xff] }
 0x765   :  { %2779 = vmatpush2.msra.mxu1 %v7805_v3  ;;  %2622 = vmatprep.subr.mxu0 %v9581_v23  ;;  %v9588_v3 = vand.u32 4294901760, %v7799_v33  ;;  %v2804_v33 = vld [vmem:[%s9120_s4 + $0x70] sm:$0xff]  ;;  %v8170_v9 = vand.u32 4294901760, %v2805_v17 }
 0x766   :  { %2783 = vmatmul.mubr.f32.vlgmr.msra.gmra.mxu1 %v9582_v44  ;;  %2626 = vmatpush2.msra.mxu0 %v9583_v26  ;;  %v8172_v15 = vand.u32 4294901760, %v2804_v33  ;;  %v9320_v23 = vand.u32 4294901760, %v8290_v7  ;;  %v8303_v26 = vand.u32 4294901760, %v2795_v48 }
 0x767   :  { %2630 = vmatprep.subr.mxu0 %v9584_v53  ;;  %5645 = vmatprep.subr.mxu1 %v9585_v36  ;;  %v8198_v6 = vsub.f32 %v2805_v17, %v8170_v9  ;;  %v2794_v53 = vld [vmem:[%s9120_s4 + $0x20] sm:$0xff] }
 0x768   :  { %2634 = vmatpush2.msra.mxu0 %v9586_v41  ;;  %5677 = vmatprep.mubr.msk.f32.mxu1 %vm6101_vm1, %v9585_v36  ;;  %v8201_v20 = vsub.f32 %v2804_v33, %v8172_v15  ;;  %v2958_v41 = vsub.f32 %v8290_v7, %v9320_v23 }
 0x769   :  { %2638 = vmatprep.subr.mxu0 %v9587_v12  ;;  %v2901_v31 = vand.u32 4294901760, %v8198_v6 }
 0x76a   :  { %2642 = vmatpush2.msra.mxu0 %v9588_v3  ;;  %v2908_v34 = vand.u32 4294901760, %v8201_v20  ;;  %v8315_v3 = vsub.f32 %v2795_v48, %v8303_v26  ;;  %v2959_v17 = vand.u32 4294901760, %v2958_v41 }
 0x76b   :  { %2646 = vmatprep.subr.mxu0 %v9589_v52  ;;  %v2902_v35 = vsub.f32 %v8198_v6, %v2901_v31  ;;  %v8317_v52 = vand.u32 4294901760, %v2794_v53 }
 0x76c   :  { %2650 = vmatpush2.msra.mxu0 %v9590_v29  ;;  %v2909_v2 = vsub.f32 %v8201_v20, %v2908_v34  ;;  %v2793_v29 = vld [vmem:[%s9120_s4 + $0x18] sm:$0xff]  ;;  %v9318_v24 = vand.u32 4294901760, %v8315_v3 }
 0x76d   :  { %2654 = vmatmul.mubr.f32.vlgmr.msra.gmra.mxu0 %v9582_v44  ;;  %5610 = vmatprep.subr.mxu0 %v9585_v36  ;;  %v2903_v1 = vand.u32 4294901760, %v2902_v35  ;;  %v8301_v44 = vsub.f32 %v2796_v18, %v8292_v59  ;;  %v8329_v46 = vsub.f32 %v2794_v53, %v8317_v52  ;;  %v8332_v47 = vand.u32 4294901760, %v2793_v29 }
 0x76e   :  { %5642 = vmatprep.mubr.msk.f32.mxu0 %vm6101_vm1, %v9585_v36  ;;  %5611 = vmatpush3.msra.mxu0 %v8170_v9  ;;  %v2910_v0 = vand.u32 4294901760, %v2909_v2  ;;  %v2972_v10 = vsub.f32 %v8315_v3, %v9318_v24  ;;  %v8342_v2 = vand.u32 4294901760, %v2792_v57  ;;  %v8384_v18 = vsub.f32 %v2790_v19, %v8371_v40 }
 0x76f   :  { %5612 = vmatprep.subr.mxu0 %v9585_v36  ;;  %5646 = vmatpush3.msra.mxu1 %v2903_v1  ;;  %v9319_v12 = vand.u32 4294901760, %v8301_v44  ;;  %v9317_v35 = vand.u32 4294901760, %v8329_v46  ;;  %v8346_v16 = vsub.f32 %v2793_v29, %v8332_v47  ;;  %v2791_v1 = vld [vmem:[%s9120_s4 + $0x8] sm:$0xff] }
 0x770   :  { %5613 = vmatpush3.msra.mxu0 %v8172_v15  ;;  %5647 = vmatprep.subr.mxu1 %v9585_v36  ;;  %v8358_v22 = vand.u32 4294901760, %v2791_v1  ;;  %v9313_v29 = vand.u32 4294901760, %v8384_v18 }
 0x771   :  { %5614 = vmatprep.subr.mxu0 %v9585_v36  ;;  %5648 = vmatpush3.msra.mxu1 %v2910_v0  ;;  %v2965_v33 = vsub.f32 %v8301_v44, %v9319_v12  ;;  %v2973_v0 = vand.u32 4294901760, %v2972_v10  ;;  %v2979_v49 = vsub.f32 %v8329_v46, %v9317_v35 }
 0x772   :  { %5615 = vmatpush3.msra.mxu0 %v8174_v4  ;;  %5649 = vmatprep.subr.mxu1 %v9585_v36 }
 0x773   :  { %5616 = vmatprep.subr.mxu0 %v9585_v36  ;;  %5650 = vmatpush3.msra.mxu1 %v2917_v43  ;;  %v2966_v63 = vand.u32 4294901760, %v2965_v33  ;;  %v8356_v43 = vsub.f32 %v2792_v57, %v8342_v2  ;;  %v3007_v33 = vsub.f32 %v8384_v18, %v9313_v29 }
 0x774   :  { %5617 = vmatpush3.msra.mxu0 %v8185_v58  ;;  %5651 = vmatprep.subr.mxu1 %v9585_v36 }
 0x775   :  { %5618 = vmatprep.subr.mxu0 %v9585_v36  ;;  %5652 = vmatpush3.msra.mxu1 %v2924_v42  ;;  %v9316_v42 = vand.u32 4294901760, %v8346_v16  ;;  %v9315_v38 = vand.u32 4294901760, %v8356_v43  ;;  %v3008_v57 = vand.u32 4294901760, %v3007_v33 }
 0x776   :  { %5619 = vmatpush3.msra.mxu0 %v8187_v62  ;;  %5653 = vmatprep.subr.mxu1 %v9585_v36 }
 0x777   :  { %5620 = vmatprep.subr.mxu0 %v9585_v36  ;;  %5654 = vmatpush3.msra.mxu1 %v2931_v55  ;;  %v2980_v55 = vand.u32 4294901760, %v2979_v49 }
 0x778   :  { %5621 = vmatpush3.msra.mxu0 %v8189_v13  ;;  %5655 = vmatprep.subr.mxu1 %v9585_v36 }
 0x779   :  { %5622 = vmatprep.subr.mxu0 %v9585_v36  ;;  %5656 = vmatpush3.msra.mxu1 %v2938_v39  ;;  %v8369_v39 = vsub.f32 %v2791_v1, %v8358_v22  ;;  %v4774_v1 = vld [vmem:[%s9115_s6 + $0x2] ss:$8 sm:$0x3] }
 0x77a   :  { %5623 = vmatpush3.msra.mxu0 %v8207_v61  ;;  %5657 = vmatprep.subr.mxu1 %v9585_v36 }
 0x77b   :  { %5624 = vmatprep.subr.mxu0 %v9585_v36  ;;  %5658 = vmatpush3.msra.mxu1 %v2945_v54  ;;  %v2986_v54 = vsub.f32 %v8346_v16, %v9316_v42  ;;  %v9314_v60 = vand.u32 4294901760, %v8369_v39 }
 0x77c   :  { %5625 = vmatpush3.msra.mxu0 %v8223_v50  ;;  %5659 = vmatprep.subr.mxu1 %v9585_v36 }
 0x77d   :  { %5626 = vmatprep.subr.mxu0 %v9585_v36  ;;  %5660 = vmatpush3.msra.mxu1 %v2952_v32  ;;  %v2993_v32 = vsub.f32 %v8356_v43, %v9315_v38  ;;  %v2987_v48 = vand.u32 4294901760, %v2986_v54  ;;  %v3000_v41 = vsub.f32 %v8369_v39, %v9314_v60 }
 0x77e   :  { %5661 = vmatprep.subr.mxu1 %v9585_v36  ;;  %5627 = vmatpush3.msra.mxu0 %v8284_v11 }
 0x77f   :  { %5628 = vmatprep.subr.mxu0 %v9585_v36  ;;  %5662 = vmatpush3.msra.mxu1 %v2959_v17  ;;  %v2994_v53 = vand.u32 4294901760, %v2993_v32  ;;  %v3001_v17 = vand.u32 4294901760, %v3000_v41 }
 0x780   :  { %5629 = vmatpush3.msra.mxu0 %v8292_v59  ;;  %5663 = vmatprep.subr.mxu1 %v9585_v36 }
 0x781   :  { %5630 = vmatprep.subr.mxu0 %v9585_v36  ;;  %5664 = vmatpush3.msra.mxu1 %v2966_v63  ;;  %v9591_v63 = vld [vmem:[#allocation4_spill] sm:$0xff] }
 0x782   :  { %5631 = vmatpush3.msra.mxu0 %v8303_v26  ;;  %5665 = vmatprep.subr.mxu1 %v9585_v36  ;;  %v1588_v10 = vsub.s32 0, %v9591_v63 }
 0x783   :  { %5632 = vmatprep.subr.mxu0 %v9585_v36  ;;  %5666 = vmatpush3.msra.mxu1 %v2973_v0  ;;  %v1592_v0 = vsub.s32 1, %v9591_v63 }
 0x784   :  { %5633 = vmatpush3.msra.mxu0 %v8317_v52  ;;  %5667 = vmatprep.subr.mxu1 %v9585_v36  ;;  %v1589_v19 = vrot.slane %v4774_v1, %v1588_v10 }
 0x785   :  { %5634 = vmatprep.subr.mxu0 %v9585_v36  ;;  %5668 = vmatpush3.msra.mxu1 %v2980_v55  ;;  %v1593_v55 = vrot.slane %v4774_v1, %v1592_v0 }
 0x786   :  { %5635 = vmatpush3.msra.mxu0 %v8332_v47  ;;  %5669 = vmatprep.subr.mxu1 %v9585_v36 }
 0x787   :  { %5636 = vmatprep.subr.mxu0 %v9585_v36  ;;  %5670 = vmatpush3.msra.mxu1 %v2987_v48 }
 0x788   :  { %5637 = vmatpush3.msra.mxu0 %v8342_v2  ;;  %5671 = vmatprep.subr.mxu1 %v9585_v36 }
 0x789   :  { %5638 = vmatprep.subr.mxu0 %v9585_v36  ;;  %5672 = vmatpush3.msra.mxu1 %v2994_v53 }
 0x78a   :  { %5639 = vmatpush3.msra.mxu0 %v8358_v22  ;;  %5673 = vmatprep.subr.mxu1 %v9585_v36 }
 0x78b   :  { %5640 = vmatprep.subr.mxu0 %v9585_v36  ;;  %5674 = vmatpush3.msra.mxu1 %v3001_v17 }
 0x78c   :  { %5641 = vmatpush3.msra.mxu0 %v8371_v40  ;;  %5675 = vmatprep.subr.mxu1 %v9585_v36 }
 0x78d   :  { %5680 = vmatprep.subr.mxu0 %v9585_v36  ;;  %5676 = vmatpush3.msra.mxu1 %v3008_v57 }
 0x78e   :  { %5715 = vmatprep.subr.mxu1 %v9585_v36 }
 0x7b3   :  { %v2094_v54 = vpop.f32.mrf.mxu1 }
 0x7b5   :  { %v2096_v17 = vpop.f32.mrf.mxu1 }
 0x7bb   :  { %v1741_v49 = vpop.f32.mrf.mxu0 }
 0x7bc   :  { %v1742_v48 = vadd.f32 %v1741_v49, %v1589_v19 }
 0x7bd   :  { %v1743_v32 = vpop.f32.mrf.mxu0 }
 0x7be   :  { %v1744_v41 = vadd.f32 %v1743_v32, %v1593_v55  ;;  %v2095_v33 = vadd.f32 %v2094_v54, %v1742_v48 }
 0x7c0   :  { %v2097_v38 = vadd.f32 %v2096_v17, %v1744_v41 }
 0x7ec   :  { %v2414_v57 = vpop.f32.mrf.mxu1 }
 0x7ee   :  { %v2416_v35 = vpop.f32.mrf.mxu1 }
 0x7f4   :  { %v2281_v53 = vpop.f32.mrf.mxu0 }
 0x7f5   :  { %v2282_v60 = vadd.f32 %v2281_v53, %v2095_v33 }
 0x7f6   :  { %v2283_v29 = vpop.f32.mrf.mxu0 }
 0x7f7   :  { %v2284_v42 = vadd.f32 %v2283_v29, %v2097_v38  ;;  %v2415_v24 = vadd.f32 %v2414_v57, %v2282_v60 }
 0x7f9   :  { %v2417_v56 = vadd.f32 %v2416_v35, %v2284_v42 }
 0x826   :  { %v2784_v12 = vpop.f32.mrf.mxu1 }
 0x828   :  { %v2786_v8 = vpop.f32.mrf.mxu1 }
 0x82d   :  { %v2655_v23 = vpop.f32.mrf.mxu0 }
 0x82e   :  { %v2656_v63 = vadd.f32 %v2655_v23, %v2415_v24  ;;  %v8435_v24 = vpop.permute.xlu1 %4020 }
 0x82f   :  { %v2657_v10 = vpop.f32.mrf.mxu0 }
 0x830   :  { %v2785_v1 = vadd.f32 %v2784_v12, %v2656_v63  ;;  %v2658_v0 = vadd.f32 %v2657_v10, %v2417_v56  ;;  %v8425_v56 = vpop.permute.xlu0 %4022 }
 0x832   :  { %v2789_v49 = vmax.f32 %v2785_v1, 0.0  ;;  %v8406_v19 = vadd.f32 %v2786_v8, %v2658_v0  ;;  %v8451_v42 = vpop.permute.xlu1 %4016 }
 0x834   :  { %v8408_v55 = vand.u32 4294901760, %v2789_v49  ;;  %v8412_v54 = vmul.f32 %v8406_v19, %v8406_v19  ;;  %v8439_v35 = vpop.permute.xlu0 %4018 }
 0x836   :  { %v8415_v38 = vsub.f32 %v2789_v49, %v8408_v55  ;;  %4660 = vrot.lane.b32.xlu0 %v8412_v54, %s6105_s29  ;;  %5678 = vmatmul.mubr.f32.vlgmr.msra.gmra.mxu1 %v8408_v55  ;;  %v8467_v29 = vpop.permute.xlu1 %4012 }
 0x837   :  { %5716 = vmatpush3.msra.mxu1 %v8170_v9  ;;  %5747 = vmatprep.mubr.msk.f32.mxu1 %vm6101_vm1, %v9585_v36 }
 0x838   :  { %v2890_v8 = vand.u32 4294901760, %v8415_v38  ;;  %5717 = vmatprep.subr.mxu1 %v9585_v36  ;;  %v8455_v60 = vpop.permute.xlu0 %4014 }
 0x839   :  { %5718 = vmatpush3.msra.mxu1 %v8172_v15 }
 0x83a   :  { %5719 = vmatprep.subr.mxu1 %v9585_v36  ;;  %v2891_v23 = vsub.f32 %v8415_v38, %v2890_v8  ;;  %v8483_v48 = vpop.permute.xlu1 %4008 }
 0x83b   :  { %5720 = vmatpush3.msra.mxu1 %v8174_v4 }
 0x83c   :  { %5721 = vmatprep.subr.mxu1 %v9585_v36  ;;  %v2892_v12 = vand.u32 4294901760, %v2891_v23  ;;  %v8471_v32 = vpop.permute.xlu0 %4010 }
 0x83d   :  { %5722 = vmatpush3.msra.mxu1 %v8185_v58 }
 0x83e   :  { %5723 = vmatprep.subr.mxu1 %v9585_v36  ;;  %5643 = vmatmul.mubr.f32.vlgmr.msra.gmra.mxu0 %v2892_v12  ;;  %v4631_v17 = vpop.permute.xlu1 %4630 }
 0x83f   :  { %5681 = vmatpush3.msra.mxu0 %v8198_v6  ;;  %5724 = vmatpush3.msra.mxu1 %v8187_v62  ;;  %v4633_v33 = vsel %vm4577_vm8, %v4631_v17, 0.0  ;;  %v9598_v6 = vand.u32 4294901760, %v8346_v16 }
 0x840   :  { %5682 = vmatprep.subr.mxu0 %v9585_v36  ;;  %5725 = vmatprep.subr.mxu1 %v9585_v36  ;;  %v4575_v53 = vpop.permute.xlu0 %4574 }
 0x841   :  { %5683 = vmatpush3.msra.mxu0 %v8201_v20  ;;  %5726 = vmatpush3.msra.mxu1 %v8189_v13  ;;  %v4578_v41 = vsel %vm4577_vm8, %v4575_v53, 0.0  ;;  %v9599_v20 = vand.u32 4294901760, %v8356_v43 }
 0x842   :  { %5684 = vmatprep.subr.mxu0 %v9585_v36  ;;  %5727 = vmatprep.subr.mxu1 %v9585_v36 }
 0x843   :  { %5685 = vmatpush3.msra.mxu0 %v8204_v28  ;;  %5728 = vmatpush3.msra.mxu1 %v8207_v61  ;;  %v9600_v28 = vand.u32 4294901760, %v8369_v39 }
 0x844   :  { %5686 = vmatprep.subr.mxu0 %v9585_v36  ;;  %5729 = vmatprep.subr.mxu1 %v9585_v36 }
 0x845   :  { %5687 = vmatpush3.msra.mxu0 %v8210_v25  ;;  %5730 = vmatpush3.msra.mxu1 %v8223_v50 }
 0x846   :  { %5688 = vmatprep.subr.mxu0 %v9585_v36  ;;  %5731 = vmatprep.subr.mxu1 %v9585_v36 }
 0x847   :  { %5689 = vmatpush3.msra.mxu0 %v8213_v27  ;;  %5732 = vmatpush3.msra.mxu1 %v8284_v11  ;;  %v9601_v27 = vand.u32 4294901760, %v8384_v18 }
 0x848   :  { %5690 = vmatprep.subr.mxu0 %v9585_v36  ;;  %5733 = vmatprep.subr.mxu1 %v9585_v36 }
 0x849   :  { %5691 = vmatpush3.msra.mxu0 %v8217_v37  ;;  %5734 = vmatpush3.msra.mxu1 %v8292_v59  ;;  %v6091_v37 = vld [vmem:[%s9118_s5 + $0x30] sm:$0xff] }
 0x84a   :  { %5692 = vmatprep.subr.mxu0 %v9585_v36  ;;  %5735 = vmatprep.subr.mxu1 %v9585_v36 }
 0x84b   :  { %5693 = vmatpush3.msra.mxu0 %v8228_v30  ;;  %5736 = vmatpush3.msra.mxu1 %v8303_v26 }
 0x84c   :  { %5694 = vmatprep.subr.mxu0 %v9585_v36  ;;  %5737 = vmatprep.subr.mxu1 %v9585_v36 }
 0x84d   :  { %5695 = vmatpush3.msra.mxu0 %v8248_v5  ;;  %5738 = vmatpush3.msra.mxu1 %v8317_v52 }
 0x84e   :  { %5696 = vmatprep.subr.mxu0 %v9585_v36  ;;  %5739 = vmatprep.subr.mxu1 %v9585_v36 }
 0x84f   :  { %5697 = vmatpush3.msra.mxu0 %v8290_v7  ;;  %5740 = vmatpush3.msra.mxu1 %v8332_v47 }
 0x850   :  { %5698 = vmatprep.subr.mxu0 %v9585_v36  ;;  %5741 = vmatprep.subr.mxu1 %v9585_v36 }
 0x851   :  { %5699 = vmatpush3.msra.mxu0 %v8301_v44  ;;  %5742 = vmatpush3.msra.mxu1 %v8342_v2 }
 0x852   :  { %5700 = vmatprep.subr.mxu0 %v9585_v36  ;;  %5743 = vmatprep.subr.mxu1 %v9585_v36 }
 0x853   :  { %5701 = vmatpush3.msra.mxu0 %v8315_v3  ;;  %5744 = vmatpush3.msra.mxu1 %v8358_v22 }
 0x854   :  { %5702 = vmatprep.subr.mxu0 %v9585_v36  ;;  %5745 = vmatprep.subr.mxu1 %v9585_v36 }
 0x855   :  { %5703 = vmatpush3.msra.mxu0 %v8329_v46  ;;  %5746 = vmatpush3.msra.mxu1 %v8371_v40 }
 0x856   :  { %4579 = vadd.xlane.f32.xlu0 %v4578_v41  ;;  %5704 = vmatprep.subr.mxu0 %v9585_v36 }
 0x857   :  { %5748 = vmatmul.mubr.f32.vlgmr.msra.gmra.mxu1 %v2890_v8  ;;  %5785 = vmatprep.subr.mxu1 %v9585_v36 }
 0x858   :  { %5705 = vmatpush3.msra.mxu0 %v8346_v16  ;;  %5786 = vmatpush3.msra.mxu1 %v8170_v9  ;;  %v9592_v9 = vand.u32 4294901760, %v8228_v30  ;;  %v6094_v30 = vld [vmem:[%s9118_s5 + $0x18] sm:$0xff] }
 0x859   :  { %5706 = vmatprep.subr.mxu0 %v9585_v36  ;;  %5787 = vmatprep.subr.mxu1 %v9585_v36 }
 0x85a   :  { %5707 = vmatpush3.msra.mxu0 %v8356_v43  ;;  %5788 = vmatpush3.msra.mxu1 %v8172_v15  ;;  %v9593_v15 = vand.u32 4294901760, %v8248_v5 }
 0x85b   :  { %4634 = vadd.xlane.f32.xlu0 %v4633_v33  ;;  %5708 = vmatprep.subr.mxu0 %v9585_v36 }
 0x85c   :  { %5789 = vmatprep.subr.mxu1 %v9585_v36  ;;  %5709 = vmatpush3.msra.mxu0 %v8369_v39 }
 0x85d   :  { %5790 = vmatpush3.msra.mxu1 %v8174_v4  ;;  %5710 = vmatprep.subr.mxu0 %v9585_v36  ;;  %v9594_v4 = vand.u32 4294901760, %v8290_v7 }
 0x85e   :  { %5791 = vmatprep.subr.mxu1 %v9585_v36  ;;  %5711 = vmatpush3.msra.mxu0 %v8384_v18 }
 0x85f   :  { %5712 = vmatprep.mubr.msk.f32.mxu0 %vm6101_vm1, %v9585_v36  ;;  %5792 = vmatpush3.msra.mxu1 %v8185_v58  ;;  %v9595_v58 = vand.u32 4294901760, %v8301_v44 }
 0x860   :  { %5713 = vmatmul.mubr.f32.vlgmr.msra.gmra.mxu0 %v8415_v38  ;;  %5750 = vmatprep.subr.mxu0 %v9585_v36 }
 0x861   :  { %5793 = vmatprep.subr.mxu1 %v9585_v36  ;;  %5751 = vmatpush3.msra.mxu0 %v2901_v31  ;;  %v8608_v31 = vand.u32 4294901760, %v6091_v37 }
 0x862   :  { %5794 = vmatpush3.msra.mxu1 %v8187_v62  ;;  %5752 = vmatprep.subr.mxu0 %v9585_v36  ;;  %v9596_v62 = vand.u32 4294901760, %v8315_v3 }
 0x863   :  { %5795 = vmatprep.subr.mxu1 %v9585_v36  ;;  %5753 = vmatpush3.msra.mxu0 %v2908_v34  ;;  %v6092_v34 = vld [vmem:[%s9118_s5 + $0x28] sm:$0xff] }
 0x864   :  { %5796 = vmatpush3.msra.mxu1 %v8189_v13  ;;  %5754 = vmatprep.subr.mxu0 %v9585_v36  ;;  %v9597_v13 = vand.u32 4294901760, %v8329_v46  ;;  %v8663_v46 = vsub.f32 %v6091_v37, %v8608_v31 }
 0x865   :  { %5797 = vmatprep.subr.mxu1 %v9585_v36  ;;  %5755 = vmatpush3.msra.mxu0 %v2915_v45  ;;  %v8617_v45 = vand.u32 4294901760, %v6092_v34 }
 0x866   :  { %5798 = vmatpush3.msra.mxu1 %v8207_v61  ;;  %5756 = vmatprep.subr.mxu0 %v9585_v36  ;;  %v6090_v61 = vld [vmem:[%s9118_s5 + $0x38] sm:$0xff]  ;;  %v3570_v16 = vand.u32 4294901760, %v8663_v46 }
 0x867   :  { %5799 = vmatprep.subr.mxu1 %v9585_v36  ;;  %5757 = vmatpush3.msra.mxu0 %v2922_v51  ;;  %v8599_v25 = vand.u32 4294901760, %v6090_v61 }
 0x868   :  { %5800 = vmatpush3.msra.mxu1 %v8223_v50  ;;  %5758 = vmatprep.subr.mxu0 %v9585_v36  ;;  %v6093_v50 = vld [vmem:[%s9118_s5 + $0x20] sm:$0xff]  ;;  %v3571_v10 = vsub.f32 %v8663_v46, %v3570_v16 }
 0x869   :  { %5801 = vmatprep.subr.mxu1 %v9585_v36  ;;  %5759 = vmatpush3.msra.mxu0 %v2929_v21  ;;  %v8624_v51 = vand.u32 4294901760, %v6093_v50  ;;  %v8631_v21 = vand.u32 4294901760, %v6094_v30 }
 0x86a   :  { %5802 = vmatpush3.msra.mxu1 %v8284_v11  ;;  %5760 = vmatprep.subr.mxu0 %v9585_v36  ;;  %v6096_v11 = vld [vmem:[%s9118_s5 + $0x8] sm:$0xff]  ;;  %v3572_v49 = vand.u32 4294901760, %v3571_v10  ;;  %v2806_v10 = vld [vmem:[%s9115_s6 + $0x3] ss:$0 sm:$0xff] }
 0x86b   :  { %5803 = vmatprep.subr.mxu1 %v9585_v36  ;;  %5761 = vmatpush3.msra.mxu0 %v2936_v14  ;;  %v6095_v14 = vld [vmem:[%s9118_s5 + $0x10] sm:$0xff]  ;;  %v8645_v7 = vand.u32 4294901760, %v6096_v11  ;;  %v8671_v43 = vsub.f32 %v6093_v50, %v8624_v51  ;;  %v8675_v39 = vsub.f32 %v6094_v30, %v8631_v21 }
 0x86c   :  { %5804 = vmatpush3.msra.mxu1 %v8292_v59  ;;  %5762 = vmatprep.subr.mxu0 %v9585_v36  ;;  %v8638_v5 = vand.u32 4294901760, %v6095_v14  ;;  %v6097_v59 = vld [vmem:[%s9118_s5] sm:$0xff] }
 0x86d   :  { %5805 = vmatprep.subr.mxu1 %v9585_v36  ;;  %5763 = vmatpush3.msra.mxu0 %v9592_v9  ;;  %v8652_v44 = vand.u32 4294901760, %v6097_v59  ;;  %v3584_v18 = vand.u32 4294901760, %v8671_v43  ;;  %v3591_v1 = vand.u32 4294901760, %v8675_v39  ;;  %v8689_v0 = vsub.f32 %v6096_v11, %v8645_v7 }
 0x86e   :  { %5806 = vmatpush3.msra.mxu1 %v8303_v26  ;;  %5764 = vmatprep.subr.mxu0 %v9585_v36  ;;  %v8682_v57 = vsub.f32 %v6095_v14, %v8638_v5 }
 0x86f   :  { %5807 = vmatprep.subr.mxu1 %v9585_v36  ;;  %5765 = vmatpush3.msra.mxu0 %v9593_v15  ;;  %v8697_v8 = vsub.f32 %v6097_v59, %v8652_v44  ;;  %v3585_v12 = vsub.f32 %v8671_v43, %v3584_v18  ;;  %v3605_v53 = vand.u32 4294901760, %v8689_v0  ;;  %v3592_v17 = vsub.f32 %v8675_v39, %v3591_v1 }
 0x870   :  { %5808 = vmatpush3.msra.mxu1 %v8317_v52  ;;  %5766 = vmatprep.subr.mxu0 %v9585_v36  ;;  %v8660_v52 = vsub.f32 %v6090_v61, %v8599_v25  ;;  %v3598_v38 = vand.u32 4294901760, %v8682_v57 }
 0x871   :  { %5809 = vmatprep.subr.mxu1 %v9585_v36  ;;  %5767 = vmatpush3.msra.mxu0 %v9594_v4  ;;  %v3586_v41 = vand.u32 4294901760, %v3585_v12  ;;  %v3612_v33 = vand.u32 4294901760, %v8697_v8  ;;  %v3593_v9 = vand.u32 4294901760, %v3592_v17 }
 0x872   :  { %5810 = vmatpush3.msra.mxu1 %v8332_v47  ;;  %5768 = vmatprep.subr.mxu0 %v9585_v36  ;;  %v3563_v47 = vand.u32 4294901760, %v8660_v52  ;;  %v3599_v15 = vsub.f32 %v8682_v57, %v3598_v38 }
 0x873   :  { %5811 = vmatprep.subr.mxu1 %v9585_v36  ;;  %5769 = vmatpush3.msra.mxu0 %v9595_v58  ;;  %v3606_v58 = vsub.f32 %v8689_v0, %v3605_v53 }
 0x874   :  { %5812 = vmatpush3.msra.mxu1 %v8342_v2  ;;  %5770 = vmatprep.subr.mxu0 %v9585_v36  ;;  %v8667_v2 = vsub.f32 %v6092_v34, %v8617_v45  ;;  %v3600_v4 = vand.u32 4294901760, %v3599_v15 }
 0x875   :  { %5813 = vmatprep.subr.mxu1 %v9585_v36  ;;  %5771 = vmatpush3.msra.mxu0 %v9596_v62  ;;  %v3607_v62 = vand.u32 4294901760, %v3606_v58 }
 0x876   :  { %5814 = vmatpush3.msra.mxu1 %v8358_v22  ;;  %5772 = vmatprep.subr.mxu0 %v9585_v36  ;;  %v3577_v22 = vand.u32 4294901760, %v8667_v2 }
 0x877   :  { %5815 = vmatprep.subr.mxu1 %v9585_v36  ;;  %5773 = vmatpush3.msra.mxu0 %v9597_v13  ;;  %v3613_v13 = vsub.f32 %v8697_v8, %v3612_v33 }
 0x878   :  { %5816 = vmatpush3.msra.mxu1 %v8371_v40  ;;  %5817 = vmatprep.mubr.msk.f32.mxu1 %vm6101_vm1, %v9585_v36  ;;  %v3564_v40 = vsub.f32 %v8660_v52, %v3563_v47 }
 0x879   :  { %5774 = vmatprep.subr.mxu0 %v9585_v36  ;;  %5818 = vmatmul.mubr.f32.vlgmr.msra.gmra.mxu1 %v8408_v55 }
 0x87a   :  { %5775 = vmatpush3.msra.mxu0 %v9598_v6  ;;  %5782 = vmatprep.mubr.msk.f32.mxu0 %vm6101_vm1, %v9585_v36  ;;  %v3565_v63 = vand.u32 4294901760, %v3564_v40  ;;  %v3614_v6 = vand.u32 4294901760, %v3613_v13 }
 0x87b   :  { %5776 = vmatprep.subr.mxu0 %v9585_v36  ;;  %5839 = vmatprep.subr.mxu1 %v9585_v36 }
 0x87c   :  { %5777 = vmatpush3.msra.mxu0 %v9599_v20  ;;  %5855 = vmatprep.mubr.msk.f32.mxu1 %vm6101_vm1, %v9585_v36 }
 0x87d   :  { %5778 = vmatprep.subr.mxu0 %v9585_v36  ;;  %5840 = vmatpush3.msra.mxu1 %v3565_v63 }
 0x87e   :  { %5779 = vmatpush3.msra.mxu0 %v9600_v28  ;;  %5841 = vmatprep.subr.mxu1 %v9585_v36 }
 0x87f   :  { %5780 = vmatprep.subr.mxu0 %v9585_v36  ;;  %5842 = vmatpush3.msra.mxu1 %v3572_v49 }
 0x880   :  { %5781 = vmatpush3.msra.mxu0 %v9601_v27  ;;  %5843 = vmatprep.subr.mxu1 %v9585_v36 }
 0x881   :  { %5783 = vmatmul.mubr.f32.vlgmr.msra.gmra.mxu0 %v8408_v55  ;;  %5820 = vmatprep.subr.mxu0 %v9585_v36  ;;  %v3578_v55 = vsub.f32 %v8667_v2, %v3577_v22 }
 0x882   :  { %5821 = vmatpush3.msra.mxu0 %v8599_v25  ;;  %5836 = vmatprep.mubr.msk.f32.mxu0 %vm6101_vm1, %v9585_v36 }
 0x883   :  { %5822 = vmatprep.subr.mxu0 %v9585_v36  ;;  %v3579_v23 = vand.u32 4294901760, %v3578_v55 }
 0x884   :  { %5823 = vmatpush3.msra.mxu0 %v8608_v31 }
 0x885   :  { %5824 = vmatprep.subr.mxu0 %v9585_v36  ;;  %5844 = vmatpush3.msra.mxu1 %v3579_v23 }
 0x886   :  { %5825 = vmatpush3.msra.mxu0 %v8617_v45  ;;  %5845 = vmatprep.subr.mxu1 %v9585_v36 }
 0x887   :  { %5826 = vmatprep.subr.mxu0 %v9585_v36  ;;  %5846 = vmatpush3.msra.mxu1 %v3586_v41 }
 0x888   :  { %5827 = vmatpush3.msra.mxu0 %v8624_v51  ;;  %5847 = vmatprep.subr.mxu1 %v9585_v36 }
 0x889   :  { %5828 = vmatprep.subr.mxu0 %v9585_v36  ;;  %5848 = vmatpush3.msra.mxu1 %v3593_v9 }
 0x88a   :  { %5829 = vmatpush3.msra.mxu0 %v8631_v21  ;;  %5849 = vmatprep.subr.mxu1 %v9585_v36 }
 0x88b   :  { %5830 = vmatprep.subr.mxu0 %v9585_v36  ;;  %5850 = vmatpush3.msra.mxu1 %v3600_v4 }
 0x88c   :  { %5831 = vmatpush3.msra.mxu0 %v8638_v5  ;;  %5851 = vmatprep.subr.mxu1 %v9585_v36 }
 0x88d   :  { %5832 = vmatprep.subr.mxu0 %v9585_v36  ;;  %5852 = vmatpush3.msra.mxu1 %v3607_v62 }
 0x88e   :  { %5833 = vmatpush3.msra.mxu0 %v8645_v7  ;;  %5853 = vmatprep.subr.mxu1 %v9585_v36 }
 0x88f   :  { %5834 = vmatprep.subr.mxu0 %v9585_v36  ;;  %5854 = vmatpush3.msra.mxu1 %v3614_v6 }
 0x890   :  { %5835 = vmatpush3.msra.mxu0 %v8652_v44  ;;  %5877 = vmatprep.subr.mxu1 %v9585_v36 }
 0x891   :  { %5858 = vmatprep.subr.mxu0 %v9585_v36 }
 0x8a8   :  { %v4661_v26 = vpop.permute.xlu0 %4660 }
 0x8a9   :  { %v4663_v3 = vsel %vm4577_vm8, %v4661_v26, 0.0 }
 0x8aa   :  { %4664 = vadd.xlane.f32.xlu0 %v4663_v3 }
 0x8df   :  { %v4580_v37 = vpop.xlane.xlu0 %4579 }
 0x8e0   :  { %6066 = vrsqrt.f32 %v4580_v37  ;;  %vm4583_vm9 = vcmp.eq.f32.partialorder %v4580_v37, inf  ;;  %v4586_v3 = vand.u32 2147483648, %v4580_v37  ;;  %vm4585_vm10 = vcmp.eq.f32.partialorder %v4580_v37, 0.0 }
 0x8ed   :  { %v6067_v11 = vpop.eup %6066 }
 0x8ee   :  { %v4582_v59 = vmul.f32 %v6067_v11, %v4580_v37 }
 0x8f0   :  { %v4584_v26 = vsel %vm4583_vm9, %v4580_v37, %v4582_v59  ;;  %v9603_v37 = vld [vmem:[#allocation5_spill] sm:$0xff] }
 0x8f1   :  { %v4587_v40 = vsel %vm4585_vm10, %v4586_v3, %v4584_v26  ;;  %v8775_v26 = vand.u32 4294901760, %v8425_v56  ;;  %v8784_v3 = vand.u32 4294901760, %v8435_v24 }
 0x8f2   :  { %v4588_v63 = vmax.f32 %v4587_v40, 1e-12 }
 0x8f4   :  { %6068 = vrcp.f32 %v4588_v63  ;;  %v8790_v63 = vsub.f32 %v8425_v56, %v8775_v26 }
 0x8f6   :  { %v3045_v20 = vpop.f32.mrf.mxu1 }
 0x8f8   :  { %v5679_v28 = vpop.f32.mrf.mxu1 }
 0x8f9   :  { %v9602_v28 = vld [vmem:[#allocation3_spill] sm:$0xff] }
 0x8fe   :  { %v2894_v61 = vpop.f32.mrf.mxu0 }
 0x8ff   :  { %v2895_v49 = vadd.f32 %v2894_v61, %v2806_v10  ;;  %v4137_v10 = vand.u32 4294901760, %v8790_v63 }
 0x900   :  { %v5644_v27 = vpop.f32.mrf.mxu0 }
 0x901   :  { %v3046_v23 = vadd.f32 %v3045_v20, %v2895_v49  ;;  %v6069_v4 = vpop.eup %6068  ;;  %v8811_v49 = vand.u32 4294901760, %v8451_v42 }
 0x902   :  { %v4590_v61 = vmul.f32 %v6069_v4, %v9602_v28 }
 0x917   :  { %v3238_v34 = vpop.f32.mrf.mxu1 }
 0x919   :  { %v5749_v50 = vpop.f32.mrf.mxu1 }
 0x920   :  { %v3149_v30 = vpop.f32.mrf.mxu0 }
 0x921   :  { %v3150_v41 = vadd.f32 %v3149_v30, %v3046_v23 }
 0x922   :  { %v5714_v14 = vpop.f32.mrf.mxu0 }
 0x923   :  { %v3239_v17 = vadd.f32 %v3238_v34, %v3150_v41  ;;  %v4598_v34 = vrot.slane %v4590_v61, %v9603_v37  ;;  %v8749_v14 = vpop.xlane.xlu0 %4634 }
 0x924   :  { %6070 = vrsqrt.f32 %v8749_v14  ;;  %vm4638_vm12 = vcmp.eq.f32.partialorder %v8749_v14, inf  ;;  %vm4640_vm13 = vcmp.eq.f32.partialorder %v8749_v14, 0.0 }
 0x931   :  { %v6071_v40 = vpop.eup %6070 }
 0x932   :  { %v4637_v56 = vmul.f32 %v6071_v40, %v8749_v14 }
 0x933   :  { %v8756_v59 = vpop.xlane.xlu0 %4664 }
 0x934   :  { %6072 = vrsqrt.f32 %v8756_v59  ;;  %v4639_v23 = vsel %vm4638_vm12, %v8749_v14, %v4637_v56  ;;  %vm4668_vm14 = vcmp.eq.f32.partialorder %v8756_v59, inf  ;;  %vm4670_vm15 = vcmp.eq.f32.partialorder %v8756_v59, 0.0 }
 0x935   :  { %vm4687_vm12 = vcmask 517504  }
 0x939   :  { %v3444_v55 = vpop.f32.mrf.mxu1 }
 0x93b   :  { %v5819_v12 = vpop.f32.mrf.mxu1 }
 0x93c   :  { %v4641_v12 = vand.u32 2147483648, %v8749_v14 }
 0x941   :  { %v3357_v9 = vpop.f32.mrf.mxu0 }
 0x942   :  { %v3358_v15 = vadd.f32 %v3357_v9, %v3239_v17  ;;  %v4671_v17 = vand.u32 2147483648, %v8756_v59  ;;  %v8878_v9 = vand.u32 4294901760, %v8483_v48 }
 0x943   :  { %v5784_v58 = vpop.f32.mrf.mxu0 }
 0x944   :  { %v8726_v62 = vadd.f32 %v3444_v55, %v3358_v15  ;;  %v8905_v58 = vsub.f32 %v8483_v48, %v8878_v9 }
 0x946   :  { %v8730_v13 = vmul.f32 %v8726_v62, %v8726_v62  ;;  %v3459_v6 = vsel %vm3457_vm11, %v8726_v62, 0 }
 0x947   :  { %v8735_v20 = vand.u32 4294901760, %v3459_v6 }
 0x948   :  { %4691 = vrot.lane.b32.xlu1 %v8730_v13, %s6098_s26 }
 0x949   :  { %v3535_v27 = vsub.f32 %v3459_v6, %v8735_v20  ;;  %5856 = vmatmul.mubr.f32.vlgmr.msra.gmra.mxu1 %v8735_v20  ;;  %v4604_v6 = vsel %vm4577_vm8, %v8412_v54, 0.0 }
 0x94a   :  { %5878 = vmatpush3.msra.mxu1 %v8599_v25  ;;  %5893 = vmatprep.mubr.msk.f32.mxu1 %vm6101_vm1, %v9585_v36 }
 0x94b   :  { %5879 = vmatprep.subr.mxu1 %v9585_v36  ;;  %v3536_v50 = vand.u32 4294901760, %v3535_v27 }
 0x94c   :  { %5880 = vmatpush3.msra.mxu1 %v8608_v31  ;;  %4599 = vrot.lane.b32.xlu1 %v4598_v34, %s6102_s23 }
 0x94d   :  { %5881 = vmatprep.subr.mxu1 %v9585_v36  ;;  %v3537_v30 = vsub.f32 %v3535_v27, %v3536_v50 }
 0x94e   :  { %5882 = vmatpush3.msra.mxu1 %v8617_v45 }
 0x94f   :  { %5883 = vmatprep.subr.mxu1 %v9585_v36  ;;  %v3538_v11 = vand.u32 4294901760, %v3537_v30 }
 0x950   :  { %5884 = vmatpush3.msra.mxu1 %v8624_v51 }
 0x951   :  { %5885 = vmatprep.subr.mxu1 %v9585_v36  ;;  %5837 = vmatmul.mubr.f32.vlgmr.msra.gmra.mxu0 %v3538_v11 }
 0x952   :  { %5859 = vmatpush3.msra.mxu0 %v8660_v52  ;;  %5886 = vmatpush3.msra.mxu1 %v8631_v21 }
 0x953   :  { %5860 = vmatprep.subr.mxu0 %v9585_v36  ;;  %5887 = vmatprep.subr.mxu1 %v9585_v36 }
 0x954   :  { %5861 = vmatpush3.msra.mxu0 %v8663_v46  ;;  %5888 = vmatpush3.msra.mxu1 %v8638_v5 }
 0x955   :  { %5862 = vmatprep.subr.mxu0 %v9585_v36  ;;  %5889 = vmatprep.subr.mxu1 %v9585_v36 }
 0x956   :  { %5863 = vmatpush3.msra.mxu0 %v8667_v2  ;;  %5890 = vmatpush3.msra.mxu1 %v8645_v7 }
 0x957   :  { %5864 = vmatprep.subr.mxu0 %v9585_v36  ;;  %5891 = vmatprep.subr.mxu1 %v9585_v36 }
 0x958   :  { %5865 = vmatpush3.msra.mxu0 %v8671_v43  ;;  %5892 = vmatpush3.msra.mxu1 %v8652_v44 }
 0x959   :  { %5866 = vmatprep.subr.mxu0 %v9585_v36  ;;  %5894 = vmatmul.mubr.f32.vlgmr.msra.gmra.mxu1 %v3536_v50 }
 0x95a   :  { %5915 = vmatprep.subr.mxu1 %v9585_v36  ;;  %5867 = vmatpush3.msra.mxu0 %v8675_v39 }
 0x95b   :  { %5916 = vmatpush3.msra.mxu1 %v8599_v25  ;;  %5868 = vmatprep.subr.mxu0 %v9585_v36  ;;  %v8797_v25 = vand.u32 4294901760, %v8439_v35 }
 0x95c   :  { %5917 = vmatprep.subr.mxu1 %v9585_v36  ;;  %5869 = vmatpush3.msra.mxu0 %v8682_v57 }
 0x95d   :  { %5918 = vmatpush3.msra.mxu1 %v8608_v31  ;;  %5870 = vmatprep.subr.mxu0 %v9585_v36  ;;  %v8803_v31 = vsub.f32 %v8435_v24, %v8784_v3  ;;  %v8819_v24 = vsub.f32 %v8439_v35, %v8797_v25  ;;  %v4138_v35 = vsub.f32 %v8790_v63, %v4137_v10 }
 0x95e   :  { %5919 = vmatprep.subr.mxu1 %v9585_v36  ;;  %5871 = vmatpush3.msra.mxu0 %v8689_v0  ;;  %v4186_v0 = vand.u32 4294901760, %v8905_v58 }
 0x95f   :  { %5920 = vmatpush3.msra.mxu1 %v8617_v45  ;;  %5872 = vmatprep.subr.mxu0 %v9585_v36  ;;  %v6073_v45 = vpop.eup %6072  ;;  %v4144_v55 = vand.u32 4294901760, %v8803_v31  ;;  %v4151_v46 = vand.u32 4294901760, %v8819_v24 }
 0x960   :  { %5921 = vmatprep.subr.mxu1 %v9585_v36  ;;  %5873 = vmatpush3.msra.mxu0 %v8697_v8  ;;  %v4667_v52 = vmul.f32 %v6073_v45, %v8756_v59 }
 0x961   :  { %5874 = vmatprep.mubr.msk.f32.mxu0 %vm6101_vm1, %v9585_v36  ;;  %5922 = vmatpush3.msra.mxu1 %v8624_v51  ;;  %v8825_v51 = vand.u32 4294901760, %v8455_v60  ;;  %v4145_v2 = vsub.f32 %v8803_v31, %v4144_v55 }
 0x962   :  { %5875 = vmatmul.mubr.f32.vlgmr.msra.gmra.mxu0 %v3535_v27  ;;  %5896 = vmatprep.subr.mxu0 %v9585_v36 }
 0x963   :  { %5923 = vmatprep.subr.mxu1 %v9585_v36  ;;  %5897 = vmatpush3.msra.mxu0 %v3563_v47  ;;  %v8841_v47 = vand.u32 4294901760, %v8467_v29  ;;  %v4146_v4 = vand.u32 4294901760, %v4145_v2 }
 0x964   :  { %5924 = vmatpush3.msra.mxu1 %v8631_v21  ;;  %5898 = vmatprep.subr.mxu0 %v9585_v36  ;;  %v8838_v21 = vsub.f32 %v8451_v42, %v8811_v49  ;;  %v4642_v42 = vsel %vm4640_vm13, %v4641_v12, %v4639_v23 }
 0x965   :  { %5925 = vmatprep.subr.mxu1 %v9585_v36  ;;  %5899 = vmatpush3.msra.mxu0 %v3570_v16  ;;  %v8859_v16 = vand.u32 4294901760, %v8471_v32  ;;  %v4643_v15 = vmax.f32 %v4642_v42, 1e-12 }
 0x966   :  { %5926 = vmatpush3.msra.mxu1 %v8638_v5  ;;  %5900 = vmatprep.subr.mxu0 %v9585_v36  ;;  %v8856_v5 = vsub.f32 %v8455_v60, %v8825_v51  ;;  %v4158_v41 = vand.u32 4294901760, %v8838_v21  ;;  %v8871_v60 = vsub.f32 %v8467_v29, %v8841_v47  ;;  %v4152_v29 = vsub.f32 %v8819_v24, %v4151_v46 }
 0x967   :  { %5927 = vmatprep.subr.mxu1 %v9585_v36  ;;  %5901 = vmatpush3.msra.mxu0 %v3577_v22  ;;  %v4669_v22 = vsel %vm4668_vm14, %v8756_v59, %v4667_v52  ;;  %6074 = vrcp.f32 %v4643_v15 }
 0x968   :  { %5928 = vmatpush3.msra.mxu1 %v8645_v7  ;;  %5902 = vmatprep.subr.mxu0 %v9585_v36  ;;  %v4139_v7 = vand.u32 4294901760, %v4138_v35  ;;  %v4672_v43 = vsel %vm4670_vm15, %v4671_v17, %v4669_v22  ;;  %v4159_v39 = vsub.f32 %v8838_v21, %v4158_v41  ;;  %v4153_v57 = vand.u32 4294901760, %v4152_v29 }
 0x969   :  { %5929 = vmatprep.subr.mxu1 %v9585_v36  ;;  %5903 = vmatpush3.msra.mxu0 %v3584_v18  ;;  %v8893_v18 = vsub.f32 %v8471_v32, %v8859_v16  ;;  %v4673_v32 = vmax.f32 %v4672_v43, 1e-12 }
 0x96a   :  { %5930 = vmatpush3.msra.mxu1 %v8652_v44  ;;  %5931 = vmatprep.mubr.msk.f32.mxu1 %vm6101_vm1, %v9585_v36  ;;  %v4165_v44 = vand.u32 4294901760, %v8856_v5  ;;  %v4160_v61 = vand.u32 4294901760, %v4159_v39 }
 0x96b   :  { %5904 = vmatprep.subr.mxu0 %v9585_v36  ;;  %5932 = vmatmul.mubr.f32.vlgmr.msra.gmra.mxu1 %v8735_v20  ;;  %v4179_v48 = vand.u32 4294901760, %v8893_v18  ;;  %6076 = vrcp.f32 %v4673_v32 }
 0x96c   :  { %5905 = vmatpush3.msra.mxu0 %v3591_v1  ;;  %5912 = vmatprep.mubr.msk.f32.mxu0 %vm6101_vm1, %v9585_v36  ;;  %v4172_v1 = vand.u32 4294901760, %v8871_v60 }
 0x96d   :  { %5906 = vmatprep.subr.mxu0 %v9585_v36  ;;  %5953 = vmatprep.subr.mxu1 %v9585_v36 }
 0x96e   :  { %5907 = vmatpush3.msra.mxu0 %v3598_v38  ;;  %5954 = vmatpush3.msra.mxu1 %v4139_v7  ;;  %v4166_v38 = vsub.f32 %v8856_v5, %v4165_v44  ;;  %v4173_v54 = vsub.f32 %v8871_v60, %v4172_v1 }
 0x96f   :  { %5908 = vmatprep.subr.mxu0 %v9585_v36  ;;  %5955 = vmatprep.subr.mxu1 %v9585_v36 }
 0x970   :  { %5909 = vmatpush3.msra.mxu0 %v3605_v53  ;;  %4605 = vadd.xlane.f32.xlu1 %v4604_v6  ;;  %v4719_v53 = vsel %vm27_vm0, %v8730_v13, 0.0  ;;  %v4167_v8 = vand.u32 4294901760, %v4166_v38  ;;  %v4187_v13 = vsub.f32 %v8905_v58, %v4186_v0 }
 0x971   :  { %5910 = vmatprep.subr.mxu0 %v9585_v36  ;;  %5956 = vmatpush3.msra.mxu1 %v4146_v4 }
 0x972   :  { %5911 = vmatpush3.msra.mxu0 %v3612_v33  ;;  %5957 = vmatprep.subr.mxu1 %v9585_v36  ;;  %v4180_v33 = vsub.f32 %v8893_v18, %v4179_v48  ;;  %v4188_v34 = vand.u32 4294901760, %v4187_v13 }
 0x973   :  { %5913 = vmatmul.mubr.f32.vlgmr.msra.gmra.mxu0 %v8735_v20  ;;  %5934 = vmatprep.subr.mxu0 %v9585_v36  ;;  %v4174_v20 = vand.u32 4294901760, %v4173_v54 }
 0x974   :  { %4720 = vadd.xlane.f32.xlu1 %v4719_v53  ;;  %5935 = vmatpush3.msra.mxu0 %v8775_v26  ;;  %v4181_v27 = vand.u32 4294901760, %v4180_v33  ;;  %v6075_v50 = vpop.eup %6074 }
 0x975   :  { %5936 = vmatprep.subr.mxu0 %v9585_v36  ;;  %5958 = vmatpush3.msra.mxu1 %v4153_v57  ;;  %v4645_v30 = vmul.f32 %v6075_v50, %v9602_v28 }
 0x976   :  { %5937 = vmatpush3.msra.mxu0 %v8784_v3  ;;  %5959 = vmatprep.subr.mxu1 %v9585_v36 }
 0x977   :  { %5938 = vmatprep.subr.mxu0 %v9585_v36  ;;  %5960 = vmatpush3.msra.mxu1 %v4160_v61  ;;  %v4653_v28 = vrot.slane %v4645_v30, %v9603_v37  ;;  %v3456_v30 = vld [vmem:[%s9115_s6 + $0x4] ss:$0 sm:$0xff] }
 0x978   :  { %5939 = vmatpush3.msra.mxu0 %v8797_v25  ;;  %5961 = vmatprep.subr.mxu1 %v9585_v36  ;;  %v6077_v14 = vpop.eup %6076 }
 0x979   :  { %5940 = vmatprep.subr.mxu0 %v9585_v36  ;;  %5962 = vmatpush3.msra.mxu1 %v4167_v8  ;;  %v4675_v11 = vmul.f32 %v6077_v14, %v8406_v19 }
 0x97a   :  { %5941 = vmatpush3.msra.mxu0 %v8811_v49  ;;  %5963 = vmatprep.subr.mxu1 %v9585_v36 }
 0x97b   :  { %5942 = vmatprep.subr.mxu0 %v9585_v36  ;;  %5964 = vmatpush3.msra.mxu1 %v4174_v20  ;;  %v4683_v59 = vrot.slane %v4675_v11, %v9603_v37 }
 0x97c   :  { %5943 = vmatpush3.msra.mxu0 %v8825_v51  ;;  %5965 = vmatprep.subr.mxu1 %v9585_v36 }
 0x97d   :  { %5944 = vmatprep.subr.mxu0 %v9585_v36  ;;  %5966 = vmatpush3.msra.mxu1 %v4181_v27 }
 0x97e   :  { %5945 = vmatpush3.msra.mxu0 %v8841_v47  ;;  %5967 = vmatprep.subr.mxu1 %v9585_v36 }
 0x97f   :  { %5946 = vmatprep.subr.mxu0 %v9585_v36  ;;  %5968 = vmatpush3.msra.mxu1 %v4188_v34 }
 0x980   :  { %5947 = vmatpush3.msra.mxu0 %v8859_v16  ;;  %5969 = vmatprep.mubr.msk.f32.mxu1 %vm6101_vm1, %v9585_v36 }
 0x981   :  { %5948 = vmatprep.subr.mxu0 %v9585_v36  ;;  %5991 = vmatprep.subr.mxu1 %v9585_v36 }
 0x982   :  { %5949 = vmatpush3.msra.mxu0 %v8878_v9  ;;  %5950 = vmatprep.mubr.msk.f32.mxu0 %vm6101_vm1, %v9585_v36 }
 0x983   :  { %5972 = vmatprep.subr.mxu0 %v9585_v36 }
 0x985   :  { %4654 = vrot.lane.b32.xlu1 %v4653_v28, %s6106_s21 }
 0x989   :  { %4684 = vrot.lane.b32.xlu1 %v4683_v59, %s6099_s28 }
 0x9ba   :  { %v4692_v40 = vpop.permute.xlu1 %4691 }
 0x9bb   :  { %v4694_v56 = vsel %vm27_vm0, %v4692_v40, 0.0 }
 0x9bc   :  { %4695 = vadd.xlane.f32.xlu0 %v4694_v56 }
 0x9be   :  { %v4600_v45 = vpop.permute.xlu1 %4599 }
 0x9bf   :  { %4602 = vst.msk [vmem:[%s9121_s7] sm:$0x3] %vm4577_vm8, %v4600_v45 }
 0x9f9   :  { %v4606_v23 = vpop.xlane.xlu1 %4605 }
 0x9fa   :  { %6078 = vrsqrt.f32 %v4606_v23  ;;  %vm4609_vm2 = vcmp.eq.f32.partialorder %v4606_v23, inf  ;;  %v4612_v42 = vand.u32 2147483648, %v4606_v23  ;;  %vm4611_vm6 = vcmp.eq.f32.partialorder %v4606_v23, 0.0 }
 0x9fd   :  { %v4721_v52 = vpop.xlane.xlu1 %4720 }
 0x9fe   :  { %6080 = vrsqrt.f32 %v4721_v52  ;;  %vm4724_vm0 = vcmp.eq.f32.partialorder %v4721_v52, inf  ;;  %v4727_v4 = vand.u32 2147483648, %v4721_v52  ;;  %vm4726_vm7 = vcmp.eq.f32.partialorder %v4721_v52, 0.0 }
 0xa07   :  { %v6079_v35 = vpop.eup %6078 }
 0xa08   :  { %v4608_v12 = vmul.f32 %v6079_v35, %v4606_v23 }
 0xa09   :  { %v3651_v2 = vpop.f32.mrf.mxu1 }
 0xa0a   :  { %v4610_v22 = vsel %vm4609_vm2, %v4606_v23, %v4608_v12 }
 0xa0b   :  { %v6081_v7 = vpop.eup %6080  ;;  %v4613_v17 = vsel %vm4611_vm6, %v4612_v42, %v4610_v22  ;;  %v5857_v15 = vpop.f32.mrf.mxu1 }
 0xa0c   :  { %v4614_v43 = vmax.f32 %v4613_v17, 1e-12  ;;  %v4723_v29 = vmul.f32 %v6081_v7, %v4721_v52 }
 0xa0e   :  { %6082 = vrcp.f32 %v4614_v43  ;;  %v4725_v39 = vsel %vm4724_vm0, %v4721_v52, %v4723_v29 }
 0xa0f   :  { %v4728_v32 = vsel %vm4726_vm7, %v4727_v4, %v4725_v39 }
 0xa10   :  { %v4729_v6 = vmax.f32 %v4728_v32, 1e-12 }
 0xa11   :  { %v3540_v57 = vpop.f32.mrf.mxu0 }
 0xa12   :  { %6084 = vrcp.f32 %v4729_v6  ;;  %v3541_v14 = vadd.f32 %v3540_v57, %v3456_v30 }
 0xa13   :  { %v5838_v38 = vpop.f32.mrf.mxu0 }
 0xa19   :  { %v3820_v61 = vpop.f32.mrf.mxu1 }
 0xa1b   :  { %v6083_v54 = vpop.eup %6082  ;;  %v5895_v53 = vpop.f32.mrf.mxu1 }
 0xa1c   :  { %v4616_v8 = vmul.f32 %v6083_v54, %v8406_v19  ;;  %v3652_v19 = vadd.f32 %v3651_v2, %v3541_v14 }
 0xa1e   :  { %v4624_v33 = vrot.slane %v4616_v8, %v9603_v37 }
 0xa1f   :  { %v6085_v20 = vpop.eup %6084 }
 0xa20   :  { %4625 = vrot.lane.b32.xlu0 %v4624_v33, %s6107_s25  ;;  %v4731_v13 = vmul.f32 %v6085_v20, %v8726_v62 }
 0xa22   :  { %v3739_v27 = vpop.f32.mrf.mxu0  ;;  %v4739_v34 = vrot.slane %v4731_v13, %v9603_v37 }
 0xa23   :  { %v3740_v59 = vadd.f32 %v3739_v27, %v3652_v19 }
 0xa24   :  { %v5876_v50 = vpop.f32.mrf.mxu0  ;;  %4740 = vrot.lane.b32.xlu1 %v4739_v34, %s6098_s26 }
 0xa25   :  { %v3821_v40 = vadd.f32 %v3820_v61, %v3740_v59 }
 0xa2b   :  { %v3994_v28 = vpop.f32.mrf.mxu1 }
 0xa2d   :  { %v5933_v11 = vpop.f32.mrf.mxu1 }
 0xa33   :  { %v3915_v56 = vpop.f32.mrf.mxu0 }
 0xa34   :  { %v3916_v45 = vadd.f32 %v3915_v56, %v3821_v40 }
 0xa35   :  { %v5914_v23 = vpop.f32.mrf.mxu0 }
 0xa36   :  { %v3995_v52 = vadd.f32 %v3994_v28, %v3916_v45 }
 0xa38   :  { %v3998_v35 = vmax.f32 %v3995_v52, 0.0 }
 0xa3a   :  { %v4033_v12 = vsel %vm3457_vm11, %v3998_v35, 0  ;;  %vm4657_vm11 = vcmask 386304  }
 0xa3b   :  { %v8980_v42 = vand.u32 4294901760, %v4033_v12 }
 0xa3d   :  { %v4109_v22 = vsub.f32 %v4033_v12, %v8980_v42  ;;  %5970 = vmatmul.mubr.f32.vlgmr.msra.gmra.mxu1 %v8980_v42 }
 0xa3e   :  { %5992 = vmatpush3.msra.mxu1 %v8775_v26  ;;  %6007 = vmatprep.mubr.msk.f32.mxu1 %vm6101_vm1, %v9585_v36 }
 0xa3f   :  { %5993 = vmatprep.subr.mxu1 %v9585_v36  ;;  %v4110_v2 = vand.u32 4294901760, %v4109_v22 }
 0xa40   :  { %5994 = vmatpush3.msra.mxu1 %v8784_v3 }
 0xa41   :  { %5995 = vmatprep.subr.mxu1 %v9585_v36  ;;  %v4111_v7 = vsub.f32 %v4109_v22, %v4110_v2 }
 0xa42   :  { %5996 = vmatpush3.msra.mxu1 %v8797_v25 }
 0xa43   :  { %5997 = vmatprep.subr.mxu1 %v9585_v36  ;;  %v4112_v17 = vand.u32 4294901760, %v4111_v7 }
 0xa44   :  { %5998 = vmatpush3.msra.mxu1 %v8811_v49 }
 0xa45   :  { %5999 = vmatprep.subr.mxu1 %v9585_v36  ;;  %5951 = vmatmul.mubr.f32.vlgmr.msra.gmra.mxu0 %v4112_v17  ;;  %v4696_v15 = vpop.xlane.xlu0 %4695 }
 0xa46   :  { %5973 = vmatpush3.msra.mxu0 %v8790_v63  ;;  %6000 = vmatpush3.msra.mxu1 %v8825_v51  ;;  %6086 = vrsqrt.f32 %v4696_v15  ;;  %vm4699_vm9 = vcmp.eq.f32.partialorder %v4696_v15, inf  ;;  %v4702_v29 = vand.u32 2147483648, %v4696_v15  ;;  %vm4701_vm10 = vcmp.eq.f32.partialorder %v4696_v15, 0.0 }
 0xa47   :  { %5974 = vmatprep.subr.mxu0 %v9585_v36  ;;  %6001 = vmatprep.subr.mxu1 %v9585_v36 }
 0xa48   :  { %5975 = vmatpush3.msra.mxu0 %v8803_v31  ;;  %6002 = vmatpush3.msra.mxu1 %v8841_v47 }
 0xa49   :  { %5976 = vmatprep.subr.mxu0 %v9585_v36  ;;  %6003 = vmatprep.subr.mxu1 %v9585_v36 }
 0xa4a   :  { %5977 = vmatpush3.msra.mxu0 %v8819_v24  ;;  %6004 = vmatpush3.msra.mxu1 %v8859_v16  ;;  %v4655_v24 = vpop.permute.xlu1 %4654 }
 0xa4b   :  { %5978 = vmatprep.subr.mxu0 %v9585_v36  ;;  %6005 = vmatprep.subr.mxu1 %v9585_v36 }
 0xa4c   :  { %5979 = vmatpush3.msra.mxu0 %v8838_v21  ;;  %6006 = vmatpush3.msra.mxu1 %v8878_v9 }
 0xa4d   :  { %5980 = vmatprep.subr.mxu0 %v9585_v36  ;;  %6008 = vmatmul.mubr.f32.vlgmr.msra.gmra.mxu1 %v4110_v2 }
 0xa4e   :  { %6029 = vmatprep.subr.mxu1 %v9585_v36  ;;  %5981 = vmatpush3.msra.mxu0 %v8856_v5 }
 0xa4f   :  { %6030 = vmatpush3.msra.mxu1 %v8775_v26  ;;  %5982 = vmatprep.subr.mxu0 %v9585_v36 }
 0xa50   :  { %6031 = vmatprep.subr.mxu1 %v9585_v36  ;;  %5983 = vmatpush3.msra.mxu0 %v8871_v60 }
 0xa51   :  { %6032 = vmatpush3.msra.mxu1 %v8784_v3  ;;  %5984 = vmatprep.subr.mxu0 %v9585_v36 }
 0xa52   :  { %6033 = vmatprep.subr.mxu1 %v9585_v36  ;;  %5985 = vmatpush3.msra.mxu0 %v8893_v18 }
 0xa53   :  { %v6087_v43 = vpop.eup %6086  ;;  %6034 = vmatpush3.msra.mxu1 %v8797_v25  ;;  %5986 = vmatprep.subr.mxu0 %v9585_v36 }
 0xa54   :  { %v4698_v26 = vmul.f32 %v6087_v43, %v4696_v15  ;;  %6035 = vmatprep.subr.mxu1 %v9585_v36  ;;  %5987 = vmatpush3.msra.mxu0 %v8905_v58 }
 0xa55   :  { %5988 = vmatprep.mubr.msk.f32.mxu0 %vm6101_vm1, %v9585_v36  ;;  %6036 = vmatpush3.msra.mxu1 %v8811_v49  ;;  %v4750_v49 = vrot.slane %v8726_v62, %v9603_v37 }
 0xa56   :  { %v4700_v3 = vsel %vm4699_vm9, %v4696_v15, %v4698_v26  ;;  %5989 = vmatmul.mubr.f32.vlgmr.msra.gmra.mxu0 %v4109_v22  ;;  %6010 = vmatprep.subr.mxu0 %v9585_v36 }
 0xa57   :  { %v4703_v25 = vsel %vm4701_vm10, %v4702_v29, %v4700_v3  ;;  %6037 = vmatprep.subr.mxu1 %v9585_v36  ;;  %6011 = vmatpush3.msra.mxu0 %v4137_v10 }
 0xa58   :  { %v4704_v4 = vmax.f32 %v4703_v25, 1e-12  ;;  %6038 = vmatpush3.msra.mxu1 %v8825_v51  ;;  %6012 = vmatprep.subr.mxu0 %v9585_v36 }
 0xa59   :  { %6039 = vmatprep.subr.mxu1 %v9585_v36  ;;  %6013 = vmatpush3.msra.mxu0 %v4144_v55  ;;  %v4685_v55 = vpop.permute.xlu1 %4684 }
 0xa5a   :  { %6088 = vrcp.f32 %v4704_v4  ;;  %6040 = vmatpush3.msra.mxu1 %v8841_v47  ;;  %6014 = vmatprep.subr.mxu0 %v9585_v36 }
 0xa5b   :  { %6041 = vmatprep.subr.mxu1 %v9585_v36  ;;  %6015 = vmatpush3.msra.mxu0 %v4151_v46 }
 0xa5c   :  { %6042 = vmatpush3.msra.mxu1 %v8859_v16  ;;  %6016 = vmatprep.subr.mxu0 %v9585_v36 }
 0xa5d   :  { %6043 = vmatprep.subr.mxu1 %v9585_v36  ;;  %6017 = vmatpush3.msra.mxu0 %v4158_v41 }
 0xa5e   :  { %6044 = vmatpush3.msra.mxu1 %v8878_v9  ;;  %6045 = vmatprep.mubr.msk.f32.mxu1 %vm6101_vm1, %v9585_v36 }
 0xa5f   :  { %6018 = vmatprep.subr.mxu0 %v9585_v36  ;;  %6046 = vmatmul.mubr.f32.vlgmr.msra.gmra.mxu1 %v8980_v42 }
 0xa60   :  { %6019 = vmatpush3.msra.mxu0 %v4165_v44  ;;  %6026 = vmatprep.mubr.msk.f32.mxu0 %vm6101_vm1, %v9585_v36  ;;  %vm4628_vm1 = vcmask 255104  }
 0xa61   :  { %6020 = vmatprep.subr.mxu0 %v9585_v36 }
 0xa62   :  { %6021 = vmatpush3.msra.mxu0 %v4172_v1  ;;  %v3999_v1 = vld [vmem:[%s9115_s6 + $0x5] ss:$0 sm:$0xff] }
 0xa63   :  { %6022 = vmatprep.subr.mxu0 %v9585_v36 }
 0xa64   :  { %6023 = vmatpush3.msra.mxu0 %v4179_v48 }
 0xa65   :  { %6024 = vmatprep.subr.mxu0 %v9585_v36 }
 0xa66   :  { %6025 = vmatpush3.msra.mxu0 %v4186_v0 }
 0xa67   :  { %v6089_v63 = vpop.eup %6088  ;;  %6027 = vmatmul.mubr.f32.vlgmr.msra.gmra.mxu0 %v8980_v42 }
 0xa68   :  { %v4706_v31 = vmul.f32 %v6089_v63, %v8726_v62 }
 0xa6a   :  { %v4714_v10 = vrot.slane %v4706_v31, %v9603_v37 }
 0xa6c   :  { %4715 = vrot.lane.b32.xlu0 %v4714_v10, %s6099_s28 }
 0xa70   :  { %4751 = vrot.lane.b32.xlu0 %v4750_v49, %s6102_s23 }
 0xa92   :  { %v4626_v51 = vpop.permute.xlu0 %4625 }
 0xa93   :  { %4629 = vst.msk [vmem:[%s9121_s7] sm:$0x3] %vm4628_vm1, %v4626_v51 }
 0xa94   :  { %4658 = vst.msk [vmem:[%s9121_s7] sm:$0x3] %vm4657_vm11, %v4655_v24 }
 0xa95   :  { %4688 = vst.msk [vmem:[%s9121_s7] sm:$0x3] %vm4687_vm12, %v4685_v55 }
 0xa96   :  { %v4741_v21 = vpop.permute.xlu1 %4740 }
 0xade   :  { %v4716_v62 = vpop.permute.xlu0 %4715 }
 0xadf   :  { %4718 = vst.msk [vmem:[%s9121_s7] sm:$0x3] %vm759_vm4, %v4716_v62 }
 0xae0   :  { %4743 = vst.msk [vmem:[%s9121_s7] sm:$0x3] %vm774_vm5, %v4741_v21 }
 0xae2   :  { %v4752_v47 = vpop.permute.xlu0 %4751 }
 0xae3   :  { %4754 = vst.msk [vmem:[%s9121_s7 + $0x2] sm:$0x3] %vm4577_vm8, %v4752_v47 }
 0xae4   :  { %4755 = vst.msk [vmem:[%s9121_s7 + $0x2] sm:$0x3] %vm4628_vm1, %v4752_v47 }
 0xafd   :  { %v4225_v46 = vpop.f32.mrf.mxu1 }
 0xaff   :  { %v5971_v5 = vpop.f32.mrf.mxu1 }
 0xb05   :  { %v4114_v16 = vpop.f32.mrf.mxu0 }
 0xb06   :  { %v4115_v58 = vadd.f32 %v4114_v16, %v3999_v1 }
 0xb07   :  { %v5952_v41 = vpop.f32.mrf.mxu0 }
 0xb08   :  { %v4226_v0 = vadd.f32 %v4225_v46, %v4115_v58 }
 0xb0d   :  { %v4394_v60 = vpop.f32.mrf.mxu1 }
 0xb0f   :  { %v6009_v9 = vpop.f32.mrf.mxu1 }
 0xb16   :  { %v4313_v44 = vpop.f32.mrf.mxu0 }
 0xb17   :  { %v4314_v32 = vadd.f32 %v4313_v44, %v4226_v0 }
 0xb18   :  { %v5990_v18 = vpop.f32.mrf.mxu0 }
 0xb19   :  { %v4395_v6 = vadd.f32 %v4394_v60, %v4314_v32 }
 0xb1f   :  { %v4568_v48 = vpop.f32.mrf.mxu1 }
 0xb21   :  { %v6047_v39 = vpop.f32.mrf.mxu1 }
 0xb27   :  { %v4489_v57 = vpop.f32.mrf.mxu0 }
 0xb28   :  { %v4490_v38 = vadd.f32 %v4489_v57, %v4395_v6 }
 0xb29   :  { %v6028_v61 = vpop.f32.mrf.mxu0 }
 0xb2a   :  { %v4569_v54 = vadd.f32 %v4568_v48, %v4490_v38 }
 0xb2c   :  { %v4763_v53 = vrot.slane %v4569_v54, %v9603_v37 }
 0xb2e   :  { %4764 = vrot.lane.b32.xlu1 %v4763_v53, %s6099_s28 }
 0xba0   :  { %v4765_v8 = vpop.permute.xlu1 %4764 }
 0xba1   :  { %4767 = vst.msk [vmem:[%s9121_s7 + $0x2] sm:$0x3] %vm4657_vm11, %v4765_v8 }
 0xba2   :  { %4768 = vst.msk [vmem:[%s9121_s7 + $0x2] sm:$0x3] %vm4687_vm12, %v4765_v8 }
 0xba3   :  { %4769 = vst.msk [vmem:[%s9121_s7 + $0x2] sm:$0x3] %vm82_vm3, %v9585_v36 }

</bundles_post_ra>
